<compile_context>
chip_gen: v7x
topology: tpu7x:2x2x1
jax: 0.10.0
libtpu: 0.0.40
codegen_flags: <defaults>
</compile_context>

<pallas_src>
import jax
import jax.numpy as jnp
from jax import lax
from jax.experimental import pallas as pl
from jax.experimental.pallas import tpu as pltpu


def _round_up(x, m):
    return (x + m - 1) // m * m


def _default_bf16_epilogue():
    """bf16 bias+ReLU+pool on chips with a bf16 VPU (v6e/v7x); f32 elsewhere."""
    try:
        kind = jax.devices()[0].device_kind.lower()
    except Exception:
        return False
    if any(old in kind for old in ("v2", "v3", "v4", "v5")):
        return False
    return ("v6" in kind) or ("v7" in kind)


# ----------------------------------------------------------------------------
# XLA glue: squared distances, ball query, gathers (data-dependent indexing).
# sqrt is dropped everywhere: FPS argmax and the radius test are monotone in d^2.
# ----------------------------------------------------------------------------
def _sq_dists(points1, points2):
    d = (jnp.sum(points1 ** 2, axis=-1)[:, :, None]
         + jnp.sum(points2 ** 2, axis=-1)[:, None, :]
         - 2.0 * jnp.einsum("bmc,bnc->bmn", points1, points2))
    return jnp.maximum(d, 0.0)


def ball_query(xyz, new_xyz, radius, K):
    # K lowest-indexed in-radius neighbors; first index back-fills short groups
    # (matches the torch reference: sort of masked indices, take first K).
    # TODO(synk): fuse into a Pallas kernel (tiled d^2 + first-K select) so the
    # (B, M, N) distance matrix is never materialized in HBM.
    B, N, _ = xyz.shape
    d2 = _sq_dists(new_xyz, xyz)                                  # (B, M, N)
    idx = jnp.broadcast_to(jnp.arange(N, dtype=jnp.int32), d2.shape)
    idx = jnp.where(d2 > radius * radius, N, idx)
    neg_vals, _ = lax.top_k(-idx, K)                              # K smallest indices
    inds = -neg_vals
    min_inds = inds[:, :, :1]
    return jnp.where(inds == N, min_inds, inds)                   # (B, M, K)


def gather_points(points, inds):
    B = points.shape[0]
    batch = jnp.arange(B).reshape((B,) + (1,) * (inds.ndim - 1))
    return points[batch, inds]


def _gather_channels_first(points_t, inds_t):
    """points_t: (B, C, N), inds_t: (B, K, M) -> (B, K, C, M) (kernel layout)."""
    B, C, _ = points_t.shape
    b_idx = jnp.arange(B).reshape(B, 1, 1, 1)
    c_idx = jnp.arange(C).reshape(1, 1, C, 1)
    return points_t[b_idx, c_idx, inds_t[:, :, None, :]]


# ----------------------------------------------------------------------------
# Pallas FPS: xyz stays resident in VMEM across all M sequential steps.
# ----------------------------------------------------------------------------
def fps(xyz, M):
    """Farthest point sampling. xyz: (B, N, 3) f32 -> (B, M) int32 indices.
    Deterministic start index 0 (the torch reference seeds with randint)."""
    B, N, _ = xyz.shape
    xyz_t = jnp.swapaxes(xyz, 1, 2)                               # (B, 3, N)

    def kernel(xyz_ref, cent_ref, dists):
        lane_n = lax.broadcasted_iota(jnp.int32, (1, N), 1)
        lane_m = lax.broadcasted_iota(jnp.int32, (1, M), 1)
        dists[...] = jnp.full((1, N), 1e10, jnp.float32)          # squared-distance space

        def body(i, carry):
            ind, cents = carry
            cents = jnp.where(lane_m == i, ind, cents)            # record centroid i
            pts = xyz_ref[...]                                    # (3, N)
            sel = lane_n == ind
            cur = jnp.sum(jnp.where(sel, pts, 0.0), axis=1, keepdims=True)   # (3, 1)
            d2 = jnp.sum((pts - cur) ** 2, axis=0, keepdims=True)            # (1, N)
            dmin = jnp.minimum(dists[...], d2)
            dists[...] = dmin
            mx = jnp.max(dmin)
            ind = jnp.min(jnp.where(dmin == mx, lane_n, N)).astype(jnp.int32)
            return ind, cents

        _, cents = lax.fori_loop(
            0, M, body, (jnp.int32(0), jnp.zeros((1, M), jnp.int32)))
        cent_ref[...] = cents

    out = pl.pallas_call(
        kernel,
        out_shape=jax.ShapeDtypeStruct((B, 1, M), jnp.int32),
        grid=(B,),
        in_specs=[pl.BlockSpec((None, 3, N), lambda b: (b, 0, 0))],
        out_specs=pl.BlockSpec((None, 1, M), lambda b: (b, 0, 0)),
        scratch_shapes=[pltpu.VMEM((1, N), jnp.float32)],
        compiler_params=pltpu.CompilerParams(dimension_semantics=("parallel",)),
    )(xyz_t)
    return out[:, 0, :]                                           # (B, M)


# ----------------------------------------------------------------------------
# Pallas branch kernel: (1x1 conv [BN scale folded] -> shift -> ReLU)*L + pool
# over the K neighbors. Channels on sublanes, groups on lanes (lane-dense).
# ----------------------------------------------------------------------------
_INPUT_BLOCK_BYTES = 6 * 1024 * 1024    # bf16 input block budget (x2 when double-buffered)
_VMEM_LIMIT_BYTES = 32 * 1024 * 1024    # explicit scoped-VMEM limit (safe on v5e/v6e/v7x)


def _pick_tile(M, K, Cin, B):
    """Lane-dense groups-per-step tile (multiple of 128) within the VMEM budget,
    keeping >= 2 grid steps when possible so both v7x TensorCores get work."""
    M_pad = _round_up(M, 128)
    t = _INPUT_BLOCK_BYTES // max(K * Cin * 2, 1)
    t = max(128, min((t // 128) * 128, 2048))
    t = min(t, M_pad)
    if B * pl.cdiv(M_pad, t) < 2 and M_pad >= 256:
        t = _round_up(M_pad // 2, 128)
    M_pad = _round_up(M_pad, t)
    return M_pad, t


def _make_branch_kernel(num_layers, K, pooling, bf16_epilogue):
    def kernel(x_ref, *refs):
        out_ref = refs[-1]
        pooled = None
        for k in range(K):                                        # neighbors (static)
            h = x_ref[k]                                          # (Cin, tile) bf16
            for l in range(num_layers):
                w = refs[2 * l][...]                              # (Cout, Cin) bf16, BN scale folded
                s = refs[2 * l + 1][...]                          # (Cout, 1) shift
                h = jnp.dot(w, h, preferred_element_type=jnp.float32)
                if bf16_epilogue:
                    h = h.astype(jnp.bfloat16)
                h = jnp.maximum(h + s, 0.0)                       # BN shift + ReLU, lane-dense
                if (not bf16_epilogue) and (l + 1 < num_layers):
                    h = h.astype(jnp.bfloat16)                    # keep matmul inputs bf16
            if pooling == "avg":
                hf = h.astype(jnp.float32)
                pooled = hf if pooled is None else pooled + hf
            else:
                pooled = h if pooled is None else jnp.maximum(pooled, h)
        if pooling == "avg":
            pooled = pooled * (1.0 / K)
        out_ref[...] = pooled.astype(out_ref.dtype)               # (Cout, tile), lane-dense store
    return kernel


def run_branch(x_t, layer_params, pooling="max", bf16_epilogue=False):
    """x_t: (B, K, Cin, M) bf16 grouped features (channels-first).
    layer_params: [(W (Cout, Cin) bf16, BN scale folded; shift (Cout, 1) f32), ...].
    Returns pooled features (B, Cout_last, M) f32."""
    B, K, Cin, M = x_t.shape
    assert Cin == layer_params[0][0].shape[1]
    M_pad, tile = _pick_tile(M, K, Cin, B)
    if M_pad != M:
        x_t = jnp.pad(x_t, ((0, 0), (0, 0), (0, 0), (0, M_pad - M)))

    in_specs = [pl.BlockSpec((None, K, Cin, tile), lambda b, i: (b, 0, 0, i))]
    args = [x_t]
    for W, s in layer_params:
        co, ci = W.shape
        in_specs.append(pl.BlockSpec((co, ci), lambda b, i: (0, 0)))
        in_specs.append(pl.BlockSpec((co, 1), lambda b, i: (0, 0)))
        args += [W, s.astype(jnp.bfloat16) if bf16_epilogue else s]
    cout = layer_params[-1][0].shape[0]

    out = pl.pallas_call(
        _make_branch_kernel(len(layer_params), K, pooling, bf16_epilogue),
        out_shape=jax.ShapeDtypeStruct((B, cout, M_pad), jnp.float32),
        grid=(B, M_pad // tile),
        in_specs=in_specs,
        out_specs=pl.BlockSpec((None, cout, tile), lambda b, i: (b, 0, i)),
        compiler_params=pltpu.CompilerParams(
            dimension_semantics=("parallel", "parallel"),
            vmem_limit_bytes=_VMEM_LIMIT_BYTES),
    )(*args)
    return out[:, :, :M]                                          # drop padded groups


def _group_features(xyz_t, points_t, new_xyz_t, inds_t, use_xyz, cin_pad):
    """Channels-first grouped features (B, K, Cin_pad, M), materialized once in bf16."""
    feats = []
    if points_t is None or use_xyz:
        gxyz = _gather_channels_first(xyz_t, inds_t) - new_xyz_t[:, None, :, :]
        feats.append(gxyz.astype(jnp.bfloat16))
    if points_t is not None:
        feats.append(_gather_channels_first(points_t, inds_t))
    x_t = feats[0] if len(feats) == 1 else jnp.concatenate(feats, axis=2)
    cin = x_t.shape[2]
    if cin_pad > cin:
        x_t = jnp.pad(x_t, ((0, 0), (0, 0), (0, cin_pad - cin), (0, 0)))
    return x_t                                                    # (B, K, Cin_pad, M) bf16


# ----------------------------------------------------------------------------
# Module wrapper (eval-mode forward of the PyTorch module).
# ----------------------------------------------------------------------------
class PointNetSAModuleMSG:
    def __init__(self, M, radiuses, Ks, in_channels, mlps, key,
                 bn=True, pooling="max", use_xyz=True):
        self.M = M
        self.radiuses = radiuses
        self.Ks = Ks
        self.mlps = mlps
        self.pooling = pooling
        self.use_xyz = use_xyz
        self.in_channels = in_channels
        self.cin_pad = _round_up(in_channels, 8)   # pad odd Cin (e.g. 7 -> 8) with a zero channel
        self.bf16_epilogue = _default_bf16_epilogue()
        eps = 1e-5
        self.params = []   # per branch: [(W (Cout, Cin_pad) bf16, BN scale folded; shift (Cout, 1) f32)]
        for mlp in mlps:
            branch = []
            cin, cin_alloc = in_channels, self.cin_pad
            for cout in mlp:
                key, kw, kg, kb, km, kv = jax.random.split(key, 6)
                # Conv2d(cin, cout, 1, bias=False): weight (cout, cin, 1, 1) -> (cout, cin)
                W = 0.1 * jax.random.normal(kw, (cout, cin), dtype=jnp.float32)
                if bn:
                    gamma = jax.random.uniform(kg, (cout,), minval=0.5, maxval=1.5)
                    beta = 0.1 * jax.random.normal(kb, (cout,))
                    rmean = 0.1 * jax.random.normal(km, (cout,))
                    rvar = jax.random.uniform(kv, (cout,), minval=0.5, maxval=1.5)
                    scale = gamma / jnp.sqrt(rvar + eps)          # eval-mode BN
                    shift = beta - rmean * scale
                else:
                    scale = jnp.ones((cout,), jnp.float32)
                    shift = jnp.zeros((cout,), jnp.float32)
                Wf = W * scale[:, None]                           # fold BN scale into weight rows
                if cin_alloc > cin:
                    Wf = jnp.pad(Wf, ((0, 0), (0, cin_alloc - cin)))
                branch.append((Wf.astype(jnp.bfloat16),
                               shift.reshape(cout, 1).astype(jnp.float32)))
                cin, cin_alloc = cout, cout
            self.params.append(branch)

    def __call__(self, xyz, points=None):
        new_xyz = gather_points(xyz, fps(xyz, self.M))            # (B, M, 3)
        xyz_t = jnp.swapaxes(xyz, 1, 2)                           # (B, 3, N) f32 (small)
        new_xyz_t = jnp.swapaxes(new_xyz, 1, 2)                   # (B, 3, M) f32
        points_t = (jnp.swapaxes(points, 1, 2).astype(jnp.bfloat16)
                    if points is not None else None)
        # TODO(synk): fuse the neighbor gather itself into the branch kernel
        # (scalar-prefetched grouped_inds + manual make_async_copy row gather from
        # HBM-resident xyz/points) so the grouped tensor never hits HBM at all.
        outs = []
        for i in range(len(self.mlps)):
            inds = ball_query(xyz, new_xyz, self.radiuses[i], self.Ks[i])  # (B, M, K)
            inds_t = jnp.swapaxes(inds, 1, 2)                              # (B, K, M)
            x_t = _group_features(xyz_t, points_t, new_xyz_t, inds_t,
                                  self.use_xyz, self.cin_pad)
            y = run_branch(x_t, self.params[i], self.pooling, self.bf16_epilogue)
            outs.append(jnp.swapaxes(y, 1, 2))                             # (B, M, Cout)
        return new_xyz, jnp.concatenate(outs, axis=-1)


# ----------------------------------------------------------------------------
# Pure-JAX mirrors for correctness spot-checks.
# ----------------------------------------------------------------------------
def _branch_ref(x_t, layer_params, pooling="max", bf16_epilogue=False):
    """Mirror of the Pallas branch kernel (same dtype / rounding sequence)."""
    h = x_t                                                        # (B, K, Cin, M) bf16
    L = len(layer_params)
    for li, (W, s) in enumerate(layer_params):
        h = jnp.einsum("oc,bkcm->bkom", W, h, preferred_element_type=jnp.float32)
        s_use = s.astype(jnp.bfloat16) if bf16_epilogue else s
        if bf16_epilogue:
            h = h.astype(jnp.bfloat16)
        h = jnp.maximum(h + s_use[None, None], 0.0)
        if (not bf16_epilogue) and (li + 1 < L):
            h = h.astype(jnp.bfloat16)
    if pooling == "avg":
        return jnp.mean(h.astype(jnp.float32), axis=1)
    return jnp.max(h, axis=1).astype(jnp.float32)                  # (B, Cout, M)


def _fps_ref(xyz, M):
    B, N, _ = xyz.shape
    batch = jnp.arange(B)

    def body(i, carry):
        dists, inds, cents = carry
        cents = cents.at[:, i].set(inds)
        cur = xyz[batch, inds]                                     # (B, 3)
        d2 = jnp.sum((xyz - cur[:, None, :]) ** 2, axis=-1)        # (B, N)
        dists = jnp.minimum(dists, d2)
        inds = jnp.argmax(dists, axis=1).astype(jnp.int32)
        return dists, inds, cents

    init = (jnp.full((B, N), 1e10, jnp.float32),
            jnp.zeros((B,), jnp.int32),
            jnp.zeros((B, M), jnp.int32))
    return lax.fori_loop(0, M, body, init)[2]


if __name__ == "__main__":
    B, N, Cp = 2, 64, 4
    M = 16
    radiuses = [0.2, 0.4]
    Ks = [8, 16]
    mlps = [[16, 32], [16, 32, 64]]
    in_channels = 3 + Cp  # use_xyz=True

    key = jax.random.PRNGKey(0)
    k1, k2, kparams = jax.random.split(key, 3)
    xyz = jax.random.uniform(k1, (B, N, 3), dtype=jnp.float32)
    points = jax.random.normal(k2, (B, N, Cp), dtype=jnp.float32)

    module = PointNetSAModuleMSG(M, radiuses, Ks, in_channels, mlps, kparams,
                                 use_xyz=True)
    forward = jax.jit(lambda a, b: module(a, b))
    new_xyz, new_points = forward(xyz, points)
    jax.block_until_ready((new_xyz, new_points))

    assert new_xyz.shape == (B, M, 3)
    assert new_points.shape == (B, M, sum(m[-1] for m in mlps))
    assert bool(jnp.all(jnp.isfinite(new_xyz)))
    assert bool(jnp.all(jnp.isfinite(new_points)))

    # Spot-check the Pallas FPS kernel against a pure-JAX reference.
    centroids = fps(xyz, M)
    centroids_ref = _fps_ref(xyz, M)
    assert centroids.shape == (B, M)
    assert bool(jnp.all((centroids >= 0) & (centroids < N)))
    assert bool(jnp.all(centroids == centroids_ref)), "FPS mismatch"

    # Spot-check the Pallas branch kernel against the matching pure-JAX reference.
    new_xyz_chk = gather_points(xyz, centroids)
    inds = ball_query(xyz, new_xyz_chk, radiuses[0], Ks[0])
    x_t = _group_features(jnp.swapaxes(xyz, 1, 2),
                          jnp.swapaxes(points, 1, 2).astype(jnp.bfloat16),
                          jnp.swapaxes(new_xyz_chk, 1, 2),
                          jnp.swapaxes(inds, 1, 2),
                          use_xyz=True, cin_pad=module.cin_pad)
    y_kernel = run_branch(x_t, module.params[0], "max", module.bf16_epilogue)
    y_ref = _branch_ref(x_t, module.params[0], "max", module.bf16_epilogue)
    err = float(jnp.max(jnp.abs(y_kernel - y_ref)))
    assert jnp.allclose(y_kernel, y_ref, atol=1e-2, rtol=1e-2), err

    print("KERNEL_OK")
</pallas_src>

<mosaic_0001>
module attributes {stable_mosaic.version = 11 : i64} {
  func.func @kernel(%arg0: i32, %arg1: memref<1x3x64xf32, #tpu.memory_space<vmem>>, %arg2: memref<1x1x16xi32, #tpu.memory_space<vmem>>, %arg3: memref<1x64xf32, #tpu.memory_space<vmem>>) attributes {dimension_semantics = [#tpu.dimension_semantics<parallel>], iteration_bounds = array<i64: 2>, scalar_prefetch = 0 : i64, scratch_operands = 1 : i64, tpu.core_type = #tpu.core_type<tc>, window_params = [{transform_indices = @transform_0, window_bounds = array<i64: 1, 3, 64>}, {transform_indices = @transform_1, window_bounds = array<i64: 1, 1, 16>}]} {
    %0 = tpu.iota {dimensions = array<i32: 1>} : vector<1x64xi32>
    %1 = tpu.iota {dimensions = array<i32: 1>} : vector<1x16xi32>
    %cst = arith.constant 1.000000e+10 : f32
    %2 = vector.broadcast %cst : f32 to vector<1x64xf32>
    %c0 = arith.constant 0 : index
    %c0_0 = arith.constant 0 : index
    %3 = vector.load %arg3[%c0, %c0_0] : memref<1x64xf32, #tpu.memory_space<vmem>>, vector<1x64xf32>
    tpu.vector_store %arg3[%c0, %c0_0], %2 {strides = array<i32>} : memref<1x64xf32, #tpu.memory_space<vmem>>, vector<1x64xf32>,
    %c0_i32 = arith.constant 0 : i32
    %4 = vector.broadcast %c0_i32 : i32 to vector<1x16xi32>
    %c0_i32_1 = arith.constant 0 : i32
    %c0_i32_2 = arith.constant 0 : i32
    %c16_i32 = arith.constant 16 : i32
    %5 = arith.addi %c0_i32_2, %c16_i32 : i32
    %c1_i32 = arith.constant 1 : i32
    %6:2 = scf.for %arg4 = %c0_i32_2 to %5 step %c1_i32 iter_args(%arg5 = %c0_i32_1, %arg6 = %4) -> (i32, vector<1x16xi32>)  : i32 {
      %10 = vector.broadcast %arg4 : i32 to vector<1x16xi32>
      %11 = arith.cmpi eq, %1, %10 : vector<1x16xi32>
      %12 = vector.broadcast %arg5 : i32 to vector<1x16xi32>
      %13 = arith.select %11, %12, %arg6 : vector<1x16xi1>, vector<1x16xi32>
      %c0_7 = arith.constant 0 : index
      %c0_8 = arith.constant 0 : index
      %c0_9 = arith.constant 0 : index
      %14 = vector.load %arg1[%c0_7, %c0_8, %c0_9] : memref<1x3x64xf32, #tpu.memory_space<vmem>>, vector<1x3x64xf32>
      %15 = vector.shape_cast %14 : vector<1x3x64xf32> to vector<3x64xf32>
      %16 = vector.broadcast %arg5 : i32 to vector<1x64xi32>
      %17 = arith.cmpi eq, %0, %16 : vector<1x64xi32>
      %cst_10 = arith.constant 0.000000e+00 : f32
      %18 = vector.shape_cast %17 : vector<1x64xi1> to vector<1x64xi1>
      %19 = vector.broadcast %18 : vector<1x64xi1> to vector<3x64xi1>
      %20 = vector.broadcast %cst_10 : f32 to vector<3x64xf32>
      %21 = arith.select %19, %15, %20 : vector<3x64xi1>, vector<3x64xf32>
      %cst_11 = arith.constant dense<0.000000e+00> : vector<3xf32>
      %22 = vector.multi_reduction <add>, %21, %cst_11 [1] : vector<3x64xf32> to vector<3xf32>
      %23 = vector.shape_cast %22 : vector<3xf32> to vector<3x1xf32>
      %24 = vector.broadcast %23 : vector<3x1xf32> to vector<3x64xf32>
      %25 = arith.subf %15, %24 : vector<3x64xf32>
      %26 = arith.mulf %25, %25 : vector<3x64xf32>
      %cst_12 = arith.constant dense<0.000000e+00> : vector<64xf32>
      %27 = vector.multi_reduction <add>, %26, %cst_12 [0] : vector<3x64xf32> to vector<64xf32>
      %28 = vector.shape_cast %27 : vector<64xf32> to vector<1x64xf32>
      %c0_13 = arith.constant 0 : index
      %c0_14 = arith.constant 0 : index
      %29 = vector.load %arg3[%c0_13, %c0_14] : memref<1x64xf32, #tpu.memory_space<vmem>>, vector<1x64xf32>
      %30 = arith.minimumf %29, %28 : vector<1x64xf32>
      %c0_15 = arith.constant 0 : index
      %c0_16 = arith.constant 0 : index
      %31 = vector.load %arg3[%c0_15, %c0_16] : memref<1x64xf32, #tpu.memory_space<vmem>>, vector<1x64xf32>
      tpu.vector_store %arg3[%c0_15, %c0_16], %30 {strides = array<i32>} : memref<1x64xf32, #tpu.memory_space<vmem>>, vector<1x64xf32>,
      %32 = vector.shape_cast %30 : vector<1x64xf32> to vector<1x1x64xf32>
      %cst_17 = arith.constant dense<0xFF800000> : vector<1xf32>
      %33 = vector.multi_reduction <maximumf>, %32, %cst_17 [1, 2] : vector<1x1x64xf32> to vector<1xf32>
      %34 = vector.shape_cast %33 : vector<1xf32> to vector<1x1x1xf32>
      %35 = vector.extract %34[0, 0, 0] : f32 from vector<1x1x1xf32>
      %36 = vector.broadcast %35 : f32 to vector<1x64xf32>
      %37 = arith.cmpf oeq, %30, %36 : vector<1x64xf32>
      %c64_i32 = arith.constant 64 : i32
      %38 = vector.broadcast %c64_i32 : i32 to vector<1x64xi32>
      %39 = arith.select %37, %0, %38 : vector<1x64xi1>, vector<1x64xi32>
      %40 = vector.shape_cast %39 : vector<1x64xi32> to vector<1x1x64xi32>
      %cst_18 = arith.constant dense<2147483647> : vector<1xi32>
      %41 = vector.multi_reduction <minsi>, %40, %cst_18 [1, 2] : vector<1x1x64xi32> to vector<1xi32>
      %42 = vector.shape_cast %41 : vector<1xi32> to vector<1x1x1xi32>
      %43 = vector.extract %42[0, 0, 0] : i32 from vector<1x1x1xi32>
      scf.yield %43, %13 : i32, vector<1x16xi32>
    }
    %c16_i32_3 = arith.constant 16 : i32
    %c0_4 = arith.constant 0 : index
    %c0_5 = arith.constant 0 : index
    %c0_6 = arith.constant 0 : index
    %7 = vector.load %arg2[%c0_4, %c0_5, %c0_6] : memref<1x1x16xi32, #tpu.memory_space<vmem>>, vector<1x1x16xi32>
    %8 = vector.shape_cast %7 : vector<1x1x16xi32> to vector<1x16xi32>
    %9 = vector.shape_cast %6#1 : vector<1x16xi32> to vector<1x1x16xi32>
    tpu.vector_store %arg2[%c0_4, %c0_5, %c0_6], %9 {strides = array<i32>} : memref<1x1x16xi32, #tpu.memory_space<vmem>>, vector<1x1x16xi32>,
    return
  }
  func.func @transform_0(%arg0: i32) -> (i32, i32, i32) {
    %c0_i32 = arith.constant 0 : i32
    %c0_i32_0 = arith.constant 0 : i32
    %c0_i32_1 = arith.constant 0 : i32
    return %arg0, %c0_i32, %c0_i32_0 : i32, i32, i32
  }
  func.func @transform_1(%arg0: i32) -> (i32, i32, i32) {
    %c0_i32 = arith.constant 0 : i32
    %c0_i32_0 = arith.constant 0 : i32
    %c0_i32_1 = arith.constant 0 : i32
    return %arg0, %c0_i32, %c0_i32_0 : i32, i32, i32
  }
}

module attributes {stable_mosaic.version = 11 : i64} {
  func.func @kernel(%arg0: i32, %arg1: i32, %arg2: memref<1x16x8x128xbf16, #tpu.memory_space<vmem>>, %arg3: memref<16x8xbf16, #tpu.memory_space<vmem>>, %arg4: memref<16x1xf32, #tpu.memory_space<vmem>>, %arg5: memref<32x16xbf16, #tpu.memory_space<vmem>>, %arg6: memref<32x1xf32, #tpu.memory_space<vmem>>, %arg7: memref<64x32xbf16, #tpu.memory_space<vmem>>, %arg8: memref<64x1xf32, #tpu.memory_space<vmem>>, %arg9: memref<1x64x128xf32, #tpu.memory_space<vmem>>) attributes {dimension_semantics = [#tpu.dimension_semantics<parallel>, #tpu.dimension_semantics<parallel>], iteration_bounds = array<i64: 2, 1>, scalar_prefetch = 0 : i64, scratch_operands = 0 : i64, tpu.core_type = #tpu.core_type<tc>, window_params = [{transform_indices = @transform_0, window_bounds = array<i64: 1, 16, 8, 128>}, {pipeline_mode = #tpu.pipeline_mode<synchronous>, transform_indices = @transform_1, window_bounds = array<i64: 16, 8>}, {pipeline_mode = #tpu.pipeline_mode<synchronous>, transform_indices = @transform_2, window_bounds = array<i64: 16, 1>}, {pipeline_mode = #tpu.pipeline_mode<synchronous>, transform_indices = @transform_3, window_bounds = array<i64: 32, 16>}, {pipeline_mode = #tpu.pipeline_mode<synchronous>, transform_indices = @transform_4, window_bounds = array<i64: 32, 1>}, {pipeline_mode = #tpu.pipeline_mode<synchronous>, transform_indices = @transform_5, window_bounds = array<i64: 64, 32>}, {pipeline_mode = #tpu.pipeline_mode<synchronous>, transform_indices = @transform_6, window_bounds = array<i64: 64, 1>}, {transform_indices = @transform_7, window_bounds = array<i64: 1, 64, 128>}]} {
    %c0 = arith.constant 0 : index
    %c0_0 = arith.constant 0 : index
    %c0_1 = arith.constant 0 : index
    %c0_2 = arith.constant 0 : index
    %0 = vector.load %arg2[%c0, %c0_0, %c0_1, %c0_2] : memref<1x16x8x128xbf16, #tpu.memory_space<vmem>>, vector<1x1x8x128xbf16>
    %1 = vector.shape_cast %0 : vector<1x1x8x128xbf16> to vector<8x128xbf16>
    %c0_3 = arith.constant 0 : index
    %c0_4 = arith.constant 0 : index
    %2 = vector.load %arg3[%c0_3, %c0_4] : memref<16x8xbf16, #tpu.memory_space<vmem>>, vector<16x8xbf16>
    %c0_5 = arith.constant 0 : index
    %c0_6 = arith.constant 0 : index
    %3 = vector.load %arg4[%c0_5, %c0_6] : memref<16x1xf32, #tpu.memory_space<vmem>>, vector<16x1xf32>
    %cst = arith.constant dense<0.000000e+00> : vector<16x128xf32>
    %4 = tpu.matmul %2, %1, %cst {dimension_numbers = #tpu.dot_dimension_numbers<[1], [0], [0], [1], [0, 0, 1, 1], [], []>} : vector<16x8xbf16>, vector<8x128xbf16>, vector<16x128xf32> -> vector<16x128xf32>
    %5 = vector.broadcast %3 : vector<16x1xf32> to vector<16x128xf32>
    %6 = arith.addf %4, %5 : vector<16x128xf32>
    %cst_7 = arith.constant 0.000000e+00 : f32
    %7 = vector.broadcast %cst_7 : f32 to vector<16x128xf32>
    %8 = arith.maximumf %6, %7 : vector<16x128xf32>
    %9 = arith.truncf %8 : vector<16x128xf32> to vector<16x128xbf16>
    %c0_8 = arith.constant 0 : index
    %c0_9 = arith.constant 0 : index
    %10 = vector.load %arg5[%c0_8, %c0_9] : memref<32x16xbf16, #tpu.memory_space<vmem>>, vector<32x16xbf16>
    %c0_10 = arith.constant 0 : index
    %c0_11 = arith.constant 0 : index
    %11 = vector.load %arg6[%c0_10, %c0_11] : memref<32x1xf32, #tpu.memory_space<vmem>>, vector<32x1xf32>
    %cst_12 = arith.constant dense<0.000000e+00> : vector<32x128xf32>
    %12 = tpu.matmul %10, %9, %cst_12 {dimension_numbers = #tpu.dot_dimension_numbers<[1], [0], [0], [1], [0, 0, 1, 1], [], []>} : vector<32x16xbf16>, vector<16x128xbf16>, vector<32x128xf32> -> vector<32x128xf32>
    %13 = vector.broadcast %11 : vector<32x1xf32> to vector<32x128xf32>
    %14 = arith.addf %12, %13 : vector<32x128xf32>
    %cst_13 = arith.constant 0.000000e+00 : f32
    %15 = vector.broadcast %cst_13 : f32 to vector<32x128xf32>
    %16 = arith.maximumf %14, %15 : vector<32x128xf32>
    %17 = arith.truncf %16 : vector<32x128xf32> to vector<32x128xbf16>
    %c0_14 = arith.constant 0 : index
    %c0_15 = arith.constant 0 : index
    %18 = vector.load %arg7[%c0_14, %c0_15] : memref<64x32xbf16, #tpu.memory_space<vmem>>, vector<64x32xbf16>
    %c0_16 = arith.constant 0 : index
    %c0_17 = arith.constant 0 : index
    %19 = vector.load %arg8[%c0_16, %c0_17] : memref<64x1xf32, #tpu.memory_space<vmem>>, vector<64x1xf32>
    %cst_18 = arith.constant dense<0.000000e+00> : vector<64x128xf32>
    %20 = tpu.matmul %18, %17, %cst_18 {dimension_numbers = #tpu.dot_dimension_numbers<[1], [0], [0], [1], [0, 0, 1, 1], [], []>} : vector<64x32xbf16>, vector<32x128xbf16>, vector<64x128xf32> -> vector<64x128xf32>
    %21 = vector.broadcast %19 : vector<64x1xf32> to vector<64x128xf32>
    %22 = arith.addf %20, %21 : vector<64x128xf32>
    %cst_19 = arith.constant 0.000000e+00 : f32
    %23 = vector.broadcast %cst_19 : f32 to vector<64x128xf32>
    %24 = arith.maximumf %22, %23 : vector<64x128xf32>
    %c0_20 = arith.constant 0 : index
    %c1 = arith.constant 1 : index
    %c0_21 = arith.constant 0 : index
    %c0_22 = arith.constant 0 : index
    %25 = vector.load %arg2[%c0_20, %c1, %c0_21, %c0_22] : memref<1x16x8x128xbf16, #tpu.memory_space<vmem>>, vector<1x1x8x128xbf16>
    %26 = vector.shape_cast %25 : vector<1x1x8x128xbf16> to vector<8x128xbf16>
    %c0_23 = arith.constant 0 : index
    %c0_24 = arith.constant 0 : index
    %27 = vector.load %arg3[%c0_23, %c0_24] : memref<16x8xbf16, #tpu.memory_space<vmem>>, vector<16x8xbf16>
    %c0_25 = arith.constant 0 : index
    %c0_26 = arith.constant 0 : index
    %28 = vector.load %arg4[%c0_25, %c0_26] : memref<16x1xf32, #tpu.memory_space<vmem>>, vector<16x1xf32>
    %cst_27 = arith.constant dense<0.000000e+00> : vector<16x128xf32>
    %29 = tpu.matmul %27, %26, %cst_27 {dimension_numbers = #tpu.dot_dimension_numbers<[1], [0], [0], [1], [0, 0, 1, 1], [], []>} : vector<16x8xbf16>, vector<8x128xbf16>, vector<16x128xf32> -> vector<16x128xf32>
    %30 = vector.broadcast %28 : vector<16x1xf32> to vector<16x128xf32>
    %31 = arith.addf %29, %30 : vector<16x128xf32>
    %cst_28 = arith.constant 0.000000e+00 : f32
    %32 = vector.broadcast %cst_28 : f32 to vector<16x128xf32>
    %33 = arith.maximumf %31, %32 : vector<16x128xf32>
    %34 = arith.truncf %33 : vector<16x128xf32> to vector<16x128xbf16>
    %c0_29 = arith.constant 0 : index
    %c0_30 = arith.constant 0 : index
    %35 = vector.load %arg5[%c0_29, %c0_30] : memref<32x16xbf16, #tpu.memory_space<vmem>>, vector<32x16xbf16>
    %c0_31 = arith.constant 0 : index
    %c0_32 = arith.constant 0 : index
    %36 = vector.load %arg6[%c0_31, %c0_32] : memref<32x1xf32, #tpu.memory_space<vmem>>, vector<32x1xf32>
    %cst_33 = arith.constant dense<0.000000e+00> : vector<32x128xf32>
    %37 = tpu.matmul %35, %34, %cst_33 {dimension_numbers = #tpu.dot_dimension_numbers<[1], [0], [0], [1], [0, 0, 1, 1], [], []>} : vector<32x16xbf16>, vector<16x128xbf16>, vector<32x128xf32> -> vector<32x128xf32>
    %38 = vector.broadcast %36 : vector<32x1xf32> to vector<32x128xf32>
    %39 = arith.addf %37, %38 : vector<32x128xf32>
    %cst_34 = arith.constant 0.000000e+00 : f32
    %40 = vector.broadcast %cst_34 : f32 to vector<32x128xf32>
    %41 = arith.maximumf %39, %40 : vector<32x128xf32>
    %42 = arith.truncf %41 : vector<32x128xf32> to vector<32x128xbf16>
    %c0_35 = arith.constant 0 : index
    %c0_36 = arith.constant 0 : index
    %43 = vector.load %arg7[%c0_35, %c0_36] : memref<64x32xbf16, #tpu.memory_space<vmem>>, vector<64x32xbf16>
    %c0_37 = arith.constant 0 : index
    %c0_38 = arith.constant 0 : index
    %44 = vector.load %arg8[%c0_37, %c0_38] : memref<64x1xf32, #tpu.memory_space<vmem>>, vector<64x1xf32>
    %cst_39 = arith.constant dense<0.000000e+00> : vector<64x128xf32>
    %45 = tpu.matmul %43, %42, %cst_39 {dimension_numbers = #tpu.dot_dimension_numbers<[1], [0], [0], [1], [0, 0, 1, 1], [], []>} : vector<64x32xbf16>, vector<32x128xbf16>, vector<64x128xf32> -> vector<64x128xf32>
    %46 = vector.broadcast %44 : vector<64x1xf32> to vector<64x128xf32>
    %47 = arith.addf %45, %46 : vector<64x128xf32>
    %cst_40 = arith.constant 0.000000e+00 : f32
    %48 = vector.broadcast %cst_40 : f32 to vector<64x128xf32>
    %49 = arith.maximumf %47, %48 : vector<64x128xf32>
    %50 = arith.maximumf %24, %49 : vector<64x128xf32>
    %c0_41 = arith.constant 0 : index
    %c2 = arith.constant 2 : index
    %c0_42 = arith.constant 0 : index
    %c0_43 = arith.constant 0 : index
    %51 = vector.load %arg2[%c0_41, %c2, %c0_42, %c0_43] : memref<1x16x8x128xbf16, #tpu.memory_space<vmem>>, vector<1x1x8x128xbf16>
    %52 = vector.shape_cast %51 : vector<1x1x8x128xbf16> to vector<8x128xbf16>
    %c0_44 = arith.constant 0 : index
    %c0_45 = arith.constant 0 : index
    %53 = vector.load %arg3[%c0_44, %c0_45] : memref<16x8xbf16, #tpu.memory_space<vmem>>, vector<16x8xbf16>
    %c0_46 = arith.constant 0 : index
    %c0_47 = arith.constant 0 : index
    %54 = vector.load %arg4[%c0_46, %c0_47] : memref<16x1xf32, #tpu.memory_space<vmem>>, vector<16x1xf32>
    %cst_48 = arith.constant dense<0.000000e+00> : vector<16x128xf32>
    %55 = tpu.matmul %53, %52, %cst_48 {dimension_numbers = #tpu.dot_dimension_numbers<[1], [0], [0], [1], [0, 0, 1, 1], [], []>} : vector<16x8xbf16>, vector<8x128xbf16>, vector<16x128xf32> -> vector<16x128xf32>
    %56 = vector.broadcast %54 : vector<16x1xf32> to vector<16x128xf32>
    %57 = arith.addf %55, %56 : vector<16x128xf32>
    %cst_49 = arith.constant 0.000000e+00 : f32
    %58 = vector.broadcast %cst_49 : f32 to vector<16x128xf32>
    %59 = arith.maximumf %57, %58 : vector<16x128xf32>
    %60 = arith.truncf %59 : vector<16x128xf32> to vector<16x128xbf16>
    %c0_50 = arith.constant 0 : index
    %c0_51 = arith.constant 0 : index
    %61 = vector.load %arg5[%c0_50, %c0_51] : memref<32x16xbf16, #tpu.memory_space<vmem>>, vector<32x16xbf16>
    %c0_52 = arith.constant 0 : index
    %c0_53 = arith.constant 0 : index
    %62 = vector.load %arg6[%c0_52, %c0_53] : memref<32x1xf32, #tpu.memory_space<vmem>>, vector<32x1xf32>
    %cst_54 = arith.constant dense<0.000000e+00> : vector<32x128xf32>
    %63 = tpu.matmul %61, %60, %cst_54 {dimension_numbers = #tpu.dot_dimension_numbers<[1], [0], [0], [1], [0, 0, 1, 1], [], []>} : vector<32x16xbf16>, vector<16x128xbf16>, vector<32x128xf32> -> vector<32x128xf32>
    %64 = vector.broadcast %62 : vector<32x1xf32> to vector<32x128xf32>
    %65 = arith.addf %63, %64 : vector<32x128xf32>
    %cst_55 = arith.constant 0.000000e+00 : f32
    %66 = vector.broadcast %cst_55 : f32 to vector<32x128xf32>
    %67 = arith.maximumf %65, %66 : vector<32x128xf32>
    %68 = arith.truncf %67 : vector<32x128xf32> to vector<32x128xbf16>
    %c0_56 = arith.constant 0 : index
    %c0_57 = arith.constant 0 : index
    %69 = vector.load %arg7[%c0_56, %c0_57] : memref<64x32xbf16, #tpu.memory_space<vmem>>, vector<64x32xbf16>
    %c0_58 = arith.constant 0 : index
    %c0_59 = arith.constant 0 : index
    %70 = vector.load %arg8[%c0_58, %c0_59] : memref<64x1xf32, #tpu.memory_space<vmem>>, vector<64x1xf32>
    %cst_60 = arith.constant dense<0.000000e+00> : vector<64x128xf32>
    %71 = tpu.matmul %69, %68, %cst_60 {dimension_numbers = #tpu.dot_dimension_numbers<[1], [0], [0], [1], [0, 0, 1, 1], [], []>} : vector<64x32xbf16>, vector<32x128xbf16>, vector<64x128xf32> -> vector<64x128xf32>
    %72 = vector.broadcast %70 : vector<64x1xf32> to vector<64x128xf32>
    %73 = arith.addf %71, %72 : vector<64x128xf32>
    %cst_61 = arith.constant 0.000000e+00 : f32
    %74 = vector.broadcast %cst_61 : f32 to vector<64x128xf32>
    %75 = arith.maximumf %73, %74 : vector<64x128xf32>
    %76 = arith.maximumf %50, %75 : vector<64x128xf32>
    %c0_62 = arith.constant 0 : index
    %c3 = arith.constant 3 : index
    %c0_63 = arith.constant 0 : index
    %c0_64 = arith.constant 0 : index
    %77 = vector.load %arg2[%c0_62, %c3, %c0_63, %c0_64] : memref<1x16x8x128xbf16, #tpu.memory_space<vmem>>, vector<1x1x8x128xbf16>
    %78 = vector.shape_cast %77 : vector<1x1x8x128xbf16> to vector<8x128xbf16>
    %c0_65 = arith.constant 0 : index
    %c0_66 = arith.constant 0 : index
    %79 = vector.load %arg3[%c0_65, %c0_66] : memref<16x8xbf16, #tpu.memory_space<vmem>>, vector<16x8xbf16>
    %c0_67 = arith.constant 0 : index
    %c0_68 = arith.constant 0 : index
    %80 = vector.load %arg4[%c0_67, %c0_68] : memref<16x1xf32, #tpu.memory_space<vmem>>, vector<16x1xf32>
    %cst_69 = arith.constant dense<0.000000e+00> : vector<16x128xf32>
    %81 = tpu.matmul %79, %78, %cst_69 {dimension_numbers = #tpu.dot_dimension_numbers<[1], [0], [0], [1], [0, 0, 1, 1], [], []>} : vector<16x8xbf16>, vector<8x128xbf16>, vector<16x128xf32> -> vector<16x128xf32>
    %82 = vector.broadcast %80 : vector<16x1xf32> to vector<16x128xf32>
    %83 = arith.addf %81, %82 : vector<16x128xf32>
    %cst_70 = arith.constant 0.000000e+00 : f32
    %84 = vector.broadcast %cst_70 : f32 to vector<16x128xf32>
    %85 = arith.maximumf %83, %84 : vector<16x128xf32>
    %86 = arith.truncf %85 : vector<16x128xf32> to vector<16x128xbf16>
    %c0_71 = arith.constant 0 : index
    %c0_72 = arith.constant 0 : index
    %87 = vector.load %arg5[%c0_71, %c0_72] : memref<32x16xbf16, #tpu.memory_space<vmem>>, vector<32x16xbf16>
    %c0_73 = arith.constant 0 : index
    %c0_74 = arith.constant 0 : index
    %88 = vector.load %arg6[%c0_73, %c0_74] : memref<32x1xf32, #tpu.memory_space<vmem>>, vector<32x1xf32>
    %cst_75 = arith.constant dense<0.000000e+00> : vector<32x128xf32>
    %89 = tpu.matmul %87, %86, %cst_75 {dimension_numbers = #tpu.dot_dimension_numbers<[1], [0], [0], [1], [0, 0, 1, 1], [], []>} : vector<32x16xbf16>, vector<16x128xbf16>, vector<32x128xf32> -> vector<32x128xf32>
    %90 = vector.broadcast %88 : vector<32x1xf32> to vector<32x128xf32>
    %91 = arith.addf %89, %90 : vector<32x128xf32>
    %cst_76 = arith.constant 0.000000e+00 : f32
    %92 = vector.broadcast %cst_76 : f32 to vector<32x128xf32>
    %93 = arith.maximumf %91, %92 : vector<32x128xf32>
    %94 = arith.truncf %93 : vector<32x128xf32> to vector<32x128xbf16>
    %c0_77 = arith.constant 0 : index
    %c0_78 = arith.constant 0 : index
    %95 = vector.load %arg7[%c0_77, %c0_78] : memref<64x32xbf16, #tpu.memory_space<vmem>>, vector<64x32xbf16>
    %c0_79 = arith.constant 0 : index
    %c0_80 = arith.constant 0 : index
    %96 = vector.load %arg8[%c0_79, %c0_80] : memref<64x1xf32, #tpu.memory_space<vmem>>, vector<64x1xf32>
    %cst_81 = arith.constant dense<0.000000e+00> : vector<64x128xf32>
    %97 = tpu.matmul %95, %94, %cst_81 {dimension_numbers = #tpu.dot_dimension_numbers<[1], [0], [0], [1], [0, 0, 1, 1], [], []>} : vector<64x32xbf16>, vector<32x128xbf16>, vector<64x128xf32> -> vector<64x128xf32>
    %98 = vector.broadcast %96 : vector<64x1xf32> to vector<64x128xf32>
    %99 = arith.addf %97, %98 : vector<64x128xf32>
    %cst_82 = arith.constant 0.000000e+00 : f32
    %100 = vector.broadcast %cst_82 : f32 to vector<64x128xf32>
    %101 = arith.maximumf %99, %100 : vector<64x128xf32>
    %102 = arith.maximumf %76, %101 : vector<64x128xf32>
    %c0_83 = arith.constant 0 : index
    %c4 = arith.constant 4 : index
    %c0_84 = arith.constant 0 : index
    %c0_85 = arith.constant 0 : index
    %103 = vector.load %arg2[%c0_83, %c4, %c0_84, %c0_85] : memref<1x16x8x128xbf16, #tpu.memory_space<vmem>>, vector<1x1x8x128xbf16>
    %104 = vector.shape_cast %103 : vector<1x1x8x128xbf16> to vector<8x128xbf16>
    %c0_86 = arith.constant 0 : index
    %c0_87 = arith.constant 0 : index
    %105 = vector.load %arg3[%c0_86, %c0_87] : memref<16x8xbf16, #tpu.memory_space<vmem>>, vector<16x8xbf16>
    %c0_88 = arith.constant 0 : index
    %c0_89 = arith.constant 0 : index
    %106 = vector.load %arg4[%c0_88, %c0_89] : memref<16x1xf32, #tpu.memory_space<vmem>>, vector<16x1xf32>
    %cst_90 = arith.constant dense<0.000000e+00> : vector<16x128xf32>
    %107 = tpu.matmul %105, %104, %cst_90 {dimension_numbers = #tpu.dot_dimension_numbers<[1], [0], [0], [1], [0, 0, 1, 1], [], []>} : vector<16x8xbf16>, vector<8x128xbf16>, vector<16x128xf32> -> vector<16x128xf32>
    %108 = vector.broadcast %106 : vector<16x1xf32> to vector<16x128xf32>
    %109 = arith.addf %107, %108 : vector<16x128xf32>
    %cst_91 = arith.constant 0.000000e+00 : f32
    %110 = vector.broadcast %cst_91 : f32 to vector<16x128xf32>
    %111 = arith.maximumf %109, %110 : vector<16x128xf32>
    %112 = arith.truncf %111 : vector<16x128xf32> to vector<16x128xbf16>
    %c0_92 = arith.constant 0 : index
    %c0_93 = arith.constant 0 : index
    %113 = vector.load %arg5[%c0_92, %c0_93] : memref<32x16xbf16, #tpu.memory_space<vmem>>, vector<32x16xbf16>
    %c0_94 = arith.constant 0 : index
    %c0_95 = arith.constant 0 : index
    %114 = vector.load %arg6[%c0_94, %c0_95] : memref<32x1xf32, #tpu.memory_space<vmem>>, vector<32x1xf32>
    %cst_96 = arith.constant dense<0.000000e+00> : vector<32x128xf32>
    %115 = tpu.matmul %113, %112, %cst_96 {dimension_numbers = #tpu.dot_dimension_numbers<[1], [0], [0], [1], [0, 0, 1, 1], [], []>} : vector<32x16xbf16>, vector<16x128xbf16>, vector<32x128xf32> -> vector<32x128xf32>
    %116 = vector.broadcast %114 : vector<32x1xf32> to vector<32x128xf32>
    %117 = arith.addf %115, %116 : vector<32x128xf32>
    %cst_97 = arith.constant 0.000000e+00 : f32
    %118 = vector.broadcast %cst_97 : f32 to vector<32x128xf32>
    %119 = arith.maximumf %117, %118 : vector<32x128xf32>
    %120 = arith.truncf %119 : vector<32x128xf32> to vector<32x128xbf16>
    %c0_98 = arith.constant 0 : index
    %c0_99 = arith.constant 0 : index
    %121 = vector.load %arg7[%c0_98, %c0_99] : memref<64x32xbf16, #tpu.memory_space<vmem>>, vector<64x32xbf16>
    %c0_100 = arith.constant 0 : index
    %c0_101 = arith.constant 0 : index
    %122 = vector.load %arg8[%c0_100, %c0_101] : memref<64x1xf32, #tpu.memory_space<vmem>>, vector<64x1xf32>
    %cst_102 = arith.constant dense<0.000000e+00> : vector<64x128xf32>
    %123 = tpu.matmul %121, %120, %cst_102 {dimension_numbers = #tpu.dot_dimension_numbers<[1], [0], [0], [1], [0, 0, 1, 1], [], []>} : vector<64x32xbf16>, vector<32x128xbf16>, vector<64x128xf32> -> vector<64x128xf32>
    %124 = vector.broadcast %122 : vector<64x1xf32> to vector<64x128xf32>
    %125 = arith.addf %123, %124 : vector<64x128xf32>
    %cst_103 = arith.constant 0.000000e+00 : f32
    %126 = vector.broadcast %cst_103 : f32 to vector<64x128xf32>
    %127 = arith.maximumf %125, %126 : vector<64x128xf32>
    %128 = arith.maximumf %102, %127 : vector<64x128xf32>
    %c0_104 = arith.constant 0 : index
    %c5 = arith.constant 5 : index
    %c0_105 = arith.constant 0 : index
    %c0_106 = arith.constant 0 : index
    %129 = vector.load %arg2[%c0_104, %c5, %c0_105, %c0_106] : memref<1x16x8x128xbf16, #tpu.memory_space<vmem>>, vector<1x1x8x128xbf16>
    %130 = vector.shape_cast %129 : vector<1x1x8x128xbf16> to vector<8x128xbf16>
    %c0_107 = arith.constant 0 : index
    %c0_108 = arith.constant 0 : index
    %131 = vector.load %arg3[%c0_107, %c0_108] : memref<16x8xbf16, #tpu.memory_space<vmem>>, vector<16x8xbf16>
    %c0_109 = arith.constant 0 : index
    %c0_110 = arith.constant 0 : index
    %132 = vector.load %arg4[%c0_109, %c0_110] : memref<16x1xf32, #tpu.memory_space<vmem>>, vector<16x1xf32>
    %cst_111 = arith.constant dense<0.000000e+00> : vector<16x128xf32>
    %133 = tpu.matmul %131, %130, %cst_111 {dimension_numbers = #tpu.dot_dimension_numbers<[1], [0], [0], [1], [0, 0, 1, 1], [], []>} : vector<16x8xbf16>, vector<8x128xbf16>, vector<16x128xf32> -> vector<16x128xf32>
    %134 = vector.broadcast %132 : vector<16x1xf32> to vector<16x128xf32>
    %135 = arith.addf %133, %134 : vector<16x128xf32>
    %cst_112 = arith.constant 0.000000e+00 : f32
    %136 = vector.broadcast %cst_112 : f32 to vector<16x128xf32>
    %137 = arith.maximumf %135, %136 : vector<16x128xf32>
    %138 = arith.truncf %137 : vector<16x128xf32> to vector<16x128xbf16>
    %c0_113 = arith.constant 0 : index
    %c0_114 = arith.constant 0 : index
    %139 = vector.load %arg5[%c0_113, %c0_114] : memref<32x16xbf16, #tpu.memory_space<vmem>>, vector<32x16xbf16>
    %c0_115 = arith.constant 0 : index
    %c0_116 = arith.constant 0 : index
    %140 = vector.load %arg6[%c0_115, %c0_116] : memref<32x1xf32, #tpu.memory_space<vmem>>, vector<32x1xf32>
    %cst_117 = arith.constant dense<0.000000e+00> : vector<32x128xf32>
    %141 = tpu.matmul %139, %138, %cst_117 {dimension_numbers = #tpu.dot_dimension_numbers<[1], [0], [0], [1], [0, 0, 1, 1], [], []>} : vector<32x16xbf16>, vector<16x128xbf16>, vector<32x128xf32> -> vector<32x128xf32>
    %142 = vector.broadcast %140 : vector<32x1xf32> to vector<32x128xf32>
    %143 = arith.addf %141, %142 : vector<32x128xf32>
    %cst_118 = arith.constant 0.000000e+00 : f32
    %144 = vector.broadcast %cst_118 : f32 to vector<32x128xf32>
    %145 = arith.maximumf %143, %144 : vector<32x128xf32>
    %146 = arith.truncf %145 : vector<32x128xf32> to vector<32x128xbf16>
    %c0_119 = arith.constant 0 : index
    %c0_120 = arith.constant 0 : index
    %147 = vector.load %arg7[%c0_119, %c0_120] : memref<64x32xbf16, #tpu.memory_space<vmem>>, vector<64x32xbf16>
    %c0_121 = arith.constant 0 : index
    %c0_122 = arith.constant 0 : index
    %148 = vector.load %arg8[%c0_121, %c0_122] : memref<64x1xf32, #tpu.memory_space<vmem>>, vector<64x1xf32>
    %cst_123 = arith.constant dense<0.000000e+00> : vector<64x128xf32>
    %149 = tpu.matmul %147, %146, %cst_123 {dimension_numbers = #tpu.dot_dimension_numbers<[1], [0], [0], [1], [0, 0, 1, 1], [], []>} : vector<64x32xbf16>, vector<32x128xbf16>, vector<64x128xf32> -> vector<64x128xf32>
    %150 = vector.broadcast %148 : vector<64x1xf32> to vector<64x128xf32>
    %151 = arith.addf %149, %150 : vector<64x128xf32>
    %cst_124 = arith.constant 0.000000e+00 : f32
    %152 = vector.broadcast %cst_124 : f32 to vector<64x128xf32>
    %153 = arith.maximumf %151, %152 : vector<64x128xf32>
    %154 = arith.maximumf %128, %153 : vector<64x128xf32>
    %c0_125 = arith.constant 0 : index
    %c6 = arith.constant 6 : index
    %c0_126 = arith.constant 0 : index
    %c0_127 = arith.constant 0 : index
    %155 = vector.load %arg2[%c0_125, %c6, %c0_126, %c0_127] : memref<1x16x8x128xbf16, #tpu.memory_space<vmem>>, vector<1x1x8x128xbf16>
    %156 = vector.shape_cast %155 : vector<1x1x8x128xbf16> to vector<8x128xbf16>
    %c0_128 = arith.constant 0 : index
    %c0_129 = arith.constant 0 : index
    %157 = vector.load %arg3[%c0_128, %c0_129] : memref<16x8xbf16, #tpu.memory_space<vmem>>, vector<16x8xbf16>
    %c0_130 = arith.constant 0 : index
    %c0_131 = arith.constant 0 : index
    %158 = vector.load %arg4[%c0_130, %c0_131] : memref<16x1xf32, #tpu.memory_space<vmem>>, vector<16x1xf32>
    %cst_132 = arith.constant dense<0.000000e+00> : vector<16x128xf32>
    %159 = tpu.matmul %157, %156, %cst_132 {dimension_numbers = #tpu.dot_dimension_numbers<[1], [0], [0], [1], [0, 0, 1, 1], [], []>} : vector<16x8xbf16>, vector<8x128xbf16>, vector<16x128xf32> -> vector<16x128xf32>
    %160 = vector.broadcast %158 : vector<16x1xf32> to vector<16x128xf32>
    %161 = arith.addf %159, %160 : vector<16x128xf32>
    %cst_133 = arith.constant 0.000000e+00 : f32
    %162 = vector.broadcast %cst_133 : f32 to vector<16x128xf32>
    %163 = arith.maximumf %161, %162 : vector<16x128xf32>
    %164 = arith.truncf %163 : vector<16x128xf32> to vector<16x128xbf16>
    %c0_134 = arith.constant 0 : index
    %c0_135 = arith.constant 0 : index
    %165 = vector.load %arg5[%c0_134, %c0_135] : memref<32x16xbf16, #tpu.memory_space<vmem>>, vector<32x16xbf16>
    %c0_136 = arith.constant 0 : index
    %c0_137 = arith.constant 0 : index
    %166 = vector.load %arg6[%c0_136, %c0_137] : memref<32x1xf32, #tpu.memory_space<vmem>>, vector<32x1xf32>
    %cst_138 = arith.constant dense<0.000000e+00> : vector<32x128xf32>
    %167 = tpu.matmul %165, %164, %cst_138 {dimension_numbers = #tpu.dot_dimension_numbers<[1], [0], [0], [1], [0, 0, 1, 1], [], []>} : vector<32x16xbf16>, vector<16x128xbf16>, vector<32x128xf32> -> vector<32x128xf32>
    %168 = vector.broadcast %166 : vector<32x1xf32> to vector<32x128xf32>
    %169 = arith.addf %167, %168 : vector<32x128xf32>
    %cst_139 = arith.constant 0.000000e+00 : f32
    %170 = vector.broadcast %cst_139 : f32 to vector<32x128xf32>
    %171 = arith.maximumf %169, %170 : vector<32x128xf32>
    %172 = arith.truncf %171 : vector<32x128xf32> to vector<32x128xbf16>
    %c0_140 = arith.constant 0 : index
    %c0_141 = arith.constant 0 : index
    %173 = vector.load %arg7[%c0_140, %c0_141] : memref<64x32xbf16, #tpu.memory_space<vmem>>, vector<64x32xbf16>
    %c0_142 = arith.constant 0 : index
    %c0_143 = arith.constant 0 : index
    %174 = vector.load %arg8[%c0_142, %c0_143] : memref<64x1xf32, #tpu.memory_space<vmem>>, vector<64x1xf32>
    %cst_144 = arith.constant dense<0.000000e+00> : vector<64x128xf32>
    %175 = tpu.matmul %173, %172, %cst_144 {dimension_numbers = #tpu.dot_dimension_numbers<[1], [0], [0], [1], [0, 0, 1, 1], [], []>} : vector<64x32xbf16>, vector<32x128xbf16>, vector<64x128xf32> -> vector<64x128xf32>
    %176 = vector.broadcast %174 : vector<64x1xf32> to vector<64x128xf32>
    %177 = arith.addf %175, %176 : vector<64x128xf32>
    %cst_145 = arith.constant 0.000000e+00 : f32
    %178 = vector.broadcast %cst_145 : f32 to vector<64x128xf32>
    %179 = arith.maximumf %177, %178 : vector<64x128xf32>
    %180 = arith.maximumf %154, %179 : vector<64x128xf32>
    %c0_146 = arith.constant 0 : index
    %c7 = arith.constant 7 : index
    %c0_147 = arith.constant 0 : index
    %c0_148 = arith.constant 0 : index
    %181 = vector.load %arg2[%c0_146, %c7, %c0_147, %c0_148] : memref<1x16x8x128xbf16, #tpu.memory_space<vmem>>, vector<1x1x8x128xbf16>
    %182 = vector.shape_cast %181 : vector<1x1x8x128xbf16> to vector<8x128xbf16>
    %c0_149 = arith.constant 0 : index
    %c0_150 = arith.constant 0 : index
    %183 = vector.load %arg3[%c0_149, %c0_150] : memref<16x8xbf16, #tpu.memory_space<vmem>>, vector<16x8xbf16>
    %c0_151 = arith.constant 0 : index
    %c0_152 = arith.constant 0 : index
    %184 = vector.load %arg4[%c0_151, %c0_152] : memref<16x1xf32, #tpu.memory_space<vmem>>, vector<16x1xf32>
    %cst_153 = arith.constant dense<0.000000e+00> : vector<16x128xf32>
    %185 = tpu.matmul %183, %182, %cst_153 {dimension_numbers = #tpu.dot_dimension_numbers<[1], [0], [0], [1], [0, 0, 1, 1], [], []>} : vector<16x8xbf16>, vector<8x128xbf16>, vector<16x128xf32> -> vector<16x128xf32>
    %186 = vector.broadcast %184 : vector<16x1xf32> to vector<16x128xf32>
    %187 = arith.addf %185, %186 : vector<16x128xf32>
    %cst_154 = arith.constant 0.000000e+00 : f32
    %188 = vector.broadcast %cst_154 : f32 to vector<16x128xf32>
    %189 = arith.maximumf %187, %188 : vector<16x128xf32>
    %190 = arith.truncf %189 : vector<16x128xf32> to vector<16x128xbf16>
    %c0_155 = arith.constant 0 : index
    %c0_156 = arith.constant 0 : index
    %191 = vector.load %arg5[%c0_155, %c0_156] : memref<32x16xbf16, #tpu.memory_space<vmem>>, vector<32x16xbf16>
    %c0_157 = arith.constant 0 : index
    %c0_158 = arith.constant 0 : index
    %192 = vector.load %arg6[%c0_157, %c0_158] : memref<32x1xf32, #tpu.memory_space<vmem>>, vector<32x1xf32>
    %cst_159 = arith.constant dense<0.000000e+00> : vector<32x128xf32>
    %193 = tpu.matmul %191, %190, %cst_159 {dimension_numbers = #tpu.dot_dimension_numbers<[1], [0], [0], [1], [0, 0, 1, 1], [], []>} : vector<32x16xbf16>, vector<16x128xbf16>, vector<32x128xf32> -> vector<32x128xf32>
    %194 = vector.broadcast %192 : vector<32x1xf32> to vector<32x128xf32>
    %195 = arith.addf %193, %194 : vector<32x128xf32>
    %cst_160 = arith.constant 0.000000e+00 : f32
    %196 = vector.broadcast %cst_160 : f32 to vector<32x128xf32>
    %197 = arith.maximumf %195, %196 : vector<32x128xf32>
    %198 = arith.truncf %197 : vector<32x128xf32> to vector<32x128xbf16>
    %c0_161 = arith.constant 0 : index
    %c0_162 = arith.constant 0 : index
    %199 = vector.load %arg7[%c0_161, %c0_162] : memref<64x32xbf16, #tpu.memory_space<vmem>>, vector<64x32xbf16>
    %c0_163 = arith.constant 0 : index
    %c0_164 = arith.constant 0 : index
    %200 = vector.load %arg8[%c0_163, %c0_164] : memref<64x1xf32, #tpu.memory_space<vmem>>, vector<64x1xf32>
    %cst_165 = arith.constant dense<0.000000e+00> : vector<64x128xf32>
    %201 = tpu.matmul %199, %198, %cst_165 {dimension_numbers = #tpu.dot_dimension_numbers<[1], [0], [0], [1], [0, 0, 1, 1], [], []>} : vector<64x32xbf16>, vector<32x128xbf16>, vector<64x128xf32> -> vector<64x128xf32>
    %202 = vector.broadcast %200 : vector<64x1xf32> to vector<64x128xf32>
    %203 = arith.addf %201, %202 : vector<64x128xf32>
    %cst_166 = arith.constant 0.000000e+00 : f32
    %204 = vector.broadcast %cst_166 : f32 to vector<64x128xf32>
    %205 = arith.maximumf %203, %204 : vector<64x128xf32>
    %206 = arith.maximumf %180, %205 : vector<64x128xf32>
    %c0_167 = arith.constant 0 : index
    %c8 = arith.constant 8 : index
    %c0_168 = arith.constant 0 : index
    %c0_169 = arith.constant 0 : index
    %207 = vector.load %arg2[%c0_167, %c8, %c0_168, %c0_169] : memref<1x16x8x128xbf16, #tpu.memory_space<vmem>>, vector<1x1x8x128xbf16>
    %208 = vector.shape_cast %207 : vector<1x1x8x128xbf16> to vector<8x128xbf16>
    %c0_170 = arith.constant 0 : index
    %c0_171 = arith.constant 0 : index
    %209 = vector.load %arg3[%c0_170, %c0_171] : memref<16x8xbf16, #tpu.memory_space<vmem>>, vector<16x8xbf16>
    %c0_172 = arith.constant 0 : index
    %c0_173 = arith.constant 0 : index
    %210 = vector.load %arg4[%c0_172, %c0_173] : memref<16x1xf32, #tpu.memory_space<vmem>>, vector<16x1xf32>
    %cst_174 = arith.constant dense<0.000000e+00> : vector<16x128xf32>
    %211 = tpu.matmul %209, %208, %cst_174 {dimension_numbers = #tpu.dot_dimension_numbers<[1], [0], [0], [1], [0, 0, 1, 1], [], []>} : vector<16x8xbf16>, vector<8x128xbf16>, vector<16x128xf32> -> vector<16x128xf32>
    %212 = vector.broadcast %210 : vector<16x1xf32> to vector<16x128xf32>
    %213 = arith.addf %211, %212 : vector<16x128xf32>
    %cst_175 = arith.constant 0.000000e+00 : f32
    %214 = vector.broadcast %cst_175 : f32 to vector<16x128xf32>
    %215 = arith.maximumf %213, %214 : vector<16x128xf32>
    %216 = arith.truncf %215 : vector<16x128xf32> to vector<16x128xbf16>
    %c0_176 = arith.constant 0 : index
    %c0_177 = arith.constant 0 : index
    %217 = vector.load %arg5[%c0_176, %c0_177] : memref<32x16xbf16, #tpu.memory_space<vmem>>, vector<32x16xbf16>
    %c0_178 = arith.constant 0 : index
    %c0_179 = arith.constant 0 : index
    %218 = vector.load %arg6[%c0_178, %c0_179] : memref<32x1xf32, #tpu.memory_space<vmem>>, vector<32x1xf32>
    %cst_180 = arith.constant dense<0.000000e+00> : vector<32x128xf32>
    %219 = tpu.matmul %217, %216, %cst_180 {dimension_numbers = #tpu.dot_dimension_numbers<[1], [0], [0], [1], [0, 0, 1, 1], [], []>} : vector<32x16xbf16>, vector<16x128xbf16>, vector<32x128xf32> -> vector<32x128xf32>
    %220 = vector.broadcast %218 : vector<32x1xf32> to vector<32x128xf32>
    %221 = arith.addf %219, %220 : vector<32x128xf32>
    %cst_181 = arith.constant 0.000000e+00 : f32
    %222 = vector.broadcast %cst_181 : f32 to vector<32x128xf32>
    %223 = arith.maximumf %221, %222 : vector<32x128xf32>
    %224 = arith.truncf %223 : vector<32x128xf32> to vector<32x128xbf16>
    %c0_182 = arith.constant 0 : index
    %c0_183 = arith.constant 0 : index
    %225 = vector.load %arg7[%c0_182, %c0_183] : memref<64x32xbf16, #tpu.memory_space<vmem>>, vector<64x32xbf16>
    %c0_184 = arith.constant 0 : index
    %c0_185 = arith.constant 0 : index
    %226 = vector.load %arg8[%c0_184, %c0_185] : memref<64x1xf32, #tpu.memory_space<vmem>>, vector<64x1xf32>
    %cst_186 = arith.constant dense<0.000000e+00> : vector<64x128xf32>
    %227 = tpu.matmul %225, %224, %cst_186 {dimension_numbers = #tpu.dot_dimension_numbers<[1], [0], [0], [1], [0, 0, 1, 1], [], []>} : vector<64x32xbf16>, vector<32x128xbf16>, vector<64x128xf32> -> vector<64x128xf32>
    %228 = vector.broadcast %226 : vector<64x1xf32> to vector<64x128xf32>
    %229 = arith.addf %227, %228 : vector<64x128xf32>
    %cst_187 = arith.constant 0.000000e+00 : f32
    %230 = vector.broadcast %cst_187 : f32 to vector<64x128xf32>
    %231 = arith.maximumf %229, %230 : vector<64x128xf32>
    %232 = arith.maximumf %206, %231 : vector<64x128xf32>
    %c0_188 = arith.constant 0 : index
    %c9 = arith.constant 9 : index
    %c0_189 = arith.constant 0 : index
    %c0_190 = arith.constant 0 : index
    %233 = vector.load %arg2[%c0_188, %c9, %c0_189, %c0_190] : memref<1x16x8x128xbf16, #tpu.memory_space<vmem>>, vector<1x1x8x128xbf16>
    %234 = vector.shape_cast %233 : vector<1x1x8x128xbf16> to vector<8x128xbf16>
    %c0_191 = arith.constant 0 : index
    %c0_192 = arith.constant 0 : index
    %235 = vector.load %arg3[%c0_191, %c0_192] : memref<16x8xbf16, #tpu.memory_space<vmem>>, vector<16x8xbf16>
    %c0_193 = arith.constant 0 : index
    %c0_194 = arith.constant 0 : index
    %236 = vector.load %arg4[%c0_193, %c0_194] : memref<16x1xf32, #tpu.memory_space<vmem>>, vector<16x1xf32>
    %cst_195 = arith.constant dense<0.000000e+00> : vector<16x128xf32>
    %237 = tpu.matmul %235, %234, %cst_195 {dimension_numbers = #tpu.dot_dimension_numbers<[1], [0], [0], [1], [0, 0, 1, 1], [], []>} : vector<16x8xbf16>, vector<8x128xbf16>, vector<16x128xf32> -> vector<16x128xf32>
    %238 = vector.broadcast %236 : vector<16x1xf32> to vector<16x128xf32>
    %239 = arith.addf %237, %238 : vector<16x128xf32>
    %cst_196 = arith.constant 0.000000e+00 : f32
    %240 = vector.broadcast %cst_196 : f32 to vector<16x128xf32>
    %241 = arith.maximumf %239, %240 : vector<16x128xf32>
    %242 = arith.truncf %241 : vector<16x128xf32> to vector<16x128xbf16>
    %c0_197 = arith.constant 0 : index
    %c0_198 = arith.constant 0 : index
    %243 = vector.load %arg5[%c0_197, %c0_198] : memref<32x16xbf16, #tpu.memory_space<vmem>>, vector<32x16xbf16>
    %c0_199 = arith.constant 0 : index
    %c0_200 = arith.constant 0 : index
    %244 = vector.load %arg6[%c0_199, %c0_200] : memref<32x1xf32, #tpu.memory_space<vmem>>, vector<32x1xf32>
    %cst_201 = arith.constant dense<0.000000e+00> : vector<32x128xf32>
    %245 = tpu.matmul %243, %242, %cst_201 {dimension_numbers = #tpu.dot_dimension_numbers<[1], [0], [0], [1], [0, 0, 1, 1], [], []>} : vector<32x16xbf16>, vector<16x128xbf16>, vector<32x128xf32> -> vector<32x128xf32>
    %246 = vector.broadcast %244 : vector<32x1xf32> to vector<32x128xf32>
    %247 = arith.addf %245, %246 : vector<32x128xf32>
    %cst_202 = arith.constant 0.000000e+00 : f32
    %248 = vector.broadcast %cst_202 : f32 to vector<32x128xf32>
    %249 = arith.maximumf %247, %248 : vector<32x128xf32>
    %250 = arith.truncf %249 : vector<32x128xf32> to vector<32x128xbf16>
    %c0_203 = arith.constant 0 : index
    %c0_204 = arith.constant 0 : index
    %251 = vector.load %arg7[%c0_203, %c0_204] : memref<64x32xbf16, #tpu.memory_space<vmem>>, vector<64x32xbf16>
    %c0_205 = arith.constant 0 : index
    %c0_206 = arith.constant 0 : index
    %252 = vector.load %arg8[%c0_205, %c0_206] : memref<64x1xf32, #tpu.memory_space<vmem>>, vector<64x1xf32>
    %cst_207 = arith.constant dense<0.000000e+00> : vector<64x128xf32>
    %253 = tpu.matmul %251, %250, %cst_207 {dimension_numbers = #tpu.dot_dimension_numbers<[1], [0], [0], [1], [0, 0, 1, 1], [], []>} : vector<64x32xbf16>, vector<32x128xbf16>, vector<64x128xf32> -> vector<64x128xf32>
    %254 = vector.broadcast %252 : vector<64x1xf32> to vector<64x128xf32>
    %255 = arith.addf %253, %254 : vector<64x128xf32>
    %cst_208 = arith.constant 0.000000e+00 : f32
    %256 = vector.broadcast %cst_208 : f32 to vector<64x128xf32>
    %257 = arith.maximumf %255, %256 : vector<64x128xf32>
    %258 = arith.maximumf %232, %257 : vector<64x128xf32>
    %c0_209 = arith.constant 0 : index
    %c10 = arith.constant 10 : index
    %c0_210 = arith.constant 0 : index
    %c0_211 = arith.constant 0 : index
    %259 = vector.load %arg2[%c0_209, %c10, %c0_210, %c0_211] : memref<1x16x8x128xbf16, #tpu.memory_space<vmem>>, vector<1x1x8x128xbf16>
    %260 = vector.shape_cast %259 : vector<1x1x8x128xbf16> to vector<8x128xbf16>
    %c0_212 = arith.constant 0 : index
    %c0_213 = arith.constant 0 : index
    %261 = vector.load %arg3[%c0_212, %c0_213] : memref<16x8xbf16, #tpu.memory_space<vmem>>, vector<16x8xbf16>
    %c0_214 = arith.constant 0 : index
    %c0_215 = arith.constant 0 : index
    %262 = vector.load %arg4[%c0_214, %c0_215] : memref<16x1xf32, #tpu.memory_space<vmem>>, vector<16x1xf32>
    %cst_216 = arith.constant dense<0.000000e+00> : vector<16x128xf32>
    %263 = tpu.matmul %261, %260, %cst_216 {dimension_numbers = #tpu.dot_dimension_numbers<[1], [0], [0], [1], [0, 0, 1, 1], [], []>} : vector<16x8xbf16>, vector<8x128xbf16>, vector<16x128xf32> -> vector<16x128xf32>
    %264 = vector.broadcast %262 : vector<16x1xf32> to vector<16x128xf32>
    %265 = arith.addf %263, %264 : vector<16x128xf32>
    %cst_217 = arith.constant 0.000000e+00 : f32
    %266 = vector.broadcast %cst_217 : f32 to vector<16x128xf32>
    %267 = arith.maximumf %265, %266 : vector<16x128xf32>
    %268 = arith.truncf %267 : vector<16x128xf32> to vector<16x128xbf16>
    %c0_218 = arith.constant 0 : index
    %c0_219 = arith.constant 0 : index
    %269 = vector.load %arg5[%c0_218, %c0_219] : memref<32x16xbf16, #tpu.memory_space<vmem>>, vector<32x16xbf16>
    %c0_220 = arith.constant 0 : index
    %c0_221 = arith.constant 0 : index
    %270 = vector.load %arg6[%c0_220, %c0_221] : memref<32x1xf32, #tpu.memory_space<vmem>>, vector<32x1xf32>
    %cst_222 = arith.constant dense<0.000000e+00> : vector<32x128xf32>
    %271 = tpu.matmul %269, %268, %cst_222 {dimension_numbers = #tpu.dot_dimension_numbers<[1], [0], [0], [1], [0, 0, 1, 1], [], []>} : vector<32x16xbf16>, vector<16x128xbf16>, vector<32x128xf32> -> vector<32x128xf32>
    %272 = vector.broadcast %270 : vector<32x1xf32> to vector<32x128xf32>
    %273 = arith.addf %271, %272 : vector<32x128xf32>
    %cst_223 = arith.constant 0.000000e+00 : f32
    %274 = vector.broadcast %cst_223 : f32 to vector<32x128xf32>
    %275 = arith.maximumf %273, %274 : vector<32x128xf32>
    %276 = arith.truncf %275 : vector<32x128xf32> to vector<32x128xbf16>
    %c0_224 = arith.constant 0 : index
    %c0_225 = arith.constant 0 : index
    %277 = vector.load %arg7[%c0_224, %c0_225] : memref<64x32xbf16, #tpu.memory_space<vmem>>, vector<64x32xbf16>
    %c0_226 = arith.constant 0 : index
    %c0_227 = arith.constant 0 : index
    %278 = vector.load %arg8[%c0_226, %c0_227] : memref<64x1xf32, #tpu.memory_space<vmem>>, vector<64x1xf32>
    %cst_228 = arith.constant dense<0.000000e+00> : vector<64x128xf32>
    %279 = tpu.matmul %277, %276, %cst_228 {dimension_numbers = #tpu.dot_dimension_numbers<[1], [0], [0], [1], [0, 0, 1, 1], [], []>} : vector<64x32xbf16>, vector<32x128xbf16>, vector<64x128xf32> -> vector<64x128xf32>
    %280 = vector.broadcast %278 : vector<64x1xf32> to vector<64x128xf32>
    %281 = arith.addf %279, %280 : vector<64x128xf32>
    %cst_229 = arith.constant 0.000000e+00 : f32
    %282 = vector.broadcast %cst_229 : f32 to vector<64x128xf32>
    %283 = arith.maximumf %281, %282 : vector<64x128xf32>
    %284 = arith.maximumf %258, %283 : vector<64x128xf32>
    %c0_230 = arith.constant 0 : index
    %c11 = arith.constant 11 : index
    %c0_231 = arith.constant 0 : index
    %c0_232 = arith.constant 0 : index
    %285 = vector.load %arg2[%c0_230, %c11, %c0_231, %c0_232] : memref<1x16x8x128xbf16, #tpu.memory_space<vmem>>, vector<1x1x8x128xbf16>
    %286 = vector.shape_cast %285 : vector<1x1x8x128xbf16> to vector<8x128xbf16>
    %c0_233 = arith.constant 0 : index
    %c0_234 = arith.constant 0 : index
    %287 = vector.load %arg3[%c0_233, %c0_234] : memref<16x8xbf16, #tpu.memory_space<vmem>>, vector<16x8xbf16>
    %c0_235 = arith.constant 0 : index
    %c0_236 = arith.constant 0 : index
    %288 = vector.load %arg4[%c0_235, %c0_236] : memref<16x1xf32, #tpu.memory_space<vmem>>, vector<16x1xf32>
    %cst_237 = arith.constant dense<0.000000e+00> : vector<16x128xf32>
    %289 = tpu.matmul %287, %286, %cst_237 {dimension_numbers = #tpu.dot_dimension_numbers<[1], [0], [0], [1], [0, 0, 1, 1], [], []>} : vector<16x8xbf16>, vector<8x128xbf16>, vector<16x128xf32> -> vector<16x128xf32>
    %290 = vector.broadcast %288 : vector<16x1xf32> to vector<16x128xf32>
    %291 = arith.addf %289, %290 : vector<16x128xf32>
    %cst_238 = arith.constant 0.000000e+00 : f32
    %292 = vector.broadcast %cst_238 : f32 to vector<16x128xf32>
    %293 = arith.maximumf %291, %292 : vector<16x128xf32>
    %294 = arith.truncf %293 : vector<16x128xf32> to vector<16x128xbf16>
    %c0_239 = arith.constant 0 : index
    %c0_240 = arith.constant 0 : index
    %295 = vector.load %arg5[%c0_239, %c0_240] : memref<32x16xbf16, #tpu.memory_space<vmem>>, vector<32x16xbf16>
    %c0_241 = arith.constant 0 : index
    %c0_242 = arith.constant 0 : index
    %296 = vector.load %arg6[%c0_241, %c0_242] : memref<32x1xf32, #tpu.memory_space<vmem>>, vector<32x1xf32>
    %cst_243 = arith.constant dense<0.000000e+00> : vector<32x128xf32>
    %297 = tpu.matmul %295, %294, %cst_243 {dimension_numbers = #tpu.dot_dimension_numbers<[1], [0], [0], [1], [0, 0, 1, 1], [], []>} : vector<32x16xbf16>, vector<16x128xbf16>, vector<32x128xf32> -> vector<32x128xf32>
    %298 = vector.broadcast %296 : vector<32x1xf32> to vector<32x128xf32>
    %299 = arith.addf %297, %298 : vector<32x128xf32>
    %cst_244 = arith.constant 0.000000e+00 : f32
    %300 = vector.broadcast %cst_244 : f32 to vector<32x128xf32>
    %301 = arith.maximumf %299, %300 : vector<32x128xf32>
    %302 = arith.truncf %301 : vector<32x128xf32> to vector<32x128xbf16>
    %c0_245 = arith.constant 0 : index
    %c0_246 = arith.constant 0 : index
    %303 = vector.load %arg7[%c0_245, %c0_246] : memref<64x32xbf16, #tpu.memory_space<vmem>>, vector<64x32xbf16>
    %c0_247 = arith.constant 0 : index
    %c0_248 = arith.constant 0 : index
    %304 = vector.load %arg8[%c0_247, %c0_248] : memref<64x1xf32, #tpu.memory_space<vmem>>, vector<64x1xf32>
    %cst_249 = arith.constant dense<0.000000e+00> : vector<64x128xf32>
    %305 = tpu.matmul %303, %302, %cst_249 {dimension_numbers = #tpu.dot_dimension_numbers<[1], [0], [0], [1], [0, 0, 1, 1], [], []>} : vector<64x32xbf16>, vector<32x128xbf16>, vector<64x128xf32> -> vector<64x128xf32>
    %306 = vector.broadcast %304 : vector<64x1xf32> to vector<64x128xf32>
    %307 = arith.addf %305, %306 : vector<64x128xf32>
    %cst_250 = arith.constant 0.000000e+00 : f32
    %308 = vector.broadcast %cst_250 : f32 to vector<64x128xf32>
    %309 = arith.maximumf %307, %308 : vector<64x128xf32>
    %310 = arith.maximumf %284, %309 : vector<64x128xf32>
    %c0_251 = arith.constant 0 : index
    %c12 = arith.constant 12 : index
    %c0_252 = arith.constant 0 : index
    %c0_253 = arith.constant 0 : index
    %311 = vector.load %arg2[%c0_251, %c12, %c0_252, %c0_253] : memref<1x16x8x128xbf16, #tpu.memory_space<vmem>>, vector<1x1x8x128xbf16>
    %312 = vector.shape_cast %311 : vector<1x1x8x128xbf16> to vector<8x128xbf16>
    %c0_254 = arith.constant 0 : index
    %c0_255 = arith.constant 0 : index
    %313 = vector.load %arg3[%c0_254, %c0_255] : memref<16x8xbf16, #tpu.memory_space<vmem>>, vector<16x8xbf16>
    %c0_256 = arith.constant 0 : index
    %c0_257 = arith.constant 0 : index
    %314 = vector.load %arg4[%c0_256, %c0_257] : memref<16x1xf32, #tpu.memory_space<vmem>>, vector<16x1xf32>
    %cst_258 = arith.constant dense<0.000000e+00> : vector<16x128xf32>
    %315 = tpu.matmul %313, %312, %cst_258 {dimension_numbers = #tpu.dot_dimension_numbers<[1], [0], [0], [1], [0, 0, 1, 1], [], []>} : vector<16x8xbf16>, vector<8x128xbf16>, vector<16x128xf32> -> vector<16x128xf32>
    %316 = vector.broadcast %314 : vector<16x1xf32> to vector<16x128xf32>
    %317 = arith.addf %315, %316 : vector<16x128xf32>
    %cst_259 = arith.constant 0.000000e+00 : f32
    %318 = vector.broadcast %cst_259 : f32 to vector<16x128xf32>
    %319 = arith.maximumf %317, %318 : vector<16x128xf32>
    %320 = arith.truncf %319 : vector<16x128xf32> to vector<16x128xbf16>
    %c0_260 = arith.constant 0 : index
    %c0_261 = arith.constant 0 : index
    %321 = vector.load %arg5[%c0_260, %c0_261] : memref<32x16xbf16, #tpu.memory_space<vmem>>, vector<32x16xbf16>
    %c0_262 = arith.constant 0 : index
    %c0_263 = arith.constant 0 : index
    %322 = vector.load %arg6[%c0_262, %c0_263] : memref<32x1xf32, #tpu.memory_space<vmem>>, vector<32x1xf32>
    %cst_264 = arith.constant dense<0.000000e+00> : vector<32x128xf32>
    %323 = tpu.matmul %321, %320, %cst_264 {dimension_numbers = #tpu.dot_dimension_numbers<[1], [0], [0], [1], [0, 0, 1, 1], [], []>} : vector<32x16xbf16>, vector<16x128xbf16>, vector<32x128xf32> -> vector<32x128xf32>
    %324 = vector.broadcast %322 : vector<32x1xf32> to vector<32x128xf32>
    %325 = arith.addf %323, %324 : vector<32x128xf32>
    %cst_265 = arith.constant 0.000000e+00 : f32
    %326 = vector.broadcast %cst_265 : f32 to vector<32x128xf32>
    %327 = arith.maximumf %325, %326 : vector<32x128xf32>
    %328 = arith.truncf %327 : vector<32x128xf32> to vector<32x128xbf16>
    %c0_266 = arith.constant 0 : index
    %c0_267 = arith.constant 0 : index
    %329 = vector.load %arg7[%c0_266, %c0_267] : memref<64x32xbf16, #tpu.memory_space<vmem>>, vector<64x32xbf16>
    %c0_268 = arith.constant 0 : index
    %c0_269 = arith.constant 0 : index
    %330 = vector.load %arg8[%c0_268, %c0_269] : memref<64x1xf32, #tpu.memory_space<vmem>>, vector<64x1xf32>
    %cst_270 = arith.constant dense<0.000000e+00> : vector<64x128xf32>
    %331 = tpu.matmul %329, %328, %cst_270 {dimension_numbers = #tpu.dot_dimension_numbers<[1], [0], [0], [1], [0, 0, 1, 1], [], []>} : vector<64x32xbf16>, vector<32x128xbf16>, vector<64x128xf32> -> vector<64x128xf32>
    %332 = vector.broadcast %330 : vector<64x1xf32> to vector<64x128xf32>
    %333 = arith.addf %331, %332 : vector<64x128xf32>
    %cst_271 = arith.constant 0.000000e+00 : f32
    %334 = vector.broadcast %cst_271 : f32 to vector<64x128xf32>
    %335 = arith.maximumf %333, %334 : vector<64x128xf32>
    %336 = arith.maximumf %310, %335 : vector<64x128xf32>
    %c0_272 = arith.constant 0 : index
    %c13 = arith.constant 13 : index
    %c0_273 = arith.constant 0 : index
    %c0_274 = arith.constant 0 : index
    %337 = vector.load %arg2[%c0_272, %c13, %c0_273, %c0_274] : memref<1x16x8x128xbf16, #tpu.memory_space<vmem>>, vector<1x1x8x128xbf16>
    %338 = vector.shape_cast %337 : vector<1x1x8x128xbf16> to vector<8x128xbf16>
    %c0_275 = arith.constant 0 : index
    %c0_276 = arith.constant 0 : index
    %339 = vector.load %arg3[%c0_275, %c0_276] : memref<16x8xbf16, #tpu.memory_space<vmem>>, vector<16x8xbf16>
    %c0_277 = arith.constant 0 : index
    %c0_278 = arith.constant 0 : index
    %340 = vector.load %arg4[%c0_277, %c0_278] : memref<16x1xf32, #tpu.memory_space<vmem>>, vector<16x1xf32>
    %cst_279 = arith.constant dense<0.000000e+00> : vector<16x128xf32>
    %341 = tpu.matmul %339, %338, %cst_279 {dimension_numbers = #tpu.dot_dimension_numbers<[1], [0], [0], [1], [0, 0, 1, 1], [], []>} : vector<16x8xbf16>, vector<8x128xbf16>, vector<16x128xf32> -> vector<16x128xf32>
    %342 = vector.broadcast %340 : vector<16x1xf32> to vector<16x128xf32>
    %343 = arith.addf %341, %342 : vector<16x128xf32>
    %cst_280 = arith.constant 0.000000e+00 : f32
    %344 = vector.broadcast %cst_280 : f32 to vector<16x128xf32>
    %345 = arith.maximumf %343, %344 : vector<16x128xf32>
    %346 = arith.truncf %345 : vector<16x128xf32> to vector<16x128xbf16>
    %c0_281 = arith.constant 0 : index
    %c0_282 = arith.constant 0 : index
    %347 = vector.load %arg5[%c0_281, %c0_282] : memref<32x16xbf16, #tpu.memory_space<vmem>>, vector<32x16xbf16>
    %c0_283 = arith.constant 0 : index
    %c0_284 = arith.constant 0 : index
    %348 = vector.load %arg6[%c0_283, %c0_284] : memref<32x1xf32, #tpu.memory_space<vmem>>, vector<32x1xf32>
    %cst_285 = arith.constant dense<0.000000e+00> : vector<32x128xf32>
    %349 = tpu.matmul %347, %346, %cst_285 {dimension_numbers = #tpu.dot_dimension_numbers<[1], [0], [0], [1], [0, 0, 1, 1], [], []>} : vector<32x16xbf16>, vector<16x128xbf16>, vector<32x128xf32> -> vector<32x128xf32>
    %350 = vector.broadcast %348 : vector<32x1xf32> to vector<32x128xf32>
    %351 = arith.addf %349, %350 : vector<32x128xf32>
    %cst_286 = arith.constant 0.000000e+00 : f32
    %352 = vector.broadcast %cst_286 : f32 to vector<32x128xf32>
    %353 = arith.maximumf %351, %352 : vector<32x128xf32>
    %354 = arith.truncf %353 : vector<32x128xf32> to vector<32x128xbf16>
    %c0_287 = arith.constant 0 : index
    %c0_288 = arith.constant 0 : index
    %355 = vector.load %arg7[%c0_287, %c0_288] : memref<64x32xbf16, #tpu.memory_space<vmem>>, vector<64x32xbf16>
    %c0_289 = arith.constant 0 : index
    %c0_290 = arith.constant 0 : index
    %356 = vector.load %arg8[%c0_289, %c0_290] : memref<64x1xf32, #tpu.memory_space<vmem>>, vector<64x1xf32>
    %cst_291 = arith.constant dense<0.000000e+00> : vector<64x128xf32>
    %357 = tpu.matmul %355, %354, %cst_291 {dimension_numbers = #tpu.dot_dimension_numbers<[1], [0], [0], [1], [0, 0, 1, 1], [], []>} : vector<64x32xbf16>, vector<32x128xbf16>, vector<64x128xf32> -> vector<64x128xf32>
    %358 = vector.broadcast %356 : vector<64x1xf32> to vector<64x128xf32>
    %359 = arith.addf %357, %358 : vector<64x128xf32>
    %cst_292 = arith.constant 0.000000e+00 : f32
    %360 = vector.broadcast %cst_292 : f32 to vector<64x128xf32>
    %361 = arith.maximumf %359, %360 : vector<64x128xf32>
    %362 = arith.maximumf %336, %361 : vector<64x128xf32>
    %c0_293 = arith.constant 0 : index
    %c14 = arith.constant 14 : index
    %c0_294 = arith.constant 0 : index
    %c0_295 = arith.constant 0 : index
    %363 = vector.load %arg2[%c0_293, %c14, %c0_294, %c0_295] : memref<1x16x8x128xbf16, #tpu.memory_space<vmem>>, vector<1x1x8x128xbf16>
    %364 = vector.shape_cast %363 : vector<1x1x8x128xbf16> to vector<8x128xbf16>
    %c0_296 = arith.constant 0 : index
    %c0_297 = arith.constant 0 : index
    %365 = vector.load %arg3[%c0_296, %c0_297] : memref<16x8xbf16, #tpu.memory_space<vmem>>, vector<16x8xbf16>
    %c0_298 = arith.constant 0 : index
    %c0_299 = arith.constant 0 : index
    %366 = vector.load %arg4[%c0_298, %c0_299] : memref<16x1xf32, #tpu.memory_space<vmem>>, vector<16x1xf32>
    %cst_300 = arith.constant dense<0.000000e+00> : vector<16x128xf32>
    %367 = tpu.matmul %365, %364, %cst_300 {dimension_numbers = #tpu.dot_dimension_numbers<[1], [0], [0], [1], [0, 0, 1, 1], [], []>} : vector<16x8xbf16>, vector<8x128xbf16>, vector<16x128xf32> -> vector<16x128xf32>
    %368 = vector.broadcast %366 : vector<16x1xf32> to vector<16x128xf32>
    %369 = arith.addf %367, %368 : vector<16x128xf32>
    %cst_301 = arith.constant 0.000000e+00 : f32
    %370 = vector.broadcast %cst_301 : f32 to vector<16x128xf32>
    %371 = arith.maximumf %369, %370 : vector<16x128xf32>
    %372 = arith.truncf %371 : vector<16x128xf32> to vector<16x128xbf16>
    %c0_302 = arith.constant 0 : index
    %c0_303 = arith.constant 0 : index
    %373 = vector.load %arg5[%c0_302, %c0_303] : memref<32x16xbf16, #tpu.memory_space<vmem>>, vector<32x16xbf16>
    %c0_304 = arith.constant 0 : index
    %c0_305 = arith.constant 0 : index
    %374 = vector.load %arg6[%c0_304, %c0_305] : memref<32x1xf32, #tpu.memory_space<vmem>>, vector<32x1xf32>
    %cst_306 = arith.constant dense<0.000000e+00> : vector<32x128xf32>
    %375 = tpu.matmul %373, %372, %cst_306 {dimension_numbers = #tpu.dot_dimension_numbers<[1], [0], [0], [1], [0, 0, 1, 1], [], []>} : vector<32x16xbf16>, vector<16x128xbf16>, vector<32x128xf32> -> vector<32x128xf32>
    %376 = vector.broadcast %374 : vector<32x1xf32> to vector<32x128xf32>
    %377 = arith.addf %375, %376 : vector<32x128xf32>
    %cst_307 = arith.constant 0.000000e+00 : f32
    %378 = vector.broadcast %cst_307 : f32 to vector<32x128xf32>
    %379 = arith.maximumf %377, %378 : vector<32x128xf32>
    %380 = arith.truncf %379 : vector<32x128xf32> to vector<32x128xbf16>
    %c0_308 = arith.constant 0 : index
    %c0_309 = arith.constant 0 : index
    %381 = vector.load %arg7[%c0_308, %c0_309] : memref<64x32xbf16, #tpu.memory_space<vmem>>, vector<64x32xbf16>
    %c0_310 = arith.constant 0 : index
    %c0_311 = arith.constant 0 : index
    %382 = vector.load %arg8[%c0_310, %c0_311] : memref<64x1xf32, #tpu.memory_space<vmem>>, vector<64x1xf32>
    %cst_312 = arith.constant dense<0.000000e+00> : vector<64x128xf32>
    %383 = tpu.matmul %381, %380, %cst_312 {dimension_numbers = #tpu.dot_dimension_numbers<[1], [0], [0], [1], [0, 0, 1, 1], [], []>} : vector<64x32xbf16>, vector<32x128xbf16>, vector<64x128xf32> -> vector<64x128xf32>
    %384 = vector.broadcast %382 : vector<64x1xf32> to vector<64x128xf32>
    %385 = arith.addf %383, %384 : vector<64x128xf32>
    %cst_313 = arith.constant 0.000000e+00 : f32
    %386 = vector.broadcast %cst_313 : f32 to vector<64x128xf32>
    %387 = arith.maximumf %385, %386 : vector<64x128xf32>
    %388 = arith.maximumf %362, %387 : vector<64x128xf32>
    %c0_314 = arith.constant 0 : index
    %c15 = arith.constant 15 : index
    %c0_315 = arith.constant 0 : index
    %c0_316 = arith.constant 0 : index
    %389 = vector.load %arg2[%c0_314, %c15, %c0_315, %c0_316] : memref<1x16x8x128xbf16, #tpu.memory_space<vmem>>, vector<1x1x8x128xbf16>
    %390 = vector.shape_cast %389 : vector<1x1x8x128xbf16> to vector<8x128xbf16>
    %c0_317 = arith.constant 0 : index
    %c0_318 = arith.constant 0 : index
    %391 = vector.load %arg3[%c0_317, %c0_318] : memref<16x8xbf16, #tpu.memory_space<vmem>>, vector<16x8xbf16>
    %c0_319 = arith.constant 0 : index
    %c0_320 = arith.constant 0 : index
    %392 = vector.load %arg4[%c0_319, %c0_320] : memref<16x1xf32, #tpu.memory_space<vmem>>, vector<16x1xf32>
    %cst_321 = arith.constant dense<0.000000e+00> : vector<16x128xf32>
    %393 = tpu.matmul %391, %390, %cst_321 {dimension_numbers = #tpu.dot_dimension_numbers<[1], [0], [0], [1], [0, 0, 1, 1], [], []>} : vector<16x8xbf16>, vector<8x128xbf16>, vector<16x128xf32> -> vector<16x128xf32>
    %394 = vector.broadcast %392 : vector<16x1xf32> to vector<16x128xf32>
    %395 = arith.addf %393, %394 : vector<16x128xf32>
    %cst_322 = arith.constant 0.000000e+00 : f32
    %396 = vector.broadcast %cst_322 : f32 to vector<16x128xf32>
    %397 = arith.maximumf %395, %396 : vector<16x128xf32>
    %398 = arith.truncf %397 : vector<16x128xf32> to vector<16x128xbf16>
    %c0_323 = arith.constant 0 : index
    %c0_324 = arith.constant 0 : index
    %399 = vector.load %arg5[%c0_323, %c0_324] : memref<32x16xbf16, #tpu.memory_space<vmem>>, vector<32x16xbf16>
    %c0_325 = arith.constant 0 : index
    %c0_326 = arith.constant 0 : index
    %400 = vector.load %arg6[%c0_325, %c0_326] : memref<32x1xf32, #tpu.memory_space<vmem>>, vector<32x1xf32>
    %cst_327 = arith.constant dense<0.000000e+00> : vector<32x128xf32>
    %401 = tpu.matmul %399, %398, %cst_327 {dimension_numbers = #tpu.dot_dimension_numbers<[1], [0], [0], [1], [0, 0, 1, 1], [], []>} : vector<32x16xbf16>, vector<16x128xbf16>, vector<32x128xf32> -> vector<32x128xf32>
    %402 = vector.broadcast %400 : vector<32x1xf32> to vector<32x128xf32>
    %403 = arith.addf %401, %402 : vector<32x128xf32>
    %cst_328 = arith.constant 0.000000e+00 : f32
    %404 = vector.broadcast %cst_328 : f32 to vector<32x128xf32>
    %405 = arith.maximumf %403, %404 : vector<32x128xf32>
    %406 = arith.truncf %405 : vector<32x128xf32> to vector<32x128xbf16>
    %c0_329 = arith.constant 0 : index
    %c0_330 = arith.constant 0 : index
    %407 = vector.load %arg7[%c0_329, %c0_330] : memref<64x32xbf16, #tpu.memory_space<vmem>>, vector<64x32xbf16>
    %c0_331 = arith.constant 0 : index
    %c0_332 = arith.constant 0 : index
    %408 = vector.load %arg8[%c0_331, %c0_332] : memref<64x1xf32, #tpu.memory_space<vmem>>, vector<64x1xf32>
    %cst_333 = arith.constant dense<0.000000e+00> : vector<64x128xf32>
    %409 = tpu.matmul %407, %406, %cst_333 {dimension_numbers = #tpu.dot_dimension_numbers<[1], [0], [0], [1], [0, 0, 1, 1], [], []>} : vector<64x32xbf16>, vector<32x128xbf16>, vector<64x128xf32> -> vector<64x128xf32>
    %410 = vector.broadcast %408 : vector<64x1xf32> to vector<64x128xf32>
    %411 = arith.addf %409, %410 : vector<64x128xf32>
    %cst_334 = arith.constant 0.000000e+00 : f32
    %412 = vector.broadcast %cst_334 : f32 to vector<64x128xf32>
    %413 = arith.maximumf %411, %412 : vector<64x128xf32>
    %414 = arith.maximumf %388, %413 : vector<64x128xf32>
    %c0_335 = arith.constant 0 : index
    %c0_336 = arith.constant 0 : index
    %c0_337 = arith.constant 0 : index
    %415 = vector.load %arg9[%c0_335, %c0_336, %c0_337] : memref<1x64x128xf32, #tpu.memory_space<vmem>>, vector<1x64x128xf32>
    %416 = vector.shape_cast %415 : vector<1x64x128xf32> to vector<64x128xf32>
    %417 = vector.shape_cast %414 : vector<64x128xf32> to vector<1x64x128xf32>
    tpu.vector_store %arg9[%c0_335, %c0_336, %c0_337], %417 {strides = array<i32>} : memref<1x64x128xf32, #tpu.memory_space<vmem>>, vector<1x64x128xf32>,
    return
  }
  func.func @transform_0(%arg0: i32, %arg1: i32) -> (i32, i32, i32, i32) {
    %c0_i32 = arith.constant 0 : i32
    %c0_i32_0 = arith.constant 0 : i32
    %c0_i32_1 = arith.constant 0 : i32
    return %arg0, %c0_i32, %c0_i32_0, %arg1 : i32, i32, i32, i32
  }
  func.func @transform_1(%arg0: i32, %arg1: i32) -> (i32, i32) {
    %c0_i32 = arith.constant 0 : i32
    %c0_i32_0 = arith.constant 0 : i32
    %c0_i32_1 = arith.constant 0 : i32
    return %c0_i32, %c0_i32_0 : i32, i32
  }
  func.func @transform_2(%arg0: i32, %arg1: i32) -> (i32, i32) {
    %c0_i32 = arith.constant 0 : i32
    %c0_i32_0 = arith.constant 0 : i32
    %c0_i32_1 = arith.constant 0 : i32
    return %c0_i32, %c0_i32_0 : i32, i32
  }
  func.func @transform_3(%arg0: i32, %arg1: i32) -> (i32, i32) {
    %c0_i32 = arith.constant 0 : i32
    %c0_i32_0 = arith.constant 0 : i32
    %c0_i32_1 = arith.constant 0 : i32
    return %c0_i32, %c0_i32_0 : i32, i32
  }
  func.func @transform_4(%arg0: i32, %arg1: i32) -> (i32, i32) {
    %c0_i32 = arith.constant 0 : i32
    %c0_i32_0 = arith.constant 0 : i32
    %c0_i32_1 = arith.constant 0 : i32
    return %c0_i32, %c0_i32_0 : i32, i32
  }
  func.func @transform_5(%arg0: i32, %arg1: i32) -> (i32, i32) {
    %c0_i32 = arith.constant 0 : i32
    %c0_i32_0 = arith.constant 0 : i32
    %c0_i32_1 = arith.constant 0 : i32
    return %c0_i32, %c0_i32_0 : i32, i32
  }
  func.func @transform_6(%arg0: i32, %arg1: i32) -> (i32, i32) {
    %c0_i32 = arith.constant 0 : i32
    %c0_i32_0 = arith.constant 0 : i32
    %c0_i32_1 = arith.constant 0 : i32
    return %c0_i32, %c0_i32_0 : i32, i32
  }
  func.func @transform_7(%arg0: i32, %arg1: i32) -> (i32, i32, i32) {
    %c0_i32 = arith.constant 0 : i32
    %c0_i32_0 = arith.constant 0 : i32
    return %arg0, %c0_i32, %arg1 : i32, i32, i32
  }
}

module attributes {stable_mosaic.version = 11 : i64} {
  func.func @kernel(%arg0: i32, %arg1: i32, %arg2: memref<1x8x8x128xbf16, #tpu.memory_space<vmem>>, %arg3: memref<16x8xbf16, #tpu.memory_space<vmem>>, %arg4: memref<16x1xf32, #tpu.memory_space<vmem>>, %arg5: memref<32x16xbf16, #tpu.memory_space<vmem>>, %arg6: memref<32x1xf32, #tpu.memory_space<vmem>>, %arg7: memref<1x32x128xf32, #tpu.memory_space<vmem>>) attributes {dimension_semantics = [#tpu.dimension_semantics<parallel>, #tpu.dimension_semantics<parallel>], iteration_bounds = array<i64: 2, 1>, scalar_prefetch = 0 : i64, scratch_operands = 0 : i64, tpu.core_type = #tpu.core_type<tc>, window_params = [{transform_indices = @transform_0, window_bounds = array<i64: 1, 8, 8, 128>}, {pipeline_mode = #tpu.pipeline_mode<synchronous>, transform_indices = @transform_1, window_bounds = array<i64: 16, 8>}, {pipeline_mode = #tpu.pipeline_mode<synchronous>, transform_indices = @transform_2, window_bounds = array<i64: 16, 1>}, {pipeline_mode = #tpu.pipeline_mode<synchronous>, transform_indices = @transform_3, window_bounds = array<i64: 32, 16>}, {pipeline_mode = #tpu.pipeline_mode<synchronous>, transform_indices = @transform_4, window_bounds = array<i64: 32, 1>}, {transform_indices = @transform_5, window_bounds = array<i64: 1, 32, 128>}]} {
    %c0 = arith.constant 0 : index
    %c0_0 = arith.constant 0 : index
    %c0_1 = arith.constant 0 : index
    %c0_2 = arith.constant 0 : index
    %0 = vector.load %arg2[%c0, %c0_0, %c0_1, %c0_2] : memref<1x8x8x128xbf16, #tpu.memory_space<vmem>>, vector<1x1x8x128xbf16>
    %1 = vector.shape_cast %0 : vector<1x1x8x128xbf16> to vector<8x128xbf16>
    %c0_3 = arith.constant 0 : index
    %c0_4 = arith.constant 0 : index
    %2 = vector.load %arg3[%c0_3, %c0_4] : memref<16x8xbf16, #tpu.memory_space<vmem>>, vector<16x8xbf16>
    %c0_5 = arith.constant 0 : index
    %c0_6 = arith.constant 0 : index
    %3 = vector.load %arg4[%c0_5, %c0_6] : memref<16x1xf32, #tpu.memory_space<vmem>>, vector<16x1xf32>
    %cst = arith.constant dense<0.000000e+00> : vector<16x128xf32>
    %4 = tpu.matmul %2, %1, %cst {dimension_numbers = #tpu.dot_dimension_numbers<[1], [0], [0], [1], [0, 0, 1, 1], [], []>} : vector<16x8xbf16>, vector<8x128xbf16>, vector<16x128xf32> -> vector<16x128xf32>
    %5 = vector.broadcast %3 : vector<16x1xf32> to vector<16x128xf32>
    %6 = arith.addf %4, %5 : vector<16x128xf32>
    %cst_7 = arith.constant 0.000000e+00 : f32
    %7 = vector.broadcast %cst_7 : f32 to vector<16x128xf32>
    %8 = arith.maximumf %6, %7 : vector<16x128xf32>
    %9 = arith.truncf %8 : vector<16x128xf32> to vector<16x128xbf16>
    %c0_8 = arith.constant 0 : index
    %c0_9 = arith.constant 0 : index
    %10 = vector.load %arg5[%c0_8, %c0_9] : memref<32x16xbf16, #tpu.memory_space<vmem>>, vector<32x16xbf16>
    %c0_10 = arith.constant 0 : index
    %c0_11 = arith.constant 0 : index
    %11 = vector.load %arg6[%c0_10, %c0_11] : memref<32x1xf32, #tpu.memory_space<vmem>>, vector<32x1xf32>
    %cst_12 = arith.constant dense<0.000000e+00> : vector<32x128xf32>
    %12 = tpu.matmul %10, %9, %cst_12 {dimension_numbers = #tpu.dot_dimension_numbers<[1], [0], [0], [1], [0, 0, 1, 1], [], []>} : vector<32x16xbf16>, vector<16x128xbf16>, vector<32x128xf32> -> vector<32x128xf32>
    %13 = vector.broadcast %11 : vector<32x1xf32> to vector<32x128xf32>
    %14 = arith.addf %12, %13 : vector<32x128xf32>
    %cst_13 = arith.constant 0.000000e+00 : f32
    %15 = vector.broadcast %cst_13 : f32 to vector<32x128xf32>
    %16 = arith.maximumf %14, %15 : vector<32x128xf32>
    %c0_14 = arith.constant 0 : index
    %c1 = arith.constant 1 : index
    %c0_15 = arith.constant 0 : index
    %c0_16 = arith.constant 0 : index
    %17 = vector.load %arg2[%c0_14, %c1, %c0_15, %c0_16] : memref<1x8x8x128xbf16, #tpu.memory_space<vmem>>, vector<1x1x8x128xbf16>
    %18 = vector.shape_cast %17 : vector<1x1x8x128xbf16> to vector<8x128xbf16>
    %c0_17 = arith.constant 0 : index
    %c0_18 = arith.constant 0 : index
    %19 = vector.load %arg3[%c0_17, %c0_18] : memref<16x8xbf16, #tpu.memory_space<vmem>>, vector<16x8xbf16>
    %c0_19 = arith.constant 0 : index
    %c0_20 = arith.constant 0 : index
    %20 = vector.load %arg4[%c0_19, %c0_20] : memref<16x1xf32, #tpu.memory_space<vmem>>, vector<16x1xf32>
    %cst_21 = arith.constant dense<0.000000e+00> : vector<16x128xf32>
    %21 = tpu.matmul %19, %18, %cst_21 {dimension_numbers = #tpu.dot_dimension_numbers<[1], [0], [0], [1], [0, 0, 1, 1], [], []>} : vector<16x8xbf16>, vector<8x128xbf16>, vector<16x128xf32> -> vector<16x128xf32>
    %22 = vector.broadcast %20 : vector<16x1xf32> to vector<16x128xf32>
    %23 = arith.addf %21, %22 : vector<16x128xf32>
    %cst_22 = arith.constant 0.000000e+00 : f32
    %24 = vector.broadcast %cst_22 : f32 to vector<16x128xf32>
    %25 = arith.maximumf %23, %24 : vector<16x128xf32>
    %26 = arith.truncf %25 : vector<16x128xf32> to vector<16x128xbf16>
    %c0_23 = arith.constant 0 : index
    %c0_24 = arith.constant 0 : index
    %27 = vector.load %arg5[%c0_23, %c0_24] : memref<32x16xbf16, #tpu.memory_space<vmem>>, vector<32x16xbf16>
    %c0_25 = arith.constant 0 : index
    %c0_26 = arith.constant 0 : index
    %28 = vector.load %arg6[%c0_25, %c0_26] : memref<32x1xf32, #tpu.memory_space<vmem>>, vector<32x1xf32>
    %cst_27 = arith.constant dense<0.000000e+00> : vector<32x128xf32>
    %29 = tpu.matmul %27, %26, %cst_27 {dimension_numbers = #tpu.dot_dimension_numbers<[1], [0], [0], [1], [0, 0, 1, 1], [], []>} : vector<32x16xbf16>, vector<16x128xbf16>, vector<32x128xf32> -> vector<32x128xf32>
    %30 = vector.broadcast %28 : vector<32x1xf32> to vector<32x128xf32>
    %31 = arith.addf %29, %30 : vector<32x128xf32>
    %cst_28 = arith.constant 0.000000e+00 : f32
    %32 = vector.broadcast %cst_28 : f32 to vector<32x128xf32>
    %33 = arith.maximumf %31, %32 : vector<32x128xf32>
    %34 = arith.maximumf %16, %33 : vector<32x128xf32>
    %c0_29 = arith.constant 0 : index
    %c2 = arith.constant 2 : index
    %c0_30 = arith.constant 0 : index
    %c0_31 = arith.constant 0 : index
    %35 = vector.load %arg2[%c0_29, %c2, %c0_30, %c0_31] : memref<1x8x8x128xbf16, #tpu.memory_space<vmem>>, vector<1x1x8x128xbf16>
    %36 = vector.shape_cast %35 : vector<1x1x8x128xbf16> to vector<8x128xbf16>
    %c0_32 = arith.constant 0 : index
    %c0_33 = arith.constant 0 : index
    %37 = vector.load %arg3[%c0_32, %c0_33] : memref<16x8xbf16, #tpu.memory_space<vmem>>, vector<16x8xbf16>
    %c0_34 = arith.constant 0 : index
    %c0_35 = arith.constant 0 : index
    %38 = vector.load %arg4[%c0_34, %c0_35] : memref<16x1xf32, #tpu.memory_space<vmem>>, vector<16x1xf32>
    %cst_36 = arith.constant dense<0.000000e+00> : vector<16x128xf32>
    %39 = tpu.matmul %37, %36, %cst_36 {dimension_numbers = #tpu.dot_dimension_numbers<[1], [0], [0], [1], [0, 0, 1, 1], [], []>} : vector<16x8xbf16>, vector<8x128xbf16>, vector<16x128xf32> -> vector<16x128xf32>
    %40 = vector.broadcast %38 : vector<16x1xf32> to vector<16x128xf32>
    %41 = arith.addf %39, %40 : vector<16x128xf32>
    %cst_37 = arith.constant 0.000000e+00 : f32
    %42 = vector.broadcast %cst_37 : f32 to vector<16x128xf32>
    %43 = arith.maximumf %41, %42 : vector<16x128xf32>
    %44 = arith.truncf %43 : vector<16x128xf32> to vector<16x128xbf16>
    %c0_38 = arith.constant 0 : index
    %c0_39 = arith.constant 0 : index
    %45 = vector.load %arg5[%c0_38, %c0_39] : memref<32x16xbf16, #tpu.memory_space<vmem>>, vector<32x16xbf16>
    %c0_40 = arith.constant 0 : index
    %c0_41 = arith.constant 0 : index
    %46 = vector.load %arg6[%c0_40, %c0_41] : memref<32x1xf32, #tpu.memory_space<vmem>>, vector<32x1xf32>
    %cst_42 = arith.constant dense<0.000000e+00> : vector<32x128xf32>
    %47 = tpu.matmul %45, %44, %cst_42 {dimension_numbers = #tpu.dot_dimension_numbers<[1], [0], [0], [1], [0, 0, 1, 1], [], []>} : vector<32x16xbf16>, vector<16x128xbf16>, vector<32x128xf32> -> vector<32x128xf32>
    %48 = vector.broadcast %46 : vector<32x1xf32> to vector<32x128xf32>
    %49 = arith.addf %47, %48 : vector<32x128xf32>
    %cst_43 = arith.constant 0.000000e+00 : f32
    %50 = vector.broadcast %cst_43 : f32 to vector<32x128xf32>
    %51 = arith.maximumf %49, %50 : vector<32x128xf32>
    %52 = arith.maximumf %34, %51 : vector<32x128xf32>
    %c0_44 = arith.constant 0 : index
    %c3 = arith.constant 3 : index
    %c0_45 = arith.constant 0 : index
    %c0_46 = arith.constant 0 : index
    %53 = vector.load %arg2[%c0_44, %c3, %c0_45, %c0_46] : memref<1x8x8x128xbf16, #tpu.memory_space<vmem>>, vector<1x1x8x128xbf16>
    %54 = vector.shape_cast %53 : vector<1x1x8x128xbf16> to vector<8x128xbf16>
    %c0_47 = arith.constant 0 : index
    %c0_48 = arith.constant 0 : index
    %55 = vector.load %arg3[%c0_47, %c0_48] : memref<16x8xbf16, #tpu.memory_space<vmem>>, vector<16x8xbf16>
    %c0_49 = arith.constant 0 : index
    %c0_50 = arith.constant 0 : index
    %56 = vector.load %arg4[%c0_49, %c0_50] : memref<16x1xf32, #tpu.memory_space<vmem>>, vector<16x1xf32>
    %cst_51 = arith.constant dense<0.000000e+00> : vector<16x128xf32>
    %57 = tpu.matmul %55, %54, %cst_51 {dimension_numbers = #tpu.dot_dimension_numbers<[1], [0], [0], [1], [0, 0, 1, 1], [], []>} : vector<16x8xbf16>, vector<8x128xbf16>, vector<16x128xf32> -> vector<16x128xf32>
    %58 = vector.broadcast %56 : vector<16x1xf32> to vector<16x128xf32>
    %59 = arith.addf %57, %58 : vector<16x128xf32>
    %cst_52 = arith.constant 0.000000e+00 : f32
    %60 = vector.broadcast %cst_52 : f32 to vector<16x128xf32>
    %61 = arith.maximumf %59, %60 : vector<16x128xf32>
    %62 = arith.truncf %61 : vector<16x128xf32> to vector<16x128xbf16>
    %c0_53 = arith.constant 0 : index
    %c0_54 = arith.constant 0 : index
    %63 = vector.load %arg5[%c0_53, %c0_54] : memref<32x16xbf16, #tpu.memory_space<vmem>>, vector<32x16xbf16>
    %c0_55 = arith.constant 0 : index
    %c0_56 = arith.constant 0 : index
    %64 = vector.load %arg6[%c0_55, %c0_56] : memref<32x1xf32, #tpu.memory_space<vmem>>, vector<32x1xf32>
    %cst_57 = arith.constant dense<0.000000e+00> : vector<32x128xf32>
    %65 = tpu.matmul %63, %62, %cst_57 {dimension_numbers = #tpu.dot_dimension_numbers<[1], [0], [0], [1], [0, 0, 1, 1], [], []>} : vector<32x16xbf16>, vector<16x128xbf16>, vector<32x128xf32> -> vector<32x128xf32>
    %66 = vector.broadcast %64 : vector<32x1xf32> to vector<32x128xf32>
    %67 = arith.addf %65, %66 : vector<32x128xf32>
    %cst_58 = arith.constant 0.000000e+00 : f32
    %68 = vector.broadcast %cst_58 : f32 to vector<32x128xf32>
    %69 = arith.maximumf %67, %68 : vector<32x128xf32>
    %70 = arith.maximumf %52, %69 : vector<32x128xf32>
    %c0_59 = arith.constant 0 : index
    %c4 = arith.constant 4 : index
    %c0_60 = arith.constant 0 : index
    %c0_61 = arith.constant 0 : index
    %71 = vector.load %arg2[%c0_59, %c4, %c0_60, %c0_61] : memref<1x8x8x128xbf16, #tpu.memory_space<vmem>>, vector<1x1x8x128xbf16>
    %72 = vector.shape_cast %71 : vector<1x1x8x128xbf16> to vector<8x128xbf16>
    %c0_62 = arith.constant 0 : index
    %c0_63 = arith.constant 0 : index
    %73 = vector.load %arg3[%c0_62, %c0_63] : memref<16x8xbf16, #tpu.memory_space<vmem>>, vector<16x8xbf16>
    %c0_64 = arith.constant 0 : index
    %c0_65 = arith.constant 0 : index
    %74 = vector.load %arg4[%c0_64, %c0_65] : memref<16x1xf32, #tpu.memory_space<vmem>>, vector<16x1xf32>
    %cst_66 = arith.constant dense<0.000000e+00> : vector<16x128xf32>
    %75 = tpu.matmul %73, %72, %cst_66 {dimension_numbers = #tpu.dot_dimension_numbers<[1], [0], [0], [1], [0, 0, 1, 1], [], []>} : vector<16x8xbf16>, vector<8x128xbf16>, vector<16x128xf32> -> vector<16x128xf32>
    %76 = vector.broadcast %74 : vector<16x1xf32> to vector<16x128xf32>
    %77 = arith.addf %75, %76 : vector<16x128xf32>
    %cst_67 = arith.constant 0.000000e+00 : f32
    %78 = vector.broadcast %cst_67 : f32 to vector<16x128xf32>
    %79 = arith.maximumf %77, %78 : vector<16x128xf32>
    %80 = arith.truncf %79 : vector<16x128xf32> to vector<16x128xbf16>
    %c0_68 = arith.constant 0 : index
    %c0_69 = arith.constant 0 : index
    %81 = vector.load %arg5[%c0_68, %c0_69] : memref<32x16xbf16, #tpu.memory_space<vmem>>, vector<32x16xbf16>
    %c0_70 = arith.constant 0 : index
    %c0_71 = arith.constant 0 : index
    %82 = vector.load %arg6[%c0_70, %c0_71] : memref<32x1xf32, #tpu.memory_space<vmem>>, vector<32x1xf32>
    %cst_72 = arith.constant dense<0.000000e+00> : vector<32x128xf32>
    %83 = tpu.matmul %81, %80, %cst_72 {dimension_numbers = #tpu.dot_dimension_numbers<[1], [0], [0], [1], [0, 0, 1, 1], [], []>} : vector<32x16xbf16>, vector<16x128xbf16>, vector<32x128xf32> -> vector<32x128xf32>
    %84 = vector.broadcast %82 : vector<32x1xf32> to vector<32x128xf32>
    %85 = arith.addf %83, %84 : vector<32x128xf32>
    %cst_73 = arith.constant 0.000000e+00 : f32
    %86 = vector.broadcast %cst_73 : f32 to vector<32x128xf32>
    %87 = arith.maximumf %85, %86 : vector<32x128xf32>
    %88 = arith.maximumf %70, %87 : vector<32x128xf32>
    %c0_74 = arith.constant 0 : index
    %c5 = arith.constant 5 : index
    %c0_75 = arith.constant 0 : index
    %c0_76 = arith.constant 0 : index
    %89 = vector.load %arg2[%c0_74, %c5, %c0_75, %c0_76] : memref<1x8x8x128xbf16, #tpu.memory_space<vmem>>, vector<1x1x8x128xbf16>
    %90 = vector.shape_cast %89 : vector<1x1x8x128xbf16> to vector<8x128xbf16>
    %c0_77 = arith.constant 0 : index
    %c0_78 = arith.constant 0 : index
    %91 = vector.load %arg3[%c0_77, %c0_78] : memref<16x8xbf16, #tpu.memory_space<vmem>>, vector<16x8xbf16>
    %c0_79 = arith.constant 0 : index
    %c0_80 = arith.constant 0 : index
    %92 = vector.load %arg4[%c0_79, %c0_80] : memref<16x1xf32, #tpu.memory_space<vmem>>, vector<16x1xf32>
    %cst_81 = arith.constant dense<0.000000e+00> : vector<16x128xf32>
    %93 = tpu.matmul %91, %90, %cst_81 {dimension_numbers = #tpu.dot_dimension_numbers<[1], [0], [0], [1], [0, 0, 1, 1], [], []>} : vector<16x8xbf16>, vector<8x128xbf16>, vector<16x128xf32> -> vector<16x128xf32>
    %94 = vector.broadcast %92 : vector<16x1xf32> to vector<16x128xf32>
    %95 = arith.addf %93, %94 : vector<16x128xf32>
    %cst_82 = arith.constant 0.000000e+00 : f32
    %96 = vector.broadcast %cst_82 : f32 to vector<16x128xf32>
    %97 = arith.maximumf %95, %96 : vector<16x128xf32>
    %98 = arith.truncf %97 : vector<16x128xf32> to vector<16x128xbf16>
    %c0_83 = arith.constant 0 : index
    %c0_84 = arith.constant 0 : index
    %99 = vector.load %arg5[%c0_83, %c0_84] : memref<32x16xbf16, #tpu.memory_space<vmem>>, vector<32x16xbf16>
    %c0_85 = arith.constant 0 : index
    %c0_86 = arith.constant 0 : index
    %100 = vector.load %arg6[%c0_85, %c0_86] : memref<32x1xf32, #tpu.memory_space<vmem>>, vector<32x1xf32>
    %cst_87 = arith.constant dense<0.000000e+00> : vector<32x128xf32>
    %101 = tpu.matmul %99, %98, %cst_87 {dimension_numbers = #tpu.dot_dimension_numbers<[1], [0], [0], [1], [0, 0, 1, 1], [], []>} : vector<32x16xbf16>, vector<16x128xbf16>, vector<32x128xf32> -> vector<32x128xf32>
    %102 = vector.broadcast %100 : vector<32x1xf32> to vector<32x128xf32>
    %103 = arith.addf %101, %102 : vector<32x128xf32>
    %cst_88 = arith.constant 0.000000e+00 : f32
    %104 = vector.broadcast %cst_88 : f32 to vector<32x128xf32>
    %105 = arith.maximumf %103, %104 : vector<32x128xf32>
    %106 = arith.maximumf %88, %105 : vector<32x128xf32>
    %c0_89 = arith.constant 0 : index
    %c6 = arith.constant 6 : index
    %c0_90 = arith.constant 0 : index
    %c0_91 = arith.constant 0 : index
    %107 = vector.load %arg2[%c0_89, %c6, %c0_90, %c0_91] : memref<1x8x8x128xbf16, #tpu.memory_space<vmem>>, vector<1x1x8x128xbf16>
    %108 = vector.shape_cast %107 : vector<1x1x8x128xbf16> to vector<8x128xbf16>
    %c0_92 = arith.constant 0 : index
    %c0_93 = arith.constant 0 : index
    %109 = vector.load %arg3[%c0_92, %c0_93] : memref<16x8xbf16, #tpu.memory_space<vmem>>, vector<16x8xbf16>
    %c0_94 = arith.constant 0 : index
    %c0_95 = arith.constant 0 : index
    %110 = vector.load %arg4[%c0_94, %c0_95] : memref<16x1xf32, #tpu.memory_space<vmem>>, vector<16x1xf32>
    %cst_96 = arith.constant dense<0.000000e+00> : vector<16x128xf32>
    %111 = tpu.matmul %109, %108, %cst_96 {dimension_numbers = #tpu.dot_dimension_numbers<[1], [0], [0], [1], [0, 0, 1, 1], [], []>} : vector<16x8xbf16>, vector<8x128xbf16>, vector<16x128xf32> -> vector<16x128xf32>
    %112 = vector.broadcast %110 : vector<16x1xf32> to vector<16x128xf32>
    %113 = arith.addf %111, %112 : vector<16x128xf32>
    %cst_97 = arith.constant 0.000000e+00 : f32
    %114 = vector.broadcast %cst_97 : f32 to vector<16x128xf32>
    %115 = arith.maximumf %113, %114 : vector<16x128xf32>
    %116 = arith.truncf %115 : vector<16x128xf32> to vector<16x128xbf16>
    %c0_98 = arith.constant 0 : index
    %c0_99 = arith.constant 0 : index
    %117 = vector.load %arg5[%c0_98, %c0_99] : memref<32x16xbf16, #tpu.memory_space<vmem>>, vector<32x16xbf16>
    %c0_100 = arith.constant 0 : index
    %c0_101 = arith.constant 0 : index
    %118 = vector.load %arg6[%c0_100, %c0_101] : memref<32x1xf32, #tpu.memory_space<vmem>>, vector<32x1xf32>
    %cst_102 = arith.constant dense<0.000000e+00> : vector<32x128xf32>
    %119 = tpu.matmul %117, %116, %cst_102 {dimension_numbers = #tpu.dot_dimension_numbers<[1], [0], [0], [1], [0, 0, 1, 1], [], []>} : vector<32x16xbf16>, vector<16x128xbf16>, vector<32x128xf32> -> vector<32x128xf32>
    %120 = vector.broadcast %118 : vector<32x1xf32> to vector<32x128xf32>
    %121 = arith.addf %119, %120 : vector<32x128xf32>
    %cst_103 = arith.constant 0.000000e+00 : f32
    %122 = vector.broadcast %cst_103 : f32 to vector<32x128xf32>
    %123 = arith.maximumf %121, %122 : vector<32x128xf32>
    %124 = arith.maximumf %106, %123 : vector<32x128xf32>
    %c0_104 = arith.constant 0 : index
    %c7 = arith.constant 7 : index
    %c0_105 = arith.constant 0 : index
    %c0_106 = arith.constant 0 : index
    %125 = vector.load %arg2[%c0_104, %c7, %c0_105, %c0_106] : memref<1x8x8x128xbf16, #tpu.memory_space<vmem>>, vector<1x1x8x128xbf16>
    %126 = vector.shape_cast %125 : vector<1x1x8x128xbf16> to vector<8x128xbf16>
    %c0_107 = arith.constant 0 : index
    %c0_108 = arith.constant 0 : index
    %127 = vector.load %arg3[%c0_107, %c0_108] : memref<16x8xbf16, #tpu.memory_space<vmem>>, vector<16x8xbf16>
    %c0_109 = arith.constant 0 : index
    %c0_110 = arith.constant 0 : index
    %128 = vector.load %arg4[%c0_109, %c0_110] : memref<16x1xf32, #tpu.memory_space<vmem>>, vector<16x1xf32>
    %cst_111 = arith.constant dense<0.000000e+00> : vector<16x128xf32>
    %129 = tpu.matmul %127, %126, %cst_111 {dimension_numbers = #tpu.dot_dimension_numbers<[1], [0], [0], [1], [0, 0, 1, 1], [], []>} : vector<16x8xbf16>, vector<8x128xbf16>, vector<16x128xf32> -> vector<16x128xf32>
    %130 = vector.broadcast %128 : vector<16x1xf32> to vector<16x128xf32>
    %131 = arith.addf %129, %130 : vector<16x128xf32>
    %cst_112 = arith.constant 0.000000e+00 : f32
    %132 = vector.broadcast %cst_112 : f32 to vector<16x128xf32>
    %133 = arith.maximumf %131, %132 : vector<16x128xf32>
    %134 = arith.truncf %133 : vector<16x128xf32> to vector<16x128xbf16>
    %c0_113 = arith.constant 0 : index
    %c0_114 = arith.constant 0 : index
    %135 = vector.load %arg5[%c0_113, %c0_114] : memref<32x16xbf16, #tpu.memory_space<vmem>>, vector<32x16xbf16>
    %c0_115 = arith.constant 0 : index
    %c0_116 = arith.constant 0 : index
    %136 = vector.load %arg6[%c0_115, %c0_116] : memref<32x1xf32, #tpu.memory_space<vmem>>, vector<32x1xf32>
    %cst_117 = arith.constant dense<0.000000e+00> : vector<32x128xf32>
    %137 = tpu.matmul %135, %134, %cst_117 {dimension_numbers = #tpu.dot_dimension_numbers<[1], [0], [0], [1], [0, 0, 1, 1], [], []>} : vector<32x16xbf16>, vector<16x128xbf16>, vector<32x128xf32> -> vector<32x128xf32>
    %138 = vector.broadcast %136 : vector<32x1xf32> to vector<32x128xf32>
    %139 = arith.addf %137, %138 : vector<32x128xf32>
    %cst_118 = arith.constant 0.000000e+00 : f32
    %140 = vector.broadcast %cst_118 : f32 to vector<32x128xf32>
    %141 = arith.maximumf %139, %140 : vector<32x128xf32>
    %142 = arith.maximumf %124, %141 : vector<32x128xf32>
    %c0_119 = arith.constant 0 : index
    %c0_120 = arith.constant 0 : index
    %c0_121 = arith.constant 0 : index
    %143 = vector.load %arg7[%c0_119, %c0_120, %c0_121] : memref<1x32x128xf32, #tpu.memory_space<vmem>>, vector<1x32x128xf32>
    %144 = vector.shape_cast %143 : vector<1x32x128xf32> to vector<32x128xf32>
    %145 = vector.shape_cast %142 : vector<32x128xf32> to vector<1x32x128xf32>
    tpu.vector_store %arg7[%c0_119, %c0_120, %c0_121], %145 {strides = array<i32>} : memref<1x32x128xf32, #tpu.memory_space<vmem>>, vector<1x32x128xf32>,
    return
  }
  func.func @transform_0(%arg0: i32, %arg1: i32) -> (i32, i32, i32, i32) {
    %c0_i32 = arith.constant 0 : i32
    %c0_i32_0 = arith.constant 0 : i32
    %c0_i32_1 = arith.constant 0 : i32
    return %arg0, %c0_i32, %c0_i32_0, %arg1 : i32, i32, i32, i32
  }
  func.func @transform_1(%arg0: i32, %arg1: i32) -> (i32, i32) {
    %c0_i32 = arith.constant 0 : i32
    %c0_i32_0 = arith.constant 0 : i32
    %c0_i32_1 = arith.constant 0 : i32
    return %c0_i32, %c0_i32_0 : i32, i32
  }
  func.func @transform_2(%arg0: i32, %arg1: i32) -> (i32, i32) {
    %c0_i32 = arith.constant 0 : i32
    %c0_i32_0 = arith.constant 0 : i32
    %c0_i32_1 = arith.constant 0 : i32
    return %c0_i32, %c0_i32_0 : i32, i32
  }
  func.func @transform_3(%arg0: i32, %arg1: i32) -> (i32, i32) {
    %c0_i32 = arith.constant 0 : i32
    %c0_i32_0 = arith.constant 0 : i32
    %c0_i32_1 = arith.constant 0 : i32
    return %c0_i32, %c0_i32_0 : i32, i32
  }
  func.func @transform_4(%arg0: i32, %arg1: i32) -> (i32, i32) {
    %c0_i32 = arith.constant 0 : i32
    %c0_i32_0 = arith.constant 0 : i32
    %c0_i32_1 = arith.constant 0 : i32
    return %c0_i32, %c0_i32_0 : i32, i32
  }
  func.func @transform_5(%arg0: i32, %arg1: i32) -> (i32, i32, i32) {
    %c0_i32 = arith.constant 0 : i32
    %c0_i32_0 = arith.constant 0 : i32
    return %arg0, %c0_i32, %arg1 : i32, i32, i32
  }
}

</mosaic_0001>

<bundles_post_ra>
// kernel: _lambda_.3
= control target key start
LH: loop header
LB: loop body
LE: loop exit
PB: predicated region body
PF: predicated region fallthrough
CT: control target
= control target key end

     0   :  { %s333_s6 = smov 0   ;;  %s394_s0 = inlined_call_operand.vmem [shape: f32[2,3,64], index: 0, kind: input, shape index: {}]   ;;  %s395_s1 = inlined_call_operand.vmem [shape: s32[2,1,16], index: 1, kind: output, shape index: {}]  }
   0x1 LB: > { %s245_s7 = sadd.s32 4294967295, %s308_s6   ;;  %p249_p0 = scmp.ge.s32.totalorder %s308_s6, 1  ;;  %s308_s6 = sphi %s333_s6, %s11_s6  }
   0x2   : > { %p86_p1 = scmp.lt.s32.totalorder %s308_s6, 3 }
   0x4   : > { %p87_p2 = pnand %p249_p0, %p86_p1 }
   0x5   : > { %p103_p3 = scmp.lt.s32.totalorder (!%p87_p2), %s245_s7, 1  ;;  %v110_v0 = vlaneseq (!%p87_p2)  ;;  %vm112_vm0 = vcmask (!%p87_p2), 516096   ;;  %v322_v1 = vmov (!%p87_p2), 1e+10   ;;  %v356_v3 = vmov (!%p87_p2), 0   ;;  %s358_s15 = smov (!%p87_p2), 0  }
   0x6   : > { %90 = sbr.rel (%p87_p2) target bundleno = 746 (0x2ea), region = 24  ;;  %113 = vst.msk [vmem:[#allocation2] sm:$0x1] (!%p87_p2), %vm112_vm0, %v322_v1  ;;  %s360_s16 = smov (!%p87_p2), 0  }
   0x7   : > { %v344_v2 = vand.u32 (!%p87_p2), 127, %v110_v0 }
   0xd   : > { %s399_s7 = smov (!%p103_p3, %s245_s7), 1 }
   0xe   : > { %s250_s8 = sshll.u32 %s399_s7, 2  ;;  %s109_s11 = scalar_lea.vmem %s395_s1, %s399_s7 }
   0xf   : > { %s354_s14 = scalar_lea.vmem %s394_s0, %s250_s8 }
  0x10 LB: >> { %v126_v4 = vld [vmem:[%s354_s14] sm:$0x7]  ;;  %v122_v5 = vstv %s320_s16  ;;  %v124_v6 = vstv %s316_s15  ;;  %vm131_vm1 = vcmask 518144   ;;  %s119_s16 = sadd.s32 1, %s320_s16   ;;  %s320_s16 = sphi %s360_s16, %s119_s16   ;;  %s316_s15 = sphi %s358_s15, %s256_s15   ;;  %v312_v3 = vphi %v356_v3, %v397_v3  }
  0x11   : >> { %vm123_vm2 = vcmp.eq.s32.totalorder %v344_v2, %v122_v5  ;;  %vm127_vm3 = vcmp.eq.s32.totalorder %v344_v2, %v124_v6  ;;  %v144_v19 = vld [vmem:[#allocation2] sm:$0x1]  ;;  %p116_p4 = scmp.ge.s32.totalorder %s119_s16, 16  }
  0x12   : >> { %v130_v7 = vsel %vm127_vm3, %v126_v4, 0.0  ;;  %v371_v3 = vsel %vm123_vm2, %v124_v6, %v312_v3   ;;  %vm185_vm9 = vcmask (%p116_p4), 122880  }
  0x13   : >> { %v396_v8 = vmov %v371_v3  ;;  %v132_v9 = vsel %vm131_vm1, %v130_v7, 0.0 }
  0x14   : >> { %133 = vadd.xlane.f32.xlu0 %v132_v9  ;;  %v397_v3 = vmov %v396_v8  ;;  %186 = vst.msk [vmem:[%s109_s11] sm:$0x1] (%p116_p4), %vm185_vm9, %v396_v8 }
  0xa1   : >> { %v134_v10 = vpop.xlane.xlu0 %133 }
  0xa2   : >> { %v135_v11 = vsub.f32 %v126_v4, %v134_v10 }
  0xa4   : >> { %v136_v12 = vmul.f32 %v135_v11, %v135_v11 }
  0xa6   : >> { %v137_v13 = vsel %vm131_vm1, %v136_v12, 0.0 }
  0xa7   : >> { %v138_v14 = vrot.slane %v137_v13, 4 }
  0xa9   : >> { %v139_v15 = vadd.f32 %v138_v14, %v137_v13 }
  0xab   : >> { %v140_v16 = vrot.slane %v139_v15, 2 }
  0xad   : >> { %v141_v17 = vadd.f32 %v140_v16, %v139_v15 }
  0xaf   : >> { %v142_v18 = vrot.slane %v141_v17, 1 }
  0xb1   : >> { %v143_v20 = vadd.f32 %v142_v18, %v141_v17 }
  0xb3   : >> { %v145_v21 = vmin.f32 %v144_v19, %v143_v20 }
  0xb5   : >> { %v147_v22 = vsel %vm112_vm0, %v145_v21, -inf  ;;  %146 = vst.msk [vmem:[#allocation2] sm:$0x1] %vm112_vm0, %v145_v21 }
  0xb6   : >> { %148 = vmax.xlane.f32.xlu0 %v147_v22 }
 0x143   : >> { %v149_v23 = vpop.xlane.xlu0 %148 }
 0x144   : >> { %v150_v24 = vrot.slane %v149_v23, 4 }
 0x146   : >> { %v151_v25 = vmax.f32 %v149_v23, %v150_v24 }
 0x148   : >> { %v152_v26 = vrot.slane %v151_v25, 2 }
 0x14a   : >> { %v153_v27 = vmax.f32 %v151_v25, %v152_v26 }
 0x14c   : >> { %v154_v28 = vrot.slane %v153_v27, 1 }
 0x14e   : >> { %v155_v29 = vmax.f32 %v153_v27, %v154_v28 }
 0x150   : >> { %253 = vpush %v155_v29 }
 0x181   : >> { %s254_s17 = spop %253 }
 0x182   : >> { %v157_v30 = vstv %s254_s17 }
 0x183   : >> { %vm158_vm4 = vcmp.eq.f32.partialorder %v145_v21, %v157_v30 }
 0x184   : >> { %v159_v31 = vsel %vm158_vm4, %v344_v2, 64 }
 0x185   : >> { %v160_v32 = vsel %vm112_vm0, %v159_v31, 2147483647 }
 0x186   : >> { %v162_v33 = vshra.s32 %v160_v32, 16  ;;  %v161_v35 = vand.u32 65535, %v160_v32 }
 0x188   : >> { %v164_v34 = vcvt.s32.f32 %v162_v33  ;;  %v163_v37 = vcvt.s32.f32 %v161_v35 }
 0x18a   : >> { %165 = vmin.xlane.f32.xlu1 %v164_v34 }
 0x217   : >> { %v166_v36 = vpop.xlane.xlu1 %165 }
 0x218   : >> { %vm167_vm5 = vcmp.eq.f32.partialorder %v164_v34, %v166_v36  ;;  %v172_v39 = vcvt.f32.s32 %v166_v36 }
 0x219   : >> { %v168_v38 = vsel %vm167_vm5, %v163_v37, inf }
 0x21a   : >> { %169 = vmin.xlane.f32.xlu1 %v168_v38  ;;  %v173_v41 = vshll.u32 %v172_v39, 16 }
 0x2a7   : >> { %v170_v40 = vpop.xlane.xlu1 %169 }
 0x2a8   : >> { %v171_v42 = vcvt.f32.s32 %v170_v40 }
 0x2aa   : >> { %v174_v43 = vadd.s32 %v173_v41, %v171_v42 }
 0x2ac   : >> { %v175_v44 = vrot.slane %v174_v43, 4 }
 0x2ae   : >> { %vm176_vm6 = vcmp.lt.s32.totalorder %v174_v43, %v175_v44 }
 0x2af   : >> { %v177_v45 = vsel %vm176_vm6, %v174_v43, %v175_v44 }
 0x2b0   : >> { %v178_v46 = vrot.slane %v177_v45, 2 }
 0x2b2   : >> { %vm179_vm7 = vcmp.lt.s32.totalorder %v177_v45, %v178_v46 }
 0x2b3   : >> { %v180_v47 = vsel %vm179_vm7, %v177_v45, %v178_v46 }
 0x2b4   : >> { %v181_v48 = vrot.slane %v180_v47, 1 }
 0x2b6   : >> { %vm182_vm8 = vcmp.lt.s32.totalorder %v180_v47, %v181_v48 }
 0x2b7   : >> { %v183_v49 = vsel %vm182_vm8, %v180_v47, %v181_v48 }
 0x2b8   : >> { %255 = vpush %v183_v49 }
 0x2e3   : > { %118 = sbr.rel (!%p116_p4) target bundleno = 16 (0x10), region = 61 }
 0x2e9   : >> { %s256_s15 = spop %255  }
 0x2ea PF: > { %s11_s6 = sadd.s32 1, %s308_s6  }
 0x2eb   : > { %p8_p5 = scmp.ge.s32.totalorder %s11_s6, 4  }
 0x2ed   :  { %10 = sbr.rel (!%p8_p5) target bundleno = 1 (0x1), region = 72 }

// kernel: _lambda_.5
= control target key start
LH: loop header
LB: loop body
LE: loop exit
PB: predicated region body
PF: predicated region fallthrough
CT: control target
= control target key end

     0   :  { %s4335_s24 = smov 0   ;;  %s4337_s25 = smov 0   ;;  %s5388_s0 = inlined_call_operand.vmem [shape: bf16[2,16,8,128], index: 0, kind: input, shape index: {}]   ;;  %s5389_s1 = inlined_call_operand.vmem [shape: bf16[16,8], index: 1, kind: input, shape index: {}]   ;;  %s5390_s2 = inlined_call_operand.vmem [shape: f32[16,1], index: 2, kind: input, shape index: {}]   ;;  %s5391_s3 = inlined_call_operand.vmem [shape: bf16[32,16], index: 3, kind: input, shape index: {}]   ;;  %s5392_s4 = inlined_call_operand.vmem [shape: f32[32,1], index: 4, kind: input, shape index: {}]   ;;  %s5393_s5 = inlined_call_operand.vmem [shape: bf16[64,32], index: 5, kind: input, shape index: {}]   ;;  %s5394_s6 = inlined_call_operand.vmem [shape: f32[64,1], index: 6, kind: input, shape index: {}]   ;;  %s5395_s7 = inlined_call_operand.vmem [shape: f32[2,64,128], index: 7, kind: output, shape index: {}]  }
   0x1   :  { %s4339_s26 = smov 0  }
   0x2 LB: > { %s29_s27 = sadd.s32 1, %s4286_s25  ;;  %p3515_p0 = scmp.ge.s32.totalorder %s4290_s26, 1  ;;  %s4290_s26 = sphi %s4339_s26, %s17_s26   ;;  %s4286_s25 = sphi %s4337_s25, %s5397_s25   ;;  %s4282_s24 = sphi %s4335_s24, %s5396_s24  }
   0x3   : > { %p31_p1 = scmp.ge.s32.totalorder %s29_s27, 2  ;;  %p256_p2 = scmp.lt.s32.totalorder %s4290_s26, 3 }
   0x5   : > { %s5399_s27 = smov (%p31_p1, %s29_s27), 0  ;;  %p257_p3 = pnand %p3515_p0, %p256_p2 }
   0x6   : > { %p294_p4 = scmp.lt.s32.totalorder (!%p257_p3), %s4282_s24, 1  ;;  %v4292_v0 = vmov (!%p257_p3), 0.0   ;;  %vm4293_vm0 = vmmov (!%p257_p3), 0   ;;  %v314_v1 = vld [vmem:[%s5390_s2] sm:$0xff] (!%p257_p3)  ;;  %v4294_v2 = vmov (!%p257_p3), 0   ;;  %vm335_vm1 = vcmask (!%p257_p3), 1043456  }
   0x7   : > { %260 = sbr.rel (%p257_p3) target bundleno = 4414 (0x113e), region = 48  ;;  %3834 = vmatprep.subr.bf16.mxu0 (!%p257_p3), %v4292_v0  ;;  %3836 = vmatprep.mubr.msk.bf16.mxu0 (!%p257_p3), %vm4293_vm0, %v4292_v0  ;;  %vm331_vm2 = vcmask (!%p257_p3), 64512   ;;  %v315_v3 = vld [vmem:[%s5390_s2 + $0x8] sm:$0xff] (!%p257_p3)  ;;  %v4375_v4 = vld [vmem:[%s5389_s1] sm:$0xff] (!%p257_p3)   ;;  %v389_v7 = vld [vmem:[%s5392_s4 + $0x10] sm:$0xff] (!%p257_p3)  ;;  %vm421_vm3 = vcmask (!%p257_p3), 130048  }
   0x8   : > { %4249 = vset.pattern.permute.xlu0 (!%p257_p3), %v4294_v2  ;;  %4250 = vset.pattern.permute.xlu1 (!%p257_p3), %v4294_v2  ;;  %v491_v8 = vld [vmem:[%s5394_s6] sm:$0xff] (!%p257_p3)  ;;  %v493_v9 = vld [vmem:[%s5394_s6 + $0x10] sm:$0xff] (!%p257_p3)  ;;  %v388_v14 = vld [vmem:[%s5392_s4 + $0x8] sm:$0xff] (!%p257_p3)  ;;  %vm559_vm4 = vcmask (!%p257_p3), 261120  }
   0x9   : > { %318 = vperm.xlu0 (!%p257_p3), %4249, %v314_v1   ;;  %v495_v10 = vld [vmem:[%s5394_s6 + $0x20] sm:$0xff] (!%p257_p3)  ;;  %v497_v11 = vld [vmem:[%s5394_s6 + $0x30] sm:$0xff] (!%p257_p3)  ;;  %v390_v15 = vld [vmem:[%s5392_s4 + $0x18] sm:$0xff] (!%p257_p3) }
   0xa   : > { %v4399_v12 = vld [vmem:[%s5391_s3] sm:$0xff] (!%p257_p3)   ;;  %v492_v16 = vld [vmem:[%s5394_s6 + $0x8] sm:$0xff] (!%p257_p3)  ;;  %v494_v17 = vld [vmem:[%s5394_s6 + $0x18] sm:$0xff] (!%p257_p3) }
   0xb   : > { %3842 = vmatprep.mubr.msk.bf16.mxu1 (!%p257_p3), %vm421_vm3, %v4399_v12  ;;  %v387_v13 = vld [vmem:[%s5392_s4] sm:$0xff] (!%p257_p3)  ;;  %v496_v18 = vld [vmem:[%s5394_s6 + $0x28] sm:$0xff] (!%p257_p3)  ;;  %v498_v19 = vld [vmem:[%s5394_s6 + $0x38] sm:$0xff] (!%p257_p3) }
   0xc   : > { %393 = vperm.xlu1 (!%p257_p3), %4250, %v387_v13   ;;  %v4433_v31 = vld [vmem:[%s5391_s3 + $0x8] sm:$0xff] (!%p257_p3)   ;;  %v4440_v32 = vld [vmem:[%s5393_s5] sm:$0xff] (!%p257_p3)   ;;  %v4445_v33 = vld [vmem:[%s5393_s5 + $0x10] sm:$0xff] (!%p257_p3)  }
   0xd   : > { %323 = vperm.xlu0 (!%p257_p3), %4249, %v315_v3   ;;  %v4467_v53 = vld [vmem:[%s5393_s5 + $0x8] sm:$0xff] (!%p257_p3)   ;;  %v4472_v54 = vld [vmem:[%s5393_s5 + $0x18] sm:$0xff] (!%p257_p3)  }
   0xe   : > { %s5401_s24 = smov (!%p294_p4, %s4282_s24), 1 }
   0xf   : > { %s3656_s30 = sshll.u32 %s5401_s24, 6 }
  0x10   : > { %s4370_s12 = scalar_lea.vmem %s5388_s0, %s3656_s30  ;;  %398 = vperm.xlu1 %4250, %v388_v14   ;;  %s5364_s21 = scalar_lea.vmem %s5395_s7, %s3656_s30 }
  0x11   : > { %v311_v5 = vld [vmem:[%s4370_s12] sm:$0xf]  ;;  %403 = vperm.xlu0 %4249, %v389_v7   ;;  %v3534_v52 = vld [vmem:[%s4370_s12 + $0x4] sm:$0xf] }
  0x12   : > { %v337_v6 = vsel %vm335_vm1, %v311_v5, 0  ;;  %v648_v55 = vsel %vm335_vm1, %v3534_v52, 0 }
  0x13   : > { %3835 = vmatpush3.bf16.msra.mxu0 %v337_v6 }
  0x14   : > { %408 = vperm.xlu1 %4250, %v390_v15  }
  0x15   : > { %501 = vperm.xlu0 %4249, %v491_v8  }
  0x16   : > { %3837 = vmatmul.mubr.msk.bf16.vlgmr.msra.gmra.mrb[0].mxu0 %vm331_vm2, %v4375_v4 }
  0x17   : > { %3850 = vmatprep.mubr.msk.bf16.mxu0 %vm559_vm4, %v4440_v32 }
  0x18   : > { %506 = vperm.xlu1 %4250, %v492_v16  }
  0x19   : > { %511 = vperm.xlu0 %4249, %v493_v9  }
  0x1c   : > { %516 = vperm.xlu1 %4250, %v494_v17  }
  0x1d   : > { %521 = vperm.xlu0 %4249, %v495_v10  }
  0x20   : > { %526 = vperm.xlu1 %4250, %v496_v18  }
  0x21   : > { %531 = vperm.xlu0 %4249, %v497_v11   ;;  %v3542_v11 = vld [vmem:[%s4370_s12 + $0x8] sm:$0xf] }
  0x22   : > { %v833_v13 = vsel %vm335_vm1, %v3542_v11, 0 }
  0x24   : > { %536 = vperm.xlu1 %4250, %v498_v19  }
  0x88   : > { %v4424_v20 = vpop.permute.xlu0 %318 }
  0x8b   : > { %v4451_v34 = vpop.permute.xlu1 %393 }
  0x8c   : > { %v4427_v24 = vpop.permute.xlu0 %323 }
  0x8f   : > { %v4453_v35 = vpop.permute.xlu1 %398 }
  0x90   : > { %v4455_v36 = vpop.permute.xlu0 %403 }
  0x93   : > { %v4458_v40 = vpop.permute.xlu1 %408 }
  0xe9   : > { %v373_v21 = vpop.f32.mrb[0].mxu0 }
  0xea   : > { %v374_v22 = vadd.f32 %v373_v21, %v4424_v20  ;;  %v3838_v23 = vpop.f32.mrb[1].mxu0 }
  0xeb   : > { %v376_v25 = vpop.f32.mrb[2].mxu0 }
  0xec   : > { %v377_v26 = vadd.f32 %v376_v25, %v4427_v24  ;;  %v3839_v27 = vpop.f32.mrb[3].mxu0  ;;  %v380_v28 = vmax.f32 %v374_v22, 0.0 }
  0xee   : > { %v381_v29 = vmax.f32 %v377_v26, 0.0 }
  0xf0   : > { %v382_v30 = vpack.c.bf16 %v381_v29, %v380_v28 }
  0xf2   : > { %3840 = vmatprep.subr.bf16.mxu1 %v382_v30 }
  0xf3   : > { %3841 = vmatpush3.bf16.msra.mxu1 %v382_v30 }
  0xf6   : > { %3843 = vmatmul.mubr.msk.bf16.vlgmr.msra.gmra.mrb[0].mxu1 %vm421_vm3, %v4433_v31 }
  0xf7   : > { %3854 = vmatprep.mubr.msk.bf16.mxu1 %vm559_vm4, %v4445_v33 }
 0x1c9   : > { %v3844_v37 = vpop.f32.mrb[0].mxu1 }
 0x1ca   : > { %v471_v38 = vadd.f32 %v3844_v37, %v4455_v36  ;;  %v462_v39 = vpop.f32.mrb[1].mxu1 }
 0x1cb   : > { %v463_v41 = vadd.f32 %v462_v39, %v4451_v34  ;;  %v3845_v42 = vpop.f32.mrb[2].mxu1 }
 0x1cc   : > { %v474_v43 = vadd.f32 %v3845_v42, %v4458_v40  ;;  %v465_v44 = vpop.f32.mrb[3].mxu1  ;;  %v479_v46 = vmax.f32 %v471_v38, 0.0 }
 0x1cd   : > { %v466_v45 = vadd.f32 %v465_v44, %v4453_v35  ;;  %v477_v48 = vmax.f32 %v463_v41, 0.0 }
 0x1ce   : > { %v480_v47 = vmax.f32 %v474_v43, 0.0 }
 0x1cf   : > { %v478_v49 = vmax.f32 %v466_v45, 0.0 }
 0x1d0   : > { %v482_v50 = vpack.c.bf16 %v480_v47, %v479_v46  ;;  %v3550_v46 = vld [vmem:[%s4370_s12 + $0xc] sm:$0xf] }
 0x1d1   : > { %v481_v51 = vpack.c.bf16 %v478_v49, %v477_v48  ;;  %v1018_v47 = vsel %vm335_vm1, %v3550_v46, 0  ;;  %v4542_v48 = vpop.permute.xlu0 %501  ;;  %v4544_v49 = vpop.permute.xlu1 %506 }
 0x1d3   : > { %3846 = vmatprep.subr.bf16.mxu0 %v481_v51  ;;  %4218 = vmatprep.subr.bf16.mxu1 %v481_v51 }
 0x1d4   : > { %3847 = vmatpush3.bf16.msra.mxu0 %v481_v51  ;;  %4220 = vmatpush3.bf16.msra.mxu1 %v481_v51 }
 0x1d5   : > { %3848 = vmatprep.subr.bf16.mxu0 %v482_v50  ;;  %4219 = vmatprep.subr.bf16.mxu1 %v482_v50  ;;  %v4548_v51 = vpop.permute.xlu1 %516 }
 0x1d8   : > { %3849 = vmatpush3.bf16.msra.mxu0 %v482_v50  ;;  %4221 = vmatpush3.bf16.msra.mxu1 %v482_v50  ;;  %v4546_v50 = vpop.permute.xlu0 %511 }
 0x1d9   : > { %3858 = vmatprep.subr.bf16.mxu1 %v4292_v0 }
 0x1db   : > { %3851 = vmatmul.mubr.msk.bf16.vlgmr.msra.gmra.mrb[4].mxu0 %vm559_vm4, %v4467_v53  ;;  %3855 = vmatmul.mubr.msk.bf16.vlgmr.msra.gmra.mrb[4].mxu1 %vm559_vm4, %v4472_v54 }
 0x1dc   : > { %3859 = vmatpush3.bf16.msra.mxu1 %v648_v55  ;;  %3860 = vmatprep.mubr.msk.bf16.mxu1 %vm4293_vm0, %v4292_v0  ;;  %v4552_v55 = vpop.permute.xlu0 %521 }
 0x1dd   : > { %3874 = vmatprep.mubr.msk.bf16.mxu0 %vm559_vm4, %v4440_v32 }
 0x1e3   : > { %3861 = vmatmul.mubr.msk.bf16.vlgmr.msra.gmra.mrb[8].mxu1 %vm331_vm2, %v4375_v4 }
 0x1e4   : > { %3866 = vmatprep.mubr.msk.bf16.mxu1 %vm421_vm3, %v4399_v12 }
 0x2ae   : > { %v4488_v56 = vpop.f32.mrb[4].mxu0  ;;  %v4490_v57 = vpop.f32.mrb[4].mxu1 }
 0x2af   : > { %v4492_v58 = vpop.f32.mrb[5].mxu0  ;;  %v4494_v59 = vpop.f32.mrb[5].mxu1  ;;  %v615_v52 = vadd.f32 %v4488_v56, %v4546_v50 }
 0x2b0   : > { %v4496_v60 = vpop.f32.mrb[6].mxu0  ;;  %v4498_v61 = vpop.f32.mrb[6].mxu1 }
 0x2b1   : > { %v4500_v62 = vpop.f32.mrb[7].mxu0  ;;  %v4502_v63 = vpop.f32.mrb[7].mxu1 }
 0x2b6   : > { %v684_v1 = vpop.f32.mrb[8].mxu1 }
 0x2b7   : > { %v685_v2 = vadd.f32 %v684_v1, %v4424_v20  ;;  %v3862_v3 = vpop.f32.mrb[9].mxu1  ;;  %v607_v1 = vadd.f32 %v4492_v58, %v4542_v48 }
 0x2b8   : > { %v687_v5 = vpop.f32.mrb[10].mxu1  ;;  %v618_v3 = vadd.f32 %v4496_v60, %v4548_v51 }
 0x2b9   : > { %v688_v6 = vadd.f32 %v687_v5, %v4427_v24  ;;  %v3863_v7 = vpop.f32.mrb[11].mxu1  ;;  %v691_v8 = vmax.f32 %v685_v2, 0.0 }
 0x2ba   : > { %v4559_v7 = vpop.permute.xlu1 %526 }
 0x2bb   : > { %v692_v9 = vmax.f32 %v688_v6, 0.0 }
 0x2bd   : > { %v693_v10 = vpack.c.bf16 %v692_v9, %v691_v8  ;;  %v610_v8 = vadd.f32 %v4500_v62, %v4544_v49 }
 0x2bf   : > { %3864 = vmatprep.subr.bf16.mxu1 %v693_v10 }
 0x2c0   : > { %3865 = vmatpush3.bf16.msra.mxu1 %v693_v10  ;;  %v639_v10 = vmax.f32 %v615_v52, 0.0 }
 0x2c1   : > { %3882 = vmatprep.subr.bf16.mxu1 %v4292_v0 }
 0x2c3   : > { %3867 = vmatmul.mubr.msk.bf16.vlgmr.msra.gmra.mrb[12].mxu1 %vm421_vm3, %v4433_v31 }
 0x2c4   : > { %3883 = vmatpush3.bf16.msra.mxu1 %v833_v13  ;;  %3884 = vmatprep.mubr.msk.bf16.mxu1 %vm4293_vm0, %v4292_v0 }
 0x2cb   : > { %3885 = vmatmul.mubr.msk.bf16.vlgmr.msra.gmra.mrb[16].mxu1 %vm331_vm2, %v4375_v4 }
 0x2cc   : > { %3890 = vmatprep.mubr.msk.bf16.mxu1 %vm421_vm3, %v4399_v12 }
 0x396   : > { %v3868_v14 = vpop.f32.mrb[12].mxu1 }
 0x397   : > { %v737_v15 = vadd.f32 %v3868_v14, %v4455_v36  ;;  %v728_v16 = vpop.f32.mrb[13].mxu1 }
 0x398   : > { %v729_v17 = vadd.f32 %v728_v16, %v4451_v34  ;;  %v3869_v18 = vpop.f32.mrb[14].mxu1 }
 0x399   : > { %v740_v19 = vadd.f32 %v3869_v18, %v4458_v40  ;;  %v731_v21 = vpop.f32.mrb[15].mxu1  ;;  %v745_v23 = vmax.f32 %v737_v15, 0.0  ;;  %v637_v15 = vmax.f32 %v607_v1, 0.0 }
 0x39a   : > { %v732_v22 = vadd.f32 %v731_v21, %v4453_v35  ;;  %v743_v26 = vmax.f32 %v729_v17, 0.0 }
 0x39b   : > { %v746_v25 = vmax.f32 %v740_v19, 0.0  ;;  %v640_v19 = vmax.f32 %v618_v3, 0.0  ;;  %v626_v3 = vadd.f32 %v4502_v63, %v4559_v7 }
 0x39c   : > { %v744_v27 = vmax.f32 %v732_v22, 0.0 }
 0x39d   : > { %v748_v28 = vpack.c.bf16 %v746_v25, %v745_v23  ;;  %v4570_v25 = vpop.permute.xlu0 %531 }
 0x39e   : > { %v747_v29 = vpack.c.bf16 %v744_v27, %v743_v26  ;;  %v869_v30 = vpop.f32.mrb[16].mxu1  ;;  %v638_v26 = vmax.f32 %v610_v8, 0.0 }
 0x39f   : > { %v870_v37 = vadd.f32 %v869_v30, %v4424_v20  ;;  %v3886_v38 = vpop.f32.mrb[17].mxu1 }
 0x3a0   : > { %3870 = vmatprep.subr.bf16.mxu0 %v747_v29  ;;  %v872_v39 = vpop.f32.mrb[18].mxu1 }
 0x3a1   : > { %v873_v41 = vadd.f32 %v872_v39, %v4427_v24  ;;  %3871 = vmatpush3.bf16.msra.mxu0 %v747_v29  ;;  %v3887_v42 = vpop.f32.mrb[19].mxu1  ;;  %v876_v43 = vmax.f32 %v870_v37, 0.0  ;;  %v631_v37 = vadd.f32 %v4490_v57, %v4570_v25 }
 0x3a2   : > { %3872 = vmatprep.subr.bf16.mxu0 %v748_v28  ;;  %v623_v42 = vadd.f32 %v4494_v59, %v4552_v55 }
 0x3a3   : > { %v877_v44 = vmax.f32 %v873_v41, 0.0  ;;  %v4580_v41 = vpop.permute.xlu1 %536  ;;  %v643_v8 = vmax.f32 %v631_v37, 0.0 }
 0x3a5   : > { %v878_v45 = vpack.c.bf16 %v877_v44, %v876_v43  ;;  %3873 = vmatpush3.bf16.msra.mxu0 %v748_v28 }
 0x3a7   : > { %3888 = vmatprep.subr.bf16.mxu1 %v878_v45 }
 0x3a8   : > { %3875 = vmatmul.mubr.msk.bf16.vlgmr.msra.gmra.mrb[8].mxu0 %vm559_vm4, %v4467_v53  ;;  %3889 = vmatpush3.bf16.msra.mxu1 %v878_v45 }
 0x3a9   : > { %3878 = vmatprep.mubr.msk.bf16.mxu0 %vm559_vm4, %v4445_v33  ;;  %3906 = vmatprep.subr.bf16.mxu1 %v4292_v0 }
 0x3ab   : > { %3891 = vmatmul.mubr.msk.bf16.vlgmr.msra.gmra.mrb[20].mxu1 %vm421_vm3, %v4433_v31 }
 0x3ac   : > { %3907 = vmatpush3.bf16.msra.mxu1 %v1018_v47  ;;  %3908 = vmatprep.mubr.msk.bf16.mxu1 %vm4293_vm0, %v4292_v0  ;;  %v634_v47 = vadd.f32 %v4498_v61, %v4580_v41  ;;  %v641_v61 = vmax.f32 %v623_v42, 0.0  ;;  %v3558_v42 = vld [vmem:[%s4370_s12 + $0x10] sm:$0xf] }
 0x3b0   : > { %3879 = vmatmul.mubr.msk.bf16.gmra.mrb[12].mxu0 %vm559_vm4, %v4472_v54 }
 0x3b1   : > { %3898 = vmatprep.mubr.msk.bf16.mxu0 %vm559_vm4, %v4440_v32 }
 0x3b3   : > { %3909 = vmatmul.mubr.msk.bf16.vlgmr.msra.gmra.mrb[24].mxu1 %vm331_vm2, %v4375_v4 }
 0x3b4   : > { %3914 = vmatprep.mubr.msk.bf16.mxu1 %vm421_vm3, %v4399_v12 }
 0x47b   : > { %v3876_v2 = vpop.f32.mrb[8].mxu0 }
 0x47c   : > { %v792_v5 = vadd.f32 %v3876_v2, %v4546_v50  ;;  %v783_v6 = vpop.f32.mrb[9].mxu0 }
 0x47d   : > { %v784_v9 = vadd.f32 %v783_v6, %v4542_v48  ;;  %v3877_v56 = vpop.f32.mrb[10].mxu0 }
 0x47e   : > { %v816_v11 = vmax.f32 %v792_v5, 0.0  ;;  %v795_v13 = vadd.f32 %v3877_v56, %v4548_v51  ;;  %v786_v58 = vpop.f32.mrb[11].mxu0  ;;  %v3892_v14 = vpop.f32.mrb[20].mxu1 }
 0x47f   : > { %v814_v16 = vmax.f32 %v784_v9, 0.0  ;;  %v787_v60 = vadd.f32 %v786_v58, %v4544_v49  ;;  %v922_v17 = vadd.f32 %v3892_v14, %v4455_v36  ;;  %v913_v18 = vpop.f32.mrb[21].mxu1 }
 0x480   : > { %v4567_v21 = vmax.f32 %v639_v10, %v816_v11  ;;  %v817_v62 = vmax.f32 %v795_v13, 0.0  ;;  %v914_v22 = vadd.f32 %v913_v18, %v4451_v34  ;;  %v3893_v23 = vpop.f32.mrb[22].mxu1 }
 0x481   : > { %v4572_v27 = vmax.f32 %v637_v15, %v814_v16  ;;  %v815_v28 = vmax.f32 %v787_v60, 0.0  ;;  %v925_v29 = vadd.f32 %v3893_v23, %v4458_v40  ;;  %v916_v30 = vpop.f32.mrb[23].mxu1  ;;  %v930_v44 = vmax.f32 %v922_v17, 0.0 }
 0x482   : > { %v4577_v38 = vmax.f32 %v640_v19, %v817_v62  ;;  %v917_v39 = vadd.f32 %v916_v30, %v4453_v35  ;;  %v928_v52 = vmax.f32 %v914_v22, 0.0  ;;  %v644_v60 = vmax.f32 %v634_v47, 0.0 }
 0x483   : > { %v4584_v43 = vmax.f32 %v638_v26, %v815_v28  ;;  %v931_v45 = vmax.f32 %v925_v29, 0.0  ;;  %v3880_v46 = vpop.f32.mrb[12].mxu0  ;;  %v642_v19 = vmax.f32 %v626_v3, 0.0 }
 0x484   : > { %v929_v1 = vmax.f32 %v917_v39, 0.0  ;;  %v808_v57 = vadd.f32 %v3880_v46, %v4570_v25  ;;  %v799_v2 = vpop.f32.mrb[13].mxu0 }
 0x485   : > { %v933_v5 = vpack.c.bf16 %v931_v45, %v930_v44  ;;  %v800_v6 = vadd.f32 %v799_v2, %v4552_v55  ;;  %v3881_v59 = vpop.f32.mrb[14].mxu0  ;;  %v1203_v44 = vsel %vm335_vm1, %v3558_v42, 0 }
 0x486   : > { %v932_v9 = vpack.c.bf16 %v929_v1, %v928_v52  ;;  %v820_v56 = vmax.f32 %v808_v57, 0.0  ;;  %v811_v10 = vadd.f32 %v3881_v59, %v4580_v41  ;;  %v802_v11 = vpop.f32.mrb[15].mxu0  ;;  %v1054_v13 = vpop.f32.mrb[24].mxu1 }
 0x487   : > { %v818_v58 = vmax.f32 %v800_v6, 0.0  ;;  %v803_v14 = vadd.f32 %v802_v11, %v4559_v7  ;;  %v1055_v15 = vadd.f32 %v1054_v13, %v4424_v20  ;;  %v3910_v16 = vpop.f32.mrb[25].mxu1 }
 0x488   : > { %v4595_v63 = vmax.f32 %v643_v8, %v820_v56  ;;  %v821_v17 = vmax.f32 %v811_v10, 0.0  ;;  %3894 = vmatprep.subr.bf16.mxu0 %v932_v9  ;;  %v1057_v18 = vpop.f32.mrb[26].mxu1 }
 0x489   : > { %v4597_v62 = vmax.f32 %v641_v61, %v818_v58  ;;  %v819_v22 = vmax.f32 %v803_v14, 0.0  ;;  %v1058_v23 = vadd.f32 %v1057_v18, %v4427_v24  ;;  %3895 = vmatpush3.bf16.msra.mxu0 %v932_v9  ;;  %v3911_v26 = vpop.f32.mrb[27].mxu1  ;;  %v1061_v30 = vmax.f32 %v1055_v15, 0.0 }
 0x48a   : > { %v4600_v28 = vmax.f32 %v644_v60, %v821_v17  ;;  %3896 = vmatprep.subr.bf16.mxu0 %v933_v5 }
 0x48b   : > { %v4602_v29 = vmax.f32 %v642_v19, %v819_v22  ;;  %v1062_v37 = vmax.f32 %v1058_v23, 0.0 }
 0x48d   : > { %v1063_v39 = vpack.c.bf16 %v1062_v37, %v1061_v30  ;;  %3897 = vmatpush3.bf16.msra.mxu0 %v933_v5 }
 0x48f   : > { %3912 = vmatprep.subr.bf16.mxu1 %v1063_v39 }
 0x490   : > { %3899 = vmatmul.mubr.msk.bf16.vlgmr.msra.gmra.mrb[16].mxu0 %vm559_vm4, %v4467_v53  ;;  %3913 = vmatpush3.bf16.msra.mxu1 %v1063_v39 }
 0x491   : > { %3902 = vmatprep.mubr.msk.bf16.mxu0 %vm559_vm4, %v4445_v33  ;;  %3930 = vmatprep.subr.bf16.mxu1 %v4292_v0 }
 0x493   : > { %3915 = vmatmul.mubr.msk.bf16.vlgmr.msra.gmra.mrb[28].mxu1 %vm421_vm3, %v4433_v31 }
 0x494   : > { %3931 = vmatpush3.bf16.msra.mxu1 %v1203_v44  ;;  %3932 = vmatprep.mubr.msk.bf16.mxu1 %vm4293_vm0, %v4292_v0 }
 0x498   : > { %3903 = vmatmul.mubr.msk.bf16.gmra.mrb[20].mxu0 %vm559_vm4, %v4472_v54 }
 0x499   : > { %3922 = vmatprep.mubr.msk.bf16.mxu0 %vm559_vm4, %v4440_v32 }
 0x49b   : > { %3933 = vmatmul.mubr.msk.bf16.vlgmr.msra.gmra.mrb[32].mxu1 %vm331_vm2, %v4375_v4 }
 0x49c   : > { %3938 = vmatprep.mubr.msk.bf16.mxu1 %vm421_vm3, %v4399_v12 }
 0x563   : > { %v3900_v45 = vpop.f32.mrb[16].mxu0 }
 0x564   : > { %v977_v46 = vadd.f32 %v3900_v45, %v4546_v50  ;;  %v968_v47 = vpop.f32.mrb[17].mxu0 }
 0x565   : > { %v969_v52 = vadd.f32 %v968_v47, %v4542_v48  ;;  %v3901_v1 = vpop.f32.mrb[18].mxu0 }
 0x566   : > { %v1001_v57 = vmax.f32 %v977_v46, 0.0  ;;  %v980_v2 = vadd.f32 %v3901_v1, %v4548_v51  ;;  %v971_v3 = vpop.f32.mrb[19].mxu0  ;;  %v3916_v5 = vpop.f32.mrb[28].mxu1 }
 0x567   : > { %v999_v6 = vmax.f32 %v969_v52, 0.0  ;;  %v972_v59 = vadd.f32 %v971_v3, %v4544_v49  ;;  %v1107_v8 = vadd.f32 %v3916_v5, %v4455_v36  ;;  %v1098_v9 = vpop.f32.mrb[29].mxu1 }
 0x568   : > { %v4629_v56 = vmax.f32 %v4567_v21, %v1001_v57  ;;  %v1002_v10 = vmax.f32 %v980_v2, 0.0  ;;  %v1099_v11 = vadd.f32 %v1098_v9, %v4451_v34  ;;  %v3917_v13 = vpop.f32.mrb[30].mxu1 }
 0x569   : > { %v4633_v61 = vmax.f32 %v4572_v27, %v999_v6  ;;  %v1000_v58 = vmax.f32 %v972_v59, 0.0  ;;  %v1110_v14 = vadd.f32 %v3917_v13, %v4458_v40  ;;  %v1101_v15 = vpop.f32.mrb[31].mxu1  ;;  %v1115_v21 = vmax.f32 %v1107_v8, 0.0 }
 0x56a   : > { %v4637_v16 = vmax.f32 %v4577_v38, %v1002_v10  ;;  %v1102_v60 = vadd.f32 %v1101_v15, %v4453_v35  ;;  %v1113_v22 = vmax.f32 %v1099_v11, 0.0 }
 0x56b   : > { %v4641_v17 = vmax.f32 %v4584_v43, %v1000_v58  ;;  %v1116_v18 = vmax.f32 %v1110_v14, 0.0  ;;  %v3904_v19 = vpop.f32.mrb[20].mxu0  ;;  %v3566_v58 = vld [vmem:[%s4370_s12 + $0x14] sm:$0xf] }
 0x56c   : > { %v1114_v23 = vmax.f32 %v1102_v60, 0.0  ;;  %v993_v27 = vadd.f32 %v3904_v19, %v4570_v25  ;;  %v984_v26 = vpop.f32.mrb[21].mxu0 }
 0x56d   : > { %v1118_v30 = vpack.c.bf16 %v1116_v18, %v1115_v21  ;;  %v985_v37 = vadd.f32 %v984_v26, %v4552_v55  ;;  %v3905_v39 = vpop.f32.mrb[22].mxu0 }
 0x56e   : > { %v1117_v42 = vpack.c.bf16 %v1114_v23, %v1113_v22  ;;  %v1005_v38 = vmax.f32 %v993_v27, 0.0  ;;  %v996_v44 = vadd.f32 %v3905_v39, %v4580_v41  ;;  %v987_v45 = vpop.f32.mrb[23].mxu0  ;;  %v1239_v46 = vpop.f32.mrb[32].mxu1 }
 0x56f   : > { %v1003_v43 = vmax.f32 %v985_v37, 0.0  ;;  %v988_v47 = vadd.f32 %v987_v45, %v4559_v7  ;;  %v1240_v52 = vadd.f32 %v1239_v46, %v4424_v20  ;;  %v3934_v1 = vpop.f32.mrb[33].mxu1 }
 0x570   : > { %v4649_v57 = vmax.f32 %v4595_v63, %v1005_v38  ;;  %v1006_v2 = vmax.f32 %v996_v44, 0.0  ;;  %3918 = vmatprep.subr.bf16.mxu0 %v1117_v42  ;;  %v1242_v3 = vpop.f32.mrb[34].mxu1 }
 0x571   : > { %v4652_v5 = vmax.f32 %v4597_v62, %v1003_v43  ;;  %v1004_v6 = vmax.f32 %v988_v47, 0.0  ;;  %v1243_v59 = vadd.f32 %v1242_v3, %v4427_v24  ;;  %3919 = vmatpush3.bf16.msra.mxu0 %v1117_v42  ;;  %v3935_v8 = vpop.f32.mrb[35].mxu1  ;;  %v1246_v63 = vmax.f32 %v1240_v52, 0.0 }
 0x572   : > { %v4656_v9 = vmax.f32 %v4600_v28, %v1006_v2  ;;  %3920 = vmatprep.subr.bf16.mxu0 %v1118_v30  ;;  %v1388_v62 = vsel %vm335_vm1, %v3566_v58, 0 }
 0x573   : > { %v4659_v10 = vmax.f32 %v4602_v29, %v1004_v6  ;;  %v1247_v11 = vmax.f32 %v1243_v59, 0.0 }
 0x575   : > { %v1248_v13 = vpack.c.bf16 %v1247_v11, %v1246_v63  ;;  %3921 = vmatpush3.bf16.msra.mxu0 %v1118_v30 }
 0x577   : > { %3936 = vmatprep.subr.bf16.mxu1 %v1248_v13 }
 0x578   : > { %3923 = vmatmul.mubr.msk.bf16.vlgmr.msra.gmra.mrb[24].mxu0 %vm559_vm4, %v4467_v53  ;;  %3937 = vmatpush3.bf16.msra.mxu1 %v1248_v13 }
 0x579   : > { %3926 = vmatprep.mubr.msk.bf16.mxu0 %vm559_vm4, %v4445_v33  ;;  %3954 = vmatprep.subr.bf16.mxu1 %v4292_v0 }
 0x57b   : > { %3939 = vmatmul.mubr.msk.bf16.vlgmr.msra.gmra.mrb[36].mxu1 %vm421_vm3, %v4433_v31 }
 0x57c   : > { %3955 = vmatpush3.bf16.msra.mxu1 %v1388_v62  ;;  %3956 = vmatprep.mubr.msk.bf16.mxu1 %vm4293_vm0, %v4292_v0 }
 0x580   : > { %3927 = vmatmul.mubr.msk.bf16.gmra.mrb[28].mxu0 %vm559_vm4, %v4472_v54 }
 0x581   : > { %3946 = vmatprep.mubr.msk.bf16.mxu0 %vm559_vm4, %v4440_v32 }
 0x583   : > { %3957 = vmatmul.mubr.msk.bf16.vlgmr.msra.gmra.mrb[40].mxu1 %vm331_vm2, %v4375_v4 }
 0x584   : > { %3962 = vmatprep.mubr.msk.bf16.mxu1 %vm421_vm3, %v4399_v12 }
 0x64b   : > { %v3924_v28 = vpop.f32.mrb[24].mxu0 }
 0x64c   : > { %v1162_v29 = vadd.f32 %v3924_v28, %v4546_v50  ;;  %v1153_v14 = vpop.f32.mrb[25].mxu0 }
 0x64d   : > { %v1154_v15 = vadd.f32 %v1153_v14, %v4542_v48  ;;  %v3925_v60 = vpop.f32.mrb[26].mxu0 }
 0x64e   : > { %v1186_v21 = vmax.f32 %v1162_v29, 0.0  ;;  %v1165_v18 = vadd.f32 %v3925_v60, %v4548_v51  ;;  %v1156_v19 = vpop.f32.mrb[27].mxu0  ;;  %v3940_v22 = vpop.f32.mrb[36].mxu1 }
 0x64f   : > { %v1184_v23 = vmax.f32 %v1154_v15, 0.0  ;;  %v1157_v27 = vadd.f32 %v1156_v19, %v4544_v49  ;;  %v1292_v26 = vadd.f32 %v3940_v22, %v4455_v36  ;;  %v1283_v30 = vpop.f32.mrb[37].mxu1 }
 0x650   : > { %v4686_v37 = vmax.f32 %v4629_v56, %v1186_v21  ;;  %v1187_v39 = vmax.f32 %v1165_v18, 0.0  ;;  %v1284_v42 = vadd.f32 %v1283_v30, %v4451_v34  ;;  %v3941_v38 = vpop.f32.mrb[38].mxu1 }
 0x651   : > { %v4690_v44 = vmax.f32 %v4633_v61, %v1184_v23  ;;  %v1185_v45 = vmax.f32 %v1157_v27, 0.0  ;;  %v1295_v46 = vadd.f32 %v3941_v38, %v4458_v40  ;;  %v1286_v43 = vpop.f32.mrb[39].mxu1  ;;  %v1300_v56 = vmax.f32 %v1292_v26, 0.0 }
 0x652   : > { %v4694_v47 = vmax.f32 %v4637_v16, %v1187_v39  ;;  %v1287_v52 = vadd.f32 %v1286_v43, %v4453_v35  ;;  %v1298_v6 = vmax.f32 %v1284_v42, 0.0 }
 0x653   : > { %v4698_v1 = vmax.f32 %v4641_v17, %v1185_v45  ;;  %v1301_v2 = vmax.f32 %v1295_v46, 0.0  ;;  %v3928_v3 = vpop.f32.mrb[28].mxu0  ;;  %v3574_v45 = vld [vmem:[%s4370_s12 + $0x18] sm:$0xf] }
 0x654   : > { %v1299_v59 = vmax.f32 %v1287_v52, 0.0  ;;  %v1178_v61 = vadd.f32 %v3928_v3, %v4570_v25  ;;  %v1169_v8 = vpop.f32.mrb[29].mxu0 }
 0x655   : > { %v1303_v63 = vpack.c.bf16 %v1301_v2, %v1300_v56  ;;  %v1170_v11 = vadd.f32 %v1169_v8, %v4552_v55  ;;  %v3929_v13 = vpop.f32.mrb[30].mxu0 }
 0x656   : > { %v1302_v58 = vpack.c.bf16 %v1299_v59, %v1298_v6  ;;  %v1190_v16 = vmax.f32 %v1178_v61, 0.0  ;;  %v1181_v62 = vadd.f32 %v3929_v13, %v4580_v41  ;;  %v1172_v28 = vpop.f32.mrb[31].mxu0  ;;  %v1424_v29 = vpop.f32.mrb[40].mxu1 }
 0x657   : > { %v1188_v17 = vmax.f32 %v1170_v11, 0.0  ;;  %v1173_v14 = vadd.f32 %v1172_v28, %v4559_v7  ;;  %v1425_v15 = vadd.f32 %v1424_v29, %v4424_v20  ;;  %v3958_v60 = vpop.f32.mrb[41].mxu1 }
 0x658   : > { %v4706_v21 = vmax.f32 %v4649_v57, %v1190_v16  ;;  %v1191_v18 = vmax.f32 %v1181_v62, 0.0  ;;  %3942 = vmatprep.subr.bf16.mxu0 %v1302_v58  ;;  %v1427_v19 = vpop.f32.mrb[42].mxu1 }
 0x659   : > { %v4709_v22 = vmax.f32 %v4652_v5, %v1188_v17  ;;  %v1189_v23 = vmax.f32 %v1173_v14, 0.0  ;;  %v1428_v27 = vadd.f32 %v1427_v19, %v4427_v24  ;;  %3943 = vmatpush3.bf16.msra.mxu0 %v1302_v58  ;;  %v3959_v26 = vpop.f32.mrb[43].mxu1  ;;  %v1431_v57 = vmax.f32 %v1425_v15, 0.0 }
 0x65a   : > { %v4713_v30 = vmax.f32 %v4656_v9, %v1191_v18  ;;  %3944 = vmatprep.subr.bf16.mxu0 %v1303_v63  ;;  %v1573_v5 = vsel %vm335_vm1, %v3574_v45, 0 }
 0x65b   : > { %v4716_v39 = vmax.f32 %v4659_v10, %v1189_v23  ;;  %v1432_v42 = vmax.f32 %v1428_v27, 0.0 }
 0x65d   : > { %v1433_v38 = vpack.c.bf16 %v1432_v42, %v1431_v57  ;;  %3945 = vmatpush3.bf16.msra.mxu0 %v1303_v63 }
 0x65f   : > { %3960 = vmatprep.subr.bf16.mxu1 %v1433_v38 }
 0x660   : > { %3947 = vmatmul.mubr.msk.bf16.vlgmr.msra.gmra.mrb[32].mxu0 %vm559_vm4, %v4467_v53  ;;  %3961 = vmatpush3.bf16.msra.mxu1 %v1433_v38 }
 0x661   : > { %3950 = vmatprep.mubr.msk.bf16.mxu0 %vm559_vm4, %v4445_v33  ;;  %3978 = vmatprep.subr.bf16.mxu1 %v4292_v0 }
 0x663   : > { %3963 = vmatmul.mubr.msk.bf16.vlgmr.msra.gmra.mrb[44].mxu1 %vm421_vm3, %v4433_v31 }
 0x664   : > { %3979 = vmatpush3.bf16.msra.mxu1 %v1573_v5  ;;  %3980 = vmatprep.mubr.msk.bf16.mxu1 %vm4293_vm0, %v4292_v0 }
 0x668   : > { %3951 = vmatmul.mubr.msk.bf16.gmra.mrb[36].mxu0 %vm559_vm4, %v4472_v54 }
 0x669   : > { %3970 = vmatprep.mubr.msk.bf16.mxu0 %vm559_vm4, %v4440_v32 }
 0x66b   : > { %3981 = vmatmul.mubr.msk.bf16.vlgmr.msra.gmra.mrb[48].mxu1 %vm331_vm2, %v4375_v4 }
 0x66c   : > { %3986 = vmatprep.mubr.msk.bf16.mxu1 %vm421_vm3, %v4399_v12 }
 0x733   : > { %v3948_v9 = vpop.f32.mrb[32].mxu0 }
 0x734   : > { %v1347_v10 = vadd.f32 %v3948_v9, %v4546_v50  ;;  %v1338_v46 = vpop.f32.mrb[33].mxu0 }
 0x735   : > { %v1339_v43 = vadd.f32 %v1338_v46, %v4542_v48  ;;  %v3949_v52 = vpop.f32.mrb[34].mxu0 }
 0x736   : > { %v1371_v56 = vmax.f32 %v1347_v10, 0.0  ;;  %v1350_v2 = vadd.f32 %v3949_v52, %v4548_v51  ;;  %v1341_v3 = vpop.f32.mrb[35].mxu0  ;;  %v3964_v6 = vpop.f32.mrb[44].mxu1 }
 0x737   : > { %v1369_v59 = vmax.f32 %v1339_v43, 0.0  ;;  %v1342_v61 = vadd.f32 %v1341_v3, %v4544_v49  ;;  %v1477_v8 = vadd.f32 %v3964_v6, %v4455_v36  ;;  %v1468_v63 = vpop.f32.mrb[45].mxu1 }
 0x738   : > { %v4743_v11 = vmax.f32 %v4686_v37, %v1371_v56  ;;  %v1372_v13 = vmax.f32 %v1350_v2, 0.0  ;;  %v1469_v58 = vadd.f32 %v1468_v63, %v4451_v34  ;;  %v3965_v16 = vpop.f32.mrb[46].mxu1 }
 0x739   : > { %v4747_v62 = vmax.f32 %v4690_v44, %v1369_v59  ;;  %v1370_v28 = vmax.f32 %v1342_v61, 0.0  ;;  %v1480_v29 = vadd.f32 %v3965_v16, %v4458_v40  ;;  %v1471_v17 = vpop.f32.mrb[47].mxu1  ;;  %v1485_v37 = vmax.f32 %v1477_v8, 0.0 }
 0x73a   : > { %v4751_v14 = vmax.f32 %v4694_v47, %v1372_v13  ;;  %v1472_v15 = vadd.f32 %v1471_v17, %v4453_v35  ;;  %v1483_v23 = vmax.f32 %v1469_v58, 0.0 }
 0x73b   : > { %v4755_v60 = vmax.f32 %v4698_v1, %v1370_v28  ;;  %v1486_v18 = vmax.f32 %v1480_v29, 0.0  ;;  %v3952_v19 = vpop.f32.mrb[36].mxu0  ;;  %v3582_v28 = vld [vmem:[%s4370_s12 + $0x1c] sm:$0xf] }
 0x73c   : > { %v1484_v27 = vmax.f32 %v1472_v15, 0.0  ;;  %v1363_v44 = vadd.f32 %v3952_v19, %v4570_v25  ;;  %v1354_v26 = vpop.f32.mrb[37].mxu0 }
 0x73d   : > { %v1488_v57 = vpack.c.bf16 %v1486_v18, %v1485_v37  ;;  %v1355_v42 = vadd.f32 %v1354_v26, %v4552_v55  ;;  %v3953_v38 = vpop.f32.mrb[38].mxu0 }
 0x73e   : > { %v1487_v45 = vpack.c.bf16 %v1484_v27, %v1483_v23  ;;  %v1375_v47 = vmax.f32 %v1363_v44, 0.0  ;;  %v1366_v5 = vadd.f32 %v3953_v38, %v4580_v41  ;;  %v1357_v9 = vpop.f32.mrb[39].mxu0  ;;  %v1609_v10 = vpop.f32.mrb[48].mxu1 }
 0x73f   : > { %v1373_v1 = vmax.f32 %v1355_v42, 0.0  ;;  %v1358_v46 = vadd.f32 %v1357_v9, %v4559_v7  ;;  %v1610_v43 = vadd.f32 %v1609_v10, %v4424_v20  ;;  %v3982_v52 = vpop.f32.mrb[49].mxu1 }
 0x740   : > { %v4763_v56 = vmax.f32 %v4706_v21, %v1375_v47  ;;  %v1376_v2 = vmax.f32 %v1366_v5, 0.0  ;;  %3966 = vmatprep.subr.bf16.mxu0 %v1487_v45  ;;  %v1612_v3 = vpop.f32.mrb[50].mxu1 }
 0x741   : > { %v4766_v6 = vmax.f32 %v4709_v22, %v1373_v1  ;;  %v1374_v59 = vmax.f32 %v1358_v46, 0.0  ;;  %v1613_v61 = vadd.f32 %v1612_v3, %v4427_v24  ;;  %3967 = vmatpush3.bf16.msra.mxu0 %v1487_v45  ;;  %v3983_v8 = vpop.f32.mrb[51].mxu1  ;;  %v1616_v21 = vmax.f32 %v1610_v43, 0.0 }
 0x742   : > { %v4770_v63 = vmax.f32 %v4713_v30, %v1376_v2  ;;  %3968 = vmatprep.subr.bf16.mxu0 %v1488_v57  ;;  %v1758_v22 = vsel %vm335_vm1, %v3582_v28, 0 }
 0x743   : > { %v4773_v13 = vmax.f32 %v4716_v39, %v1374_v59  ;;  %v1617_v58 = vmax.f32 %v1613_v61, 0.0 }
 0x745   : > { %v1618_v16 = vpack.c.bf16 %v1617_v58, %v1616_v21  ;;  %3969 = vmatpush3.bf16.msra.mxu0 %v1488_v57 }
 0x747   : > { %3984 = vmatprep.subr.bf16.mxu1 %v1618_v16 }
 0x748   : > { %3971 = vmatmul.mubr.msk.bf16.vlgmr.msra.gmra.mrb[40].mxu0 %vm559_vm4, %v4467_v53  ;;  %3985 = vmatpush3.bf16.msra.mxu1 %v1618_v16 }
 0x749   : > { %3974 = vmatprep.mubr.msk.bf16.mxu0 %vm559_vm4, %v4445_v33  ;;  %4002 = vmatprep.subr.bf16.mxu1 %v4292_v0 }
 0x74b   : > { %3987 = vmatmul.mubr.msk.bf16.vlgmr.msra.gmra.mrb[52].mxu1 %vm421_vm3, %v4433_v31 }
 0x74c   : > { %4003 = vmatpush3.bf16.msra.mxu1 %v1758_v22  ;;  %4004 = vmatprep.mubr.msk.bf16.mxu1 %vm4293_vm0, %v4292_v0 }
 0x750   : > { %3975 = vmatmul.mubr.msk.bf16.gmra.mrb[44].mxu0 %vm559_vm4, %v4472_v54 }
 0x751   : > { %3994 = vmatprep.mubr.msk.bf16.mxu0 %vm559_vm4, %v4440_v32 }
 0x753   : > { %4005 = vmatmul.mubr.msk.bf16.vlgmr.msra.gmra.mrb[56].mxu1 %vm331_vm2, %v4375_v4 }
 0x754   : > { %4010 = vmatprep.mubr.msk.bf16.mxu1 %vm421_vm3, %v4399_v12 }
 0x81b   : > { %v3972_v30 = vpop.f32.mrb[40].mxu0 }
 0x81c   : > { %v1532_v39 = vadd.f32 %v3972_v30, %v4546_v50  ;;  %v1523_v29 = vpop.f32.mrb[41].mxu0 }
 0x81d   : > { %v1524_v17 = vadd.f32 %v1523_v29, %v4542_v48  ;;  %v3973_v15 = vpop.f32.mrb[42].mxu0 }
 0x81e   : > { %v1556_v37 = vmax.f32 %v1532_v39, 0.0  ;;  %v1535_v18 = vadd.f32 %v3973_v15, %v4548_v51  ;;  %v1526_v19 = vpop.f32.mrb[43].mxu0  ;;  %v3988_v23 = vpop.f32.mrb[52].mxu1 }
 0x81f   : > { %v1554_v27 = vmax.f32 %v1524_v17, 0.0  ;;  %v1527_v44 = vadd.f32 %v1526_v19, %v4544_v49  ;;  %v1662_v4 = vadd.f32 %v3988_v23, %v4455_v36  ;;  %v1653_v26 = vpop.f32.mrb[53].mxu1 }
 0x820   : > { %v4800_v12 = vmax.f32 %v4743_v11, %v1556_v37  ;;  %v1557_v57 = vmax.f32 %v1535_v18, 0.0  ;;  %v1654_v42 = vadd.f32 %v1653_v26, %v4451_v34  ;;  %v3989_v38 = vpop.f32.mrb[54].mxu1 }
 0x821   : > { %v4804_v45 = vmax.f32 %v4747_v62, %v1554_v27  ;;  %v1555_v47 = vmax.f32 %v1527_v44, 0.0  ;;  %v1665_v5 = vadd.f32 %v3989_v38, %v4458_v40  ;;  %v1656_v9 = vpop.f32.mrb[55].mxu1  ;;  %v1670_v11 = vmax.f32 %v1662_v4, 0.0 }
 0x822   : > { %v4808_v10 = vmax.f32 %v4751_v14, %v1557_v57  ;;  %v1657_v1 = vadd.f32 %v1656_v9, %v4453_v35  ;;  %v1668_v2 = vmax.f32 %v1654_v42, 0.0  ;;  %v3590_v42 = vld [vmem:[%s4370_s12 + $0x20] sm:$0xf] }
 0x823   : > { %v4812_v46 = vmax.f32 %v4755_v60, %v1555_v47  ;;  %v1671_v43 = vmax.f32 %v1665_v5, 0.0  ;;  %v3976_v52 = vpop.f32.mrb[44].mxu0 }
 0x824   : > { %v1669_v3 = vmax.f32 %v1657_v1, 0.0  ;;  %v1548_v62 = vadd.f32 %v3976_v52, %v4570_v25  ;;  %v1539_v59 = vpop.f32.mrb[45].mxu0 }
 0x825   : > { %v1673_v61 = vpack.c.bf16 %v1671_v43, %v1670_v11  ;;  %v1540_v8 = vadd.f32 %v1539_v59, %v4552_v55  ;;  %v3977_v21 = vpop.f32.mrb[46].mxu0 }
 0x826   : > { %v1672_v58 = vpack.c.bf16 %v1669_v3, %v1668_v2  ;;  %v1560_v14 = vmax.f32 %v1548_v62, 0.0  ;;  %v1551_v16 = vadd.f32 %v3977_v21, %v4580_v41  ;;  %v1542_v28 = vpop.f32.mrb[47].mxu0  ;;  %v1794_v22 = vpop.f32.mrb[56].mxu1 }
 0x827   : > { %v1558_v60 = vmax.f32 %v1540_v8, 0.0  ;;  %v1543_v30 = vadd.f32 %v1542_v28, %v4559_v7  ;;  %v1795_v39 = vadd.f32 %v1794_v22, %v4424_v20  ;;  %v4006_v29 = vpop.f32.mrb[57].mxu1 }
 0x828   : > { %v4820_v17 = vmax.f32 %v4763_v56, %v1560_v14  ;;  %v1561_v15 = vmax.f32 %v1551_v16, 0.0  ;;  %3990 = vmatprep.subr.bf16.mxu0 %v1672_v58  ;;  %v1797_v37 = vpop.f32.mrb[58].mxu1 }
 0x829   : > { %v4823_v18 = vmax.f32 %v4766_v6, %v1558_v60  ;;  %v1559_v19 = vmax.f32 %v1543_v30, 0.0  ;;  %v1798_v23 = vadd.f32 %v1797_v37, %v4427_v24  ;;  %3991 = vmatpush3.bf16.msra.mxu0 %v1672_v58  ;;  %v4007_v27 = vpop.f32.mrb[59].mxu1  ;;  %v1801_v56 = vmax.f32 %v1795_v39, 0.0 }
 0x82a   : > { %v4827_v44 = vmax.f32 %v4770_v63, %v1561_v15  ;;  %3992 = vmatprep.subr.bf16.mxu0 %v1673_v61  ;;  %v1943_v6 = vsel %vm335_vm1, %v3590_v42, 0 }
 0x82b   : > { %v4830_v4 = vmax.f32 %v4773_v13, %v1559_v19  ;;  %v1802_v26 = vmax.f32 %v1798_v23, 0.0 }
 0x82d   : > { %v1803_v57 = vpack.c.bf16 %v1802_v26, %v1801_v56  ;;  %3993 = vmatpush3.bf16.msra.mxu0 %v1673_v61 }
 0x82f   : > { %4008 = vmatprep.subr.bf16.mxu1 %v1803_v57 }
 0x830   : > { %3995 = vmatmul.mubr.msk.bf16.vlgmr.msra.gmra.mrb[48].mxu0 %vm559_vm4, %v4467_v53  ;;  %4009 = vmatpush3.bf16.msra.mxu1 %v1803_v57 }
 0x831   : > { %3998 = vmatprep.mubr.msk.bf16.mxu0 %vm559_vm4, %v4445_v33  ;;  %4026 = vmatprep.subr.bf16.mxu1 %v4292_v0  ;;  %v4850_v33 = vld [vmem:[%s5389_s1] sm:$0xff]  }
 0x833   : > { %4011 = vmatmul.mubr.msk.bf16.vlgmr.msra.gmra.mrb[60].mxu1 %vm421_vm3, %v4433_v31  ;;  %v4857_v31 = vld [vmem:[%s5391_s3] sm:$0xff]  }
 0x834   : > { %4027 = vmatpush3.bf16.msra.mxu1 %v1943_v6  ;;  %4028 = vmatprep.mubr.msk.bf16.mxu1 %vm4293_vm0, %v4292_v0 }
 0x838   : > { %3999 = vmatmul.mubr.msk.bf16.gmra.mrb[52].mxu0 %vm559_vm4, %v4472_v54 }
 0x839   : > { %4018 = vmatprep.mubr.msk.bf16.mxu0 %vm559_vm4, %v4440_v32 }
 0x83b   : > { %4029 = vmatmul.mubr.msk.bf16.vlgmr.msra.gmra.mrb[64].mxu1 %vm331_vm2, %v4850_v33 }
 0x83c   : > { %4034 = vmatprep.mubr.msk.bf16.mxu1 %vm421_vm3, %v4857_v31 }
 0x903   : > { %v3996_v53 = vpop.f32.mrb[48].mxu0 }
 0x904   : > { %v1717_v54 = vadd.f32 %v3996_v53, %v4546_v50  ;;  %v1708_v32 = vpop.f32.mrb[49].mxu0 }
 0x905   : > { %v1709_v63 = vadd.f32 %v1708_v32, %v4542_v48  ;;  %v3997_v13 = vpop.f32.mrb[50].mxu0 }
 0x906   : > { %v1741_v38 = vmax.f32 %v1717_v54, 0.0  ;;  %v1720_v47 = vadd.f32 %v3997_v13, %v4548_v51  ;;  %v1711_v5 = vpop.f32.mrb[51].mxu0  ;;  %v4012_v9 = vpop.f32.mrb[60].mxu1 }
 0x907   : > { %v1739_v1 = vmax.f32 %v1709_v63, 0.0  ;;  %v1712_v11 = vadd.f32 %v1711_v5, %v4544_v49  ;;  %v1847_v43 = vadd.f32 %v4012_v9, %v4455_v36  ;;  %v1838_v52 = vpop.f32.mrb[61].mxu1 }
 0x908   : > { %v4867_v2 = vmax.f32 %v4800_v12, %v1741_v38  ;;  %v1742_v3 = vmax.f32 %v1720_v47, 0.0  ;;  %v1839_v62 = vadd.f32 %v1838_v52, %v4451_v34  ;;  %v4013_v59 = vpop.f32.mrb[62].mxu1  ;;  %v4919_v52 = vld [vmem:[%s5391_s3 + $0x8] sm:$0xff]  }
 0x909   : > { %v4871_v61 = vmax.f32 %v4804_v45, %v1739_v1  ;;  %v1740_v8 = vmax.f32 %v1712_v11, 0.0  ;;  %v1850_v21 = vadd.f32 %v4013_v59, %v4458_v40  ;;  %v1841_v58 = vpop.f32.mrb[63].mxu1  ;;  %v1855_v12 = vmax.f32 %v1847_v43, 0.0  ;;  %v3598_v43 = vld [vmem:[%s4370_s12 + $0x24] sm:$0xf] }
 0x90a   : > { %v4875_v14 = vmax.f32 %v4808_v10, %v1742_v3  ;;  %v1842_v16 = vadd.f32 %v1841_v58, %v4453_v35  ;;  %v1853_v30 = vmax.f32 %v1839_v62, 0.0  ;;  %v4928_v3 = vld [vmem:[%s5393_s5 + $0x18] sm:$0xff]   ;;  %v4935_v62 = vld [vmem:[%s5393_s5] sm:$0xff]  }
 0x90b   : > { %v4879_v28 = vmax.f32 %v4812_v46, %v1740_v8  ;;  %v1856_v22 = vmax.f32 %v1850_v21, 0.0  ;;  %v4000_v60 = vpop.f32.mrb[52].mxu0 }
 0x90c   : > { %v1854_v39 = vmax.f32 %v1842_v16, 0.0  ;;  %v1733_v45 = vadd.f32 %v4000_v60, %v4570_v25  ;;  %v1724_v29 = vpop.f32.mrb[53].mxu0 }
 0x90d   : > { %v1858_v15 = vpack.c.bf16 %v1856_v22, %v1855_v12  ;;  %v1725_v37 = vadd.f32 %v1724_v29, %v4552_v55  ;;  %v4001_v19 = vpop.f32.mrb[54].mxu0 }
 0x90e   : > { %v1857_v23 = vpack.c.bf16 %v1854_v39, %v1853_v30  ;;  %v1745_v10 = vmax.f32 %v1733_v45, 0.0  ;;  %v1736_v27 = vadd.f32 %v4001_v19, %v4580_v41  ;;  %v1727_v56 = vpop.f32.mrb[55].mxu0  ;;  %v1979_v26 = vpop.f32.mrb[64].mxu1 }
 0x90f   : > { %v1743_v46 = vmax.f32 %v1725_v37, 0.0  ;;  %v1728_v57 = vadd.f32 %v1727_v56, %v4559_v7  ;;  %v1980_v42 = vadd.f32 %v1979_v26, %v4424_v20  ;;  %v4030_v6 = vpop.f32.mrb[65].mxu1 }
 0x910   : > { %v4887_v53 = vmax.f32 %v4820_v17, %v1745_v10  ;;  %v1746_v54 = vmax.f32 %v1736_v27, 0.0  ;;  %4014 = vmatprep.subr.bf16.mxu0 %v1857_v23  ;;  %v1982_v32 = vpop.f32.mrb[66].mxu1 }
 0x911   : > { %v4890_v63 = vmax.f32 %v4823_v18, %v1743_v46  ;;  %v1744_v13 = vmax.f32 %v1728_v57, 0.0  ;;  %v1983_v38 = vadd.f32 %v1982_v32, %v4427_v24  ;;  %4015 = vmatpush3.bf16.msra.mxu0 %v1857_v23  ;;  %v4031_v47 = vpop.f32.mrb[67].mxu1  ;;  %v1986_v17 = vmax.f32 %v1980_v42, 0.0  ;;  %v4903_v18 = vld [vmem:[%s5393_s5 + $0x8] sm:$0xff]  }
 0x912   : > { %v4894_v5 = vmax.f32 %v4827_v44, %v1746_v54  ;;  %4016 = vmatprep.subr.bf16.mxu0 %v1858_v15  ;;  %v4910_v44 = vld [vmem:[%s5393_s5 + $0x10] sm:$0xff]  }
 0x913   : > { %v4897_v9 = vmax.f32 %v4830_v4, %v1744_v13  ;;  %v1987_v1 = vmax.f32 %v1983_v38, 0.0  ;;  %v2128_v4 = vsel %vm335_vm1, %v3598_v43, 0 }
 0x915   : > { %v1988_v11 = vpack.c.bf16 %v1987_v1, %v1986_v17  ;;  %4017 = vmatpush3.bf16.msra.mxu0 %v1858_v15 }
 0x917   : > { %4032 = vmatprep.subr.bf16.mxu1 %v1988_v11 }
 0x918   : > { %4019 = vmatmul.mubr.msk.bf16.vlgmr.msra.gmra.mrb[56].mxu0 %vm559_vm4, %v4903_v18  ;;  %4033 = vmatpush3.bf16.msra.mxu1 %v1988_v11 }
 0x919   : > { %4022 = vmatprep.mubr.msk.bf16.mxu0 %vm559_vm4, %v4910_v44  ;;  %4050 = vmatprep.subr.bf16.mxu1 %v4292_v0 }
 0x91b   : > { %4035 = vmatmul.mubr.msk.bf16.vlgmr.msra.gmra.mrb[68].mxu1 %vm421_vm3, %v4919_v52 }
 0x91c   : > { %4051 = vmatpush3.bf16.msra.mxu1 %v2128_v4  ;;  %4052 = vmatprep.mubr.msk.bf16.mxu1 %vm4293_vm0, %v4292_v0 }
 0x920   : > { %4023 = vmatmul.mubr.msk.bf16.gmra.mrb[60].mxu0 %vm559_vm4, %v4928_v3 }
 0x921   : > { %4042 = vmatprep.mubr.msk.bf16.mxu0 %vm559_vm4, %v4935_v62 }
 0x923   : > { %4053 = vmatmul.mubr.msk.bf16.vlgmr.msra.gmra.mrb[72].mxu1 %vm331_vm2, %v4850_v33 }
 0x924   : > { %4058 = vmatprep.mubr.msk.bf16.mxu1 %vm421_vm3, %v4857_v31 }
 0x9eb   : > { %v4020_v59 = vpop.f32.mrb[56].mxu0 }
 0x9ec   : > { %v1902_v8 = vadd.f32 %v4020_v59, %v4546_v50  ;;  %v1893_v21 = vpop.f32.mrb[57].mxu0 }
 0x9ed   : > { %v1894_v58 = vadd.f32 %v1893_v21, %v4542_v48  ;;  %v4021_v16 = vpop.f32.mrb[58].mxu0 }
 0x9ee   : > { %v1926_v12 = vmax.f32 %v1902_v8, 0.0  ;;  %v1905_v22 = vadd.f32 %v4021_v16, %v4548_v51  ;;  %v1896_v60 = vpop.f32.mrb[59].mxu0  ;;  %v4036_v30 = vpop.f32.mrb[68].mxu1 }
 0x9ef   : > { %v1924_v39 = vmax.f32 %v1894_v58, 0.0  ;;  %v1897_v45 = vadd.f32 %v1896_v60, %v4544_v49  ;;  %v2032_v29 = vadd.f32 %v4036_v30, %v4455_v36  ;;  %v2023_v15 = vpop.f32.mrb[69].mxu1 }
 0x9f0   : > { %v4949_v37 = vmax.f32 %v4867_v2, %v1926_v12  ;;  %v1927_v19 = vmax.f32 %v1905_v22, 0.0  ;;  %v2024_v23 = vadd.f32 %v2023_v15, %v4451_v34  ;;  %v4037_v10 = vpop.f32.mrb[70].mxu1 }
 0x9f1   : > { %v4953_v27 = vmax.f32 %v4871_v61, %v1924_v39  ;;  %v1925_v56 = vmax.f32 %v1897_v45, 0.0  ;;  %v2035_v26 = vadd.f32 %v4037_v10, %v4458_v40  ;;  %v2026_v46 = vpop.f32.mrb[71].mxu1  ;;  %v2040_v2 = vmax.f32 %v2032_v29, 0.0 }
 0x9f2   : > { %v4957_v57 = vmax.f32 %v4875_v14, %v1927_v19  ;;  %v2027_v42 = vadd.f32 %v2026_v46, %v4453_v35  ;;  %v2038_v13 = vmax.f32 %v2024_v23, 0.0 }
 0x9f3   : > { %v4961_v6 = vmax.f32 %v4879_v28, %v1925_v56  ;;  %v2041_v54 = vmax.f32 %v2035_v26, 0.0  ;;  %v4024_v32 = vpop.f32.mrb[60].mxu0  ;;  %v3606_v56 = vld [vmem:[%s4370_s12 + $0x28] sm:$0xf] }
 0x9f4   : > { %v2039_v38 = vmax.f32 %v2027_v42, 0.0  ;;  %v1918_v61 = vadd.f32 %v4024_v32, %v4570_v25  ;;  %v1909_v47 = vpop.f32.mrb[61].mxu0 }
 0x9f5   : > { %v2043_v17 = vpack.c.bf16 %v2041_v54, %v2040_v2  ;;  %v1910_v1 = vadd.f32 %v1909_v47, %v4552_v55  ;;  %v4025_v11 = vpop.f32.mrb[62].mxu0 }
 0x9f6   : > { %v2042_v43 = vpack.c.bf16 %v2039_v38, %v2038_v13  ;;  %v1930_v14 = vmax.f32 %v1918_v61, 0.0  ;;  %v1921_v4 = vadd.f32 %v4025_v11, %v4580_v41  ;;  %v1912_v59 = vpop.f32.mrb[63].mxu0  ;;  %v2164_v8 = vpop.f32.mrb[72].mxu1 }
 0x9f7   : > { %v1928_v28 = vmax.f32 %v1910_v1, 0.0  ;;  %v1913_v21 = vadd.f32 %v1912_v59, %v4559_v7  ;;  %v2165_v58 = vadd.f32 %v2164_v8, %v4424_v20  ;;  %v4054_v16 = vpop.f32.mrb[73].mxu1 }
 0x9f8   : > { %v4969_v12 = vmax.f32 %v4887_v53, %v1930_v14  ;;  %v1931_v22 = vmax.f32 %v1921_v4, 0.0  ;;  %4038 = vmatprep.subr.bf16.mxu0 %v2042_v43  ;;  %v2167_v60 = vpop.f32.mrb[74].mxu1 }
 0x9f9   : > { %v4972_v30 = vmax.f32 %v4890_v63, %v1928_v28  ;;  %v1929_v39 = vmax.f32 %v1913_v21, 0.0  ;;  %v2168_v45 = vadd.f32 %v2167_v60, %v4427_v24  ;;  %4039 = vmatpush3.bf16.msra.mxu0 %v2042_v43  ;;  %v4055_v29 = vpop.f32.mrb[75].mxu1  ;;  %v2171_v53 = vmax.f32 %v2165_v58, 0.0 }
 0x9fa   : > { %v4976_v15 = vmax.f32 %v4894_v5, %v1931_v22  ;;  %4040 = vmatprep.subr.bf16.mxu0 %v2043_v17  ;;  %v2313_v63 = vsel %vm335_vm1, %v3606_v56, 0 }
 0x9fb   : > { %v4979_v19 = vmax.f32 %v4897_v9, %v1929_v39  ;;  %v2172_v23 = vmax.f32 %v2168_v45, 0.0 }
 0x9fd   : > { %v2173_v10 = vpack.c.bf16 %v2172_v23, %v2171_v53  ;;  %4041 = vmatpush3.bf16.msra.mxu0 %v2043_v17 }
 0x9ff   : > { %4056 = vmatprep.subr.bf16.mxu1 %v2173_v10 }
 0xa00   : > { %4043 = vmatmul.mubr.msk.bf16.vlgmr.msra.gmra.mrb[64].mxu0 %vm559_vm4, %v4903_v18  ;;  %4057 = vmatpush3.bf16.msra.mxu1 %v2173_v10 }
 0xa01   : > { %4046 = vmatprep.mubr.msk.bf16.mxu0 %vm559_vm4, %v4910_v44  ;;  %4074 = vmatprep.subr.bf16.mxu1 %v4292_v0 }
 0xa03   : > { %4059 = vmatmul.mubr.msk.bf16.vlgmr.msra.gmra.mrb[76].mxu1 %vm421_vm3, %v4919_v52 }
 0xa04   : > { %4075 = vmatpush3.bf16.msra.mxu1 %v2313_v63  ;;  %4076 = vmatprep.mubr.msk.bf16.mxu1 %vm4293_vm0, %v4292_v0 }
 0xa08   : > { %4047 = vmatmul.mubr.msk.bf16.gmra.mrb[68].mxu0 %vm559_vm4, %v4928_v3 }
 0xa09   : > { %4066 = vmatprep.mubr.msk.bf16.mxu0 %vm559_vm4, %v4935_v62 }
 0xa0b   : > { %4077 = vmatmul.mubr.msk.bf16.vlgmr.msra.gmra.mrb[80].mxu1 %vm331_vm2, %v4850_v33 }
 0xa0c   : > { %4082 = vmatprep.mubr.msk.bf16.mxu1 %vm421_vm3, %v4857_v31 }
 0xad3   : > { %v4044_v5 = vpop.f32.mrb[64].mxu0 }
 0xad4   : > { %v2087_v9 = vadd.f32 %v4044_v5, %v4546_v50  ;;  %v2078_v26 = vpop.f32.mrb[65].mxu0 }
 0xad5   : > { %v2079_v46 = vadd.f32 %v2078_v26, %v4542_v48  ;;  %v4045_v42 = vpop.f32.mrb[66].mxu0 }
 0xad6   : > { %v2111_v2 = vmax.f32 %v2087_v9, 0.0  ;;  %v2090_v54 = vadd.f32 %v4045_v42, %v4548_v51  ;;  %v2081_v32 = vpop.f32.mrb[67].mxu0  ;;  %v4060_v13 = vpop.f32.mrb[76].mxu1 }
 0xad7   : > { %v2109_v38 = vmax.f32 %v2079_v46, 0.0  ;;  %v2082_v61 = vadd.f32 %v2081_v32, %v4544_v49  ;;  %v2217_v47 = vadd.f32 %v4060_v13, %v4455_v36  ;;  %v2208_v17 = vpop.f32.mrb[77].mxu1 }
 0xad8   : > { %v5006_v1 = vmax.f32 %v4949_v37, %v2111_v2  ;;  %v2112_v11 = vmax.f32 %v2090_v54, 0.0  ;;  %v2209_v43 = vadd.f32 %v2208_v17, %v4451_v34  ;;  %v4061_v14 = vpop.f32.mrb[78].mxu1 }
 0xad9   : > { %v5010_v4 = vmax.f32 %v4953_v27, %v2109_v38  ;;  %v2110_v59 = vmax.f32 %v2082_v61, 0.0  ;;  %v2220_v8 = vadd.f32 %v4061_v14, %v4458_v40  ;;  %v2211_v28 = vpop.f32.mrb[79].mxu1  ;;  %v2225_v37 = vmax.f32 %v2217_v47, 0.0 }
 0xada   : > { %v5014_v21 = vmax.f32 %v4957_v57, %v2112_v11  ;;  %v2212_v58 = vadd.f32 %v2211_v28, %v4453_v35  ;;  %v2223_v39 = vmax.f32 %v2209_v43, 0.0 }
 0xadb   : > { %v5018_v16 = vmax.f32 %v4961_v6, %v2110_v59  ;;  %v2226_v22 = vmax.f32 %v2220_v8, 0.0  ;;  %v4048_v60 = vpop.f32.mrb[68].mxu0  ;;  %v3614_v59 = vld [vmem:[%s4370_s12 + $0x2c] sm:$0xf] }
 0xadc   : > { %v2224_v45 = vmax.f32 %v2212_v58, 0.0  ;;  %v2103_v27 = vadd.f32 %v4048_v60, %v4570_v25  ;;  %v2094_v29 = vpop.f32.mrb[69].mxu0 }
 0xadd   : > { %v2228_v53 = vpack.c.bf16 %v2226_v22, %v2225_v37  ;;  %v2095_v23 = vadd.f32 %v2094_v29, %v4552_v55  ;;  %v4049_v10 = vpop.f32.mrb[70].mxu0 }
 0xade   : > { %v2227_v56 = vpack.c.bf16 %v2224_v45, %v2223_v39  ;;  %v2115_v57 = vmax.f32 %v2103_v27, 0.0  ;;  %v2106_v63 = vadd.f32 %v4049_v10, %v4580_v41  ;;  %v2097_v5 = vpop.f32.mrb[71].mxu0  ;;  %v2349_v9 = vpop.f32.mrb[80].mxu1 }
 0xadf   : > { %v2113_v6 = vmax.f32 %v2095_v23, 0.0  ;;  %v2098_v26 = vadd.f32 %v2097_v5, %v4559_v7  ;;  %v2350_v46 = vadd.f32 %v2349_v9, %v4424_v20  ;;  %v4078_v42 = vpop.f32.mrb[81].mxu1 }
 0xae0   : > { %v5026_v2 = vmax.f32 %v4969_v12, %v2115_v57  ;;  %v2116_v54 = vmax.f32 %v2106_v63, 0.0  ;;  %4062 = vmatprep.subr.bf16.mxu0 %v2227_v56  ;;  %v2352_v32 = vpop.f32.mrb[82].mxu1 }
 0xae1   : > { %v5029_v13 = vmax.f32 %v4972_v30, %v2113_v6  ;;  %v2114_v38 = vmax.f32 %v2098_v26, 0.0  ;;  %v2353_v61 = vadd.f32 %v2352_v32, %v4427_v24  ;;  %4063 = vmatpush3.bf16.msra.mxu0 %v2227_v56  ;;  %v4079_v47 = vpop.f32.mrb[83].mxu1  ;;  %v2356_v12 = vmax.f32 %v2350_v46, 0.0 }
 0xae2   : > { %v5033_v17 = vmax.f32 %v4976_v15, %v2116_v54  ;;  %4064 = vmatprep.subr.bf16.mxu0 %v2228_v53  ;;  %v2498_v30 = vsel %vm335_vm1, %v3614_v59, 0 }
 0xae3   : > { %v5036_v11 = vmax.f32 %v4979_v19, %v2114_v38  ;;  %v2357_v43 = vmax.f32 %v2353_v61, 0.0 }
 0xae5   : > { %v2358_v14 = vpack.c.bf16 %v2357_v43, %v2356_v12  ;;  %4065 = vmatpush3.bf16.msra.mxu0 %v2228_v53 }
 0xae7   : > { %4080 = vmatprep.subr.bf16.mxu1 %v2358_v14 }
 0xae8   : > { %4067 = vmatmul.mubr.msk.bf16.vlgmr.msra.gmra.mrb[72].mxu0 %vm559_vm4, %v4903_v18  ;;  %4081 = vmatpush3.bf16.msra.mxu1 %v2358_v14 }
 0xae9   : > { %4070 = vmatprep.mubr.msk.bf16.mxu0 %vm559_vm4, %v4910_v44  ;;  %4098 = vmatprep.subr.bf16.mxu1 %v4292_v0 }
 0xaeb   : > { %4083 = vmatmul.mubr.msk.bf16.vlgmr.msra.gmra.mrb[84].mxu1 %vm421_vm3, %v4919_v52 }
 0xaec   : > { %4099 = vmatpush3.bf16.msra.mxu1 %v2498_v30  ;;  %4100 = vmatprep.mubr.msk.bf16.mxu1 %vm4293_vm0, %v4292_v0 }
 0xaf0   : > { %4071 = vmatmul.mubr.msk.bf16.gmra.mrb[76].mxu0 %vm559_vm4, %v4928_v3 }
 0xaf1   : > { %4090 = vmatprep.mubr.msk.bf16.mxu0 %vm559_vm4, %v4935_v62 }
 0xaf3   : > { %4101 = vmatmul.mubr.msk.bf16.vlgmr.msra.gmra.mrb[88].mxu1 %vm331_vm2, %v4850_v33 }
 0xaf4   : > { %4106 = vmatprep.mubr.msk.bf16.mxu1 %vm421_vm3, %v4857_v31 }
 0xbbb   : > { %v4068_v15 = vpop.f32.mrb[72].mxu0 }
 0xbbc   : > { %v2272_v19 = vadd.f32 %v4068_v15, %v4546_v50  ;;  %v2263_v8 = vpop.f32.mrb[73].mxu0 }
 0xbbd   : > { %v2264_v28 = vadd.f32 %v2263_v8, %v4542_v48  ;;  %v4069_v58 = vpop.f32.mrb[74].mxu0 }
 0xbbe   : > { %v2296_v37 = vmax.f32 %v2272_v19, 0.0  ;;  %v2275_v22 = vadd.f32 %v4069_v58, %v4548_v51  ;;  %v2266_v60 = vpop.f32.mrb[75].mxu0  ;;  %v4084_v39 = vpop.f32.mrb[84].mxu1 }
 0xbbf   : > { %v2294_v45 = vmax.f32 %v2264_v28, 0.0  ;;  %v2267_v27 = vadd.f32 %v2266_v60, %v4544_v49  ;;  %v2402_v29 = vadd.f32 %v4084_v39, %v4455_v36  ;;  %v2393_v53 = vpop.f32.mrb[85].mxu1 }
 0xbc0   : > { %v5063_v23 = vmax.f32 %v5006_v1, %v2296_v37  ;;  %v2297_v10 = vmax.f32 %v2275_v22, 0.0  ;;  %v2394_v56 = vadd.f32 %v2393_v53, %v4451_v34  ;;  %v4085_v57 = vpop.f32.mrb[86].mxu1 }
 0xbc1   : > { %v5067_v63 = vmax.f32 %v5010_v4, %v2294_v45  ;;  %v2295_v5 = vmax.f32 %v2267_v27, 0.0  ;;  %v2405_v9 = vadd.f32 %v4085_v57, %v4458_v40  ;;  %v2396_v6 = vpop.f32.mrb[87].mxu1  ;;  %v2410_v1 = vmax.f32 %v2402_v29, 0.0 }
 0xbc2   : > { %v5071_v26 = vmax.f32 %v5014_v21, %v2297_v10  ;;  %v2397_v46 = vadd.f32 %v2396_v6, %v4453_v35  ;;  %v2408_v38 = vmax.f32 %v2394_v56, 0.0 }
 0xbc3   : > { %v5075_v42 = vmax.f32 %v5018_v16, %v2295_v5  ;;  %v2411_v54 = vmax.f32 %v2405_v9, 0.0  ;;  %v4072_v32 = vpop.f32.mrb[76].mxu0  ;;  %v3622_v5 = vld [vmem:[%s4370_s12 + $0x30] sm:$0xf] }
 0xbc4   : > { %v2409_v61 = vmax.f32 %v2397_v46, 0.0  ;;  %v2288_v4 = vadd.f32 %v4072_v32, %v4570_v25  ;;  %v2279_v47 = vpop.f32.mrb[77].mxu0 }
 0xbc5   : > { %v2413_v12 = vpack.c.bf16 %v2411_v54, %v2410_v1  ;;  %v2280_v43 = vadd.f32 %v2279_v47, %v4552_v55  ;;  %v4073_v14 = vpop.f32.mrb[78].mxu0 }
 0xbc6   : > { %v2412_v59 = vpack.c.bf16 %v2409_v61, %v2408_v38  ;;  %v2300_v21 = vmax.f32 %v2288_v4, 0.0  ;;  %v2291_v30 = vadd.f32 %v4073_v14, %v4580_v41  ;;  %v2282_v15 = vpop.f32.mrb[79].mxu0  ;;  %v2534_v19 = vpop.f32.mrb[88].mxu1 }
 0xbc7   : > { %v2298_v16 = vmax.f32 %v2280_v43, 0.0  ;;  %v2283_v8 = vadd.f32 %v2282_v15, %v4559_v7  ;;  %v2535_v28 = vadd.f32 %v2534_v19, %v4424_v20  ;;  %v4102_v58 = vpop.f32.mrb[89].mxu1 }
 0xbc8   : > { %v5083_v37 = vmax.f32 %v5026_v2, %v2300_v21  ;;  %v2301_v22 = vmax.f32 %v2291_v30, 0.0  ;;  %4086 = vmatprep.subr.bf16.mxu0 %v2412_v59  ;;  %v2537_v60 = vpop.f32.mrb[90].mxu1 }
 0xbc9   : > { %v5086_v39 = vmax.f32 %v5029_v13, %v2298_v16  ;;  %v2299_v45 = vmax.f32 %v2283_v8, 0.0  ;;  %v2538_v27 = vadd.f32 %v2537_v60, %v4427_v24  ;;  %4087 = vmatpush3.bf16.msra.mxu0 %v2412_v59  ;;  %v4103_v29 = vpop.f32.mrb[91].mxu1  ;;  %v2541_v2 = vmax.f32 %v2535_v28, 0.0 }
 0xbca   : > { %v5090_v53 = vmax.f32 %v5033_v17, %v2301_v22  ;;  %4088 = vmatprep.subr.bf16.mxu0 %v2413_v12  ;;  %v2683_v13 = vsel %vm335_vm1, %v3622_v5, 0 }
 0xbcb   : > { %v5093_v10 = vmax.f32 %v5036_v11, %v2299_v45  ;;  %v2542_v56 = vmax.f32 %v2538_v27, 0.0 }
 0xbcd   : > { %v2543_v57 = vpack.c.bf16 %v2542_v56, %v2541_v2  ;;  %4089 = vmatpush3.bf16.msra.mxu0 %v2413_v12 }
 0xbcf   : > { %4104 = vmatprep.subr.bf16.mxu1 %v2543_v57 }
 0xbd0   : > { %4091 = vmatmul.mubr.msk.bf16.vlgmr.msra.gmra.mrb[80].mxu0 %vm559_vm4, %v4903_v18  ;;  %4105 = vmatpush3.bf16.msra.mxu1 %v2543_v57 }
 0xbd1   : > { %4094 = vmatprep.mubr.msk.bf16.mxu0 %vm559_vm4, %v4910_v44  ;;  %4122 = vmatprep.subr.bf16.mxu1 %v4292_v0 }
 0xbd3   : > { %4107 = vmatmul.mubr.msk.bf16.vlgmr.msra.gmra.mrb[92].mxu1 %vm421_vm3, %v4919_v52 }
 0xbd4   : > { %4123 = vmatpush3.bf16.msra.mxu1 %v2683_v13  ;;  %4124 = vmatprep.mubr.msk.bf16.mxu1 %vm4293_vm0, %v4292_v0 }
 0xbd8   : > { %4095 = vmatmul.mubr.msk.bf16.gmra.mrb[84].mxu0 %vm559_vm4, %v4928_v3 }
 0xbd9   : > { %4114 = vmatprep.mubr.msk.bf16.mxu0 %vm559_vm4, %v4935_v62 }
 0xbdb   : > { %4125 = vmatmul.mubr.msk.bf16.vlgmr.msra.gmra.mrb[96].mxu1 %vm331_vm2, %v4850_v33 }
 0xbdc   : > { %4130 = vmatprep.mubr.msk.bf16.mxu1 %vm421_vm3, %v4857_v31 }
 0xca3   : > { %v4092_v17 = vpop.f32.mrb[80].mxu0 }
 0xca4   : > { %v2457_v11 = vadd.f32 %v4092_v17, %v4546_v50  ;;  %v2448_v9 = vpop.f32.mrb[81].mxu0 }
 0xca5   : > { %v2449_v6 = vadd.f32 %v2448_v9, %v4542_v48  ;;  %v4093_v46 = vpop.f32.mrb[82].mxu0 }
 0xca6   : > { %v2481_v1 = vmax.f32 %v2457_v11, 0.0  ;;  %v2460_v54 = vadd.f32 %v4093_v46, %v4548_v51  ;;  %v2451_v32 = vpop.f32.mrb[83].mxu0  ;;  %v4108_v38 = vpop.f32.mrb[92].mxu1 }
 0xca7   : > { %v2479_v61 = vmax.f32 %v2449_v6, 0.0  ;;  %v2452_v4 = vadd.f32 %v2451_v32, %v4544_v49  ;;  %v2587_v47 = vadd.f32 %v4108_v38, %v4455_v36  ;;  %v2578_v12 = vpop.f32.mrb[93].mxu1 }
 0xca8   : > { %v5120_v43 = vmax.f32 %v5063_v23, %v2481_v1  ;;  %v2482_v14 = vmax.f32 %v2460_v54, 0.0  ;;  %v2579_v59 = vadd.f32 %v2578_v12, %v4451_v34  ;;  %v4109_v21 = vpop.f32.mrb[94].mxu1 }
 0xca9   : > { %v5124_v30 = vmax.f32 %v5067_v63, %v2479_v61  ;;  %v2480_v15 = vmax.f32 %v2452_v4, 0.0  ;;  %v2590_v19 = vadd.f32 %v4109_v21, %v4458_v40  ;;  %v2581_v16 = vpop.f32.mrb[95].mxu1  ;;  %v2595_v23 = vmax.f32 %v2587_v47, 0.0 }
 0xcaa   : > { %v5128_v8 = vmax.f32 %v5071_v26, %v2482_v14  ;;  %v2582_v28 = vadd.f32 %v2581_v16, %v4453_v35  ;;  %v2593_v45 = vmax.f32 %v2579_v59, 0.0 }
 0xcab   : > { %v5132_v58 = vmax.f32 %v5075_v42, %v2480_v15  ;;  %v2596_v22 = vmax.f32 %v2590_v19, 0.0  ;;  %v4096_v60 = vpop.f32.mrb[84].mxu0  ;;  %v3630_v15 = vld [vmem:[%s4370_s12 + $0x34] sm:$0xf] }
 0xcac   : > { %v2594_v27 = vmax.f32 %v2582_v28, 0.0  ;;  %v2473_v63 = vadd.f32 %v4096_v60, %v4570_v25  ;;  %v2464_v29 = vpop.f32.mrb[85].mxu0 }
 0xcad   : > { %v2598_v2 = vpack.c.bf16 %v2596_v22, %v2595_v23  ;;  %v2465_v56 = vadd.f32 %v2464_v29, %v4552_v55  ;;  %v4097_v57 = vpop.f32.mrb[86].mxu0 }
 0xcae   : > { %v2597_v5 = vpack.c.bf16 %v2594_v27, %v2593_v45  ;;  %v2485_v26 = vmax.f32 %v2473_v63, 0.0  ;;  %v2476_v13 = vadd.f32 %v4097_v57, %v4580_v41  ;;  %v2467_v17 = vpop.f32.mrb[87].mxu0  ;;  %v2719_v11 = vpop.f32.mrb[96].mxu1 }
 0xcaf   : > { %v2483_v42 = vmax.f32 %v2465_v56, 0.0  ;;  %v2468_v9 = vadd.f32 %v2467_v17, %v4559_v7  ;;  %v2720_v6 = vadd.f32 %v2719_v11, %v4424_v20  ;;  %v4126_v46 = vpop.f32.mrb[97].mxu1 }
 0xcb0   : > { %v5140_v1 = vmax.f32 %v5083_v37, %v2485_v26  ;;  %v2486_v54 = vmax.f32 %v2476_v13, 0.0  ;;  %4110 = vmatprep.subr.bf16.mxu0 %v2597_v5  ;;  %v2722_v32 = vpop.f32.mrb[98].mxu1 }
 0xcb1   : > { %v5143_v38 = vmax.f32 %v5086_v39, %v2483_v42  ;;  %v2484_v61 = vmax.f32 %v2468_v9, 0.0  ;;  %v2723_v4 = vadd.f32 %v2722_v32, %v4427_v24  ;;  %4111 = vmatpush3.bf16.msra.mxu0 %v2597_v5  ;;  %v4127_v47 = vpop.f32.mrb[99].mxu1  ;;  %v2726_v37 = vmax.f32 %v2720_v6, 0.0 }
 0xcb2   : > { %v5147_v12 = vmax.f32 %v5090_v53, %v2486_v54  ;;  %4112 = vmatprep.subr.bf16.mxu0 %v2598_v2  ;;  %v2868_v39 = vsel %vm335_vm1, %v3630_v15, 0 }
 0xcb3   : > { %v5150_v14 = vmax.f32 %v5093_v10, %v2484_v61  ;;  %v2727_v59 = vmax.f32 %v2723_v4, 0.0 }
 0xcb5   : > { %v2728_v21 = vpack.c.bf16 %v2727_v59, %v2726_v37  ;;  %4113 = vmatpush3.bf16.msra.mxu0 %v2598_v2 }
 0xcb7   : > { %4128 = vmatprep.subr.bf16.mxu1 %v2728_v21 }
 0xcb8   : > { %4115 = vmatmul.mubr.msk.bf16.vlgmr.msra.gmra.mrb[88].mxu0 %vm559_vm4, %v4903_v18  ;;  %4129 = vmatpush3.bf16.msra.mxu1 %v2728_v21 }
 0xcb9   : > { %4118 = vmatprep.mubr.msk.bf16.mxu0 %vm559_vm4, %v4910_v44  ;;  %4146 = vmatprep.subr.bf16.mxu1 %v4292_v0 }
 0xcbb   : > { %4131 = vmatmul.mubr.msk.bf16.vlgmr.msra.gmra.mrb[100].mxu1 %vm421_vm3, %v4919_v52 }
 0xcbc   : > { %4147 = vmatpush3.bf16.msra.mxu1 %v2868_v39  ;;  %4148 = vmatprep.mubr.msk.bf16.mxu1 %vm4293_vm0, %v4292_v0 }
 0xcc0   : > { %4119 = vmatmul.mubr.msk.bf16.gmra.mrb[92].mxu0 %vm559_vm4, %v4928_v3 }
 0xcc1   : > { %4138 = vmatprep.mubr.msk.bf16.mxu0 %vm559_vm4, %v4935_v62 }
 0xcc3   : > { %4149 = vmatmul.mubr.msk.bf16.vlgmr.msra.gmra.mrb[104].mxu1 %vm331_vm2, %v4850_v33 }
 0xcc4   : > { %4154 = vmatprep.mubr.msk.bf16.mxu1 %vm421_vm3, %v4857_v31 }
 0xd8b   : > { %v4116_v53 = vpop.f32.mrb[88].mxu0 }
 0xd8c   : > { %v2642_v10 = vadd.f32 %v4116_v53, %v4546_v50  ;;  %v2633_v19 = vpop.f32.mrb[89].mxu0 }
 0xd8d   : > { %v2634_v16 = vadd.f32 %v2633_v19, %v4542_v48  ;;  %v4117_v28 = vpop.f32.mrb[90].mxu0 }
 0xd8e   : > { %v2666_v23 = vmax.f32 %v2642_v10, 0.0  ;;  %v2645_v22 = vadd.f32 %v4117_v28, %v4548_v51  ;;  %v2636_v60 = vpop.f32.mrb[91].mxu0  ;;  %v4132_v45 = vpop.f32.mrb[100].mxu1 }
 0xd8f   : > { %v2664_v27 = vmax.f32 %v2634_v16, 0.0  ;;  %v2637_v63 = vadd.f32 %v2636_v60, %v4544_v49  ;;  %v2772_v29 = vadd.f32 %v4132_v45, %v4455_v36  ;;  %v2763_v2 = vpop.f32.mrb[101].mxu1 }
 0xd90   : > { %v5177_v56 = vmax.f32 %v5120_v43, %v2666_v23  ;;  %v2667_v57 = vmax.f32 %v2645_v22, 0.0  ;;  %v2764_v5 = vadd.f32 %v2763_v2, %v4451_v34  ;;  %v4133_v26 = vpop.f32.mrb[102].mxu1 }
 0xd91   : > { %v5181_v13 = vmax.f32 %v5124_v30, %v2664_v27  ;;  %v2665_v17 = vmax.f32 %v2637_v63, 0.0  ;;  %v2775_v11 = vadd.f32 %v4133_v26, %v4458_v40  ;;  %v2766_v42 = vpop.f32.mrb[103].mxu1  ;;  %v2780_v43 = vmax.f32 %v2772_v29, 0.0 }
 0xd92   : > { %v5185_v9 = vmax.f32 %v5128_v8, %v2667_v57  ;;  %v2767_v6 = vadd.f32 %v2766_v42, %v4453_v35  ;;  %v2778_v61 = vmax.f32 %v2764_v5, 0.0 }
 0xd93   : > { %v5189_v46 = vmax.f32 %v5132_v58, %v2665_v17  ;;  %v2781_v54 = vmax.f32 %v2775_v11, 0.0  ;;  %v4120_v32 = vpop.f32.mrb[92].mxu0  ;;  %v3638_v17 = vld [vmem:[%s4370_s12 + $0x38] sm:$0xf] }
 0xd94   : > { %v2779_v4 = vmax.f32 %v2767_v6, 0.0  ;;  %v2658_v30 = vadd.f32 %v4120_v32, %v4570_v25  ;;  %v2649_v47 = vpop.f32.mrb[93].mxu0 }
 0xd95   : > { %v2783_v37 = vpack.c.bf16 %v2781_v54, %v2780_v43  ;;  %v2650_v59 = vadd.f32 %v2649_v47, %v4552_v55  ;;  %v4121_v21 = vpop.f32.mrb[94].mxu0 }
 0xd96   : > { %v2782_v15 = vpack.c.bf16 %v2779_v4, %v2778_v61  ;;  %v2670_v8 = vmax.f32 %v2658_v30, 0.0  ;;  %v2661_v39 = vadd.f32 %v4121_v21, %v4580_v41  ;;  %v2652_v53 = vpop.f32.mrb[95].mxu0  ;;  %v2904_v10 = vpop.f32.mrb[104].mxu1 }
 0xd97   : > { %v2668_v58 = vmax.f32 %v2650_v59, 0.0  ;;  %v2653_v19 = vadd.f32 %v2652_v53, %v4559_v7  ;;  %v2905_v16 = vadd.f32 %v2904_v10, %v4424_v20  ;;  %v4150_v28 = vpop.f32.mrb[105].mxu1 }
 0xd98   : > { %v5197_v23 = vmax.f32 %v5140_v1, %v2670_v8  ;;  %v2671_v22 = vmax.f32 %v2661_v39, 0.0  ;;  %4134 = vmatprep.subr.bf16.mxu0 %v2782_v15  ;;  %v2907_v60 = vpop.f32.mrb[106].mxu1 }
 0xd99   : > { %v5200_v45 = vmax.f32 %v5143_v38, %v2668_v58  ;;  %v2669_v27 = vmax.f32 %v2653_v19, 0.0  ;;  %v2908_v63 = vadd.f32 %v2907_v60, %v4427_v24  ;;  %4135 = vmatpush3.bf16.msra.mxu0 %v2782_v15  ;;  %v4151_v29 = vpop.f32.mrb[107].mxu1  ;;  %v2911_v1 = vmax.f32 %v2905_v16, 0.0 }
 0xd9a   : > { %v5204_v2 = vmax.f32 %v5147_v12, %v2671_v22  ;;  %4136 = vmatprep.subr.bf16.mxu0 %v2783_v37  ;;  %v3053_v38 = vsel %vm335_vm1, %v3638_v17, 0 }
 0xd9b   : > { %v5207_v57 = vmax.f32 %v5150_v14, %v2669_v27  ;;  %v2912_v5 = vmax.f32 %v2908_v63, 0.0 }
 0xd9d   : > { %v2913_v26 = vpack.c.bf16 %v2912_v5, %v2911_v1  ;;  %4137 = vmatpush3.bf16.msra.mxu0 %v2783_v37 }
 0xd9f   : > { %4152 = vmatprep.subr.bf16.mxu1 %v2913_v26 }
 0xda0   : > { %4139 = vmatmul.mubr.msk.bf16.vlgmr.msra.gmra.mrb[96].mxu0 %vm559_vm4, %v4903_v18  ;;  %4153 = vmatpush3.bf16.msra.mxu1 %v2913_v26 }
 0xda1   : > { %4142 = vmatprep.mubr.msk.bf16.mxu0 %vm559_vm4, %v4910_v44  ;;  %4170 = vmatprep.subr.bf16.mxu1 %v4292_v0 }
 0xda3   : > { %4155 = vmatmul.mubr.msk.bf16.vlgmr.msra.gmra.mrb[108].mxu1 %vm421_vm3, %v4919_v52 }
 0xda4   : > { %4171 = vmatpush3.bf16.msra.mxu1 %v3053_v38  ;;  %4172 = vmatprep.mubr.msk.bf16.mxu1 %vm4293_vm0, %v4292_v0 }
 0xda8   : > { %4143 = vmatmul.mubr.msk.bf16.gmra.mrb[100].mxu0 %vm559_vm4, %v4928_v3 }
 0xda9   : > { %4162 = vmatprep.mubr.msk.bf16.mxu0 %vm559_vm4, %v4935_v62 }
 0xdab   : > { %4173 = vmatmul.mubr.msk.bf16.vlgmr.msra.gmra.mrb[112].mxu1 %vm331_vm2, %v4850_v33 }
 0xdac   : > { %4178 = vmatprep.mubr.msk.bf16.mxu1 %vm421_vm3, %v4857_v31 }
 0xe73   : > { %v4140_v12 = vpop.f32.mrb[96].mxu0 }
 0xe74   : > { %v2827_v14 = vadd.f32 %v4140_v12, %v4546_v50  ;;  %v2818_v11 = vpop.f32.mrb[97].mxu0 }
 0xe75   : > { %v2819_v42 = vadd.f32 %v2818_v11, %v4542_v48  ;;  %v4141_v6 = vpop.f32.mrb[98].mxu0 }
 0xe76   : > { %v2851_v43 = vmax.f32 %v2827_v14, 0.0  ;;  %v2830_v54 = vadd.f32 %v4141_v6, %v4548_v51  ;;  %v2821_v32 = vpop.f32.mrb[99].mxu0  ;;  %v4156_v61 = vpop.f32.mrb[108].mxu1 }
 0xe77   : > { %v2849_v4 = vmax.f32 %v2819_v42, 0.0  ;;  %v2822_v30 = vadd.f32 %v2821_v32, %v4544_v49  ;;  %v2957_v47 = vadd.f32 %v4156_v61, %v4455_v36  ;;  %v2948_v37 = vpop.f32.mrb[109].mxu1 }
 0xe78   : > { %v5234_v59 = vmax.f32 %v5177_v56, %v2851_v43  ;;  %v2852_v21 = vmax.f32 %v2830_v54, 0.0  ;;  %v2949_v15 = vadd.f32 %v2948_v37, %v4451_v34  ;;  %v4157_v8 = vpop.f32.mrb[110].mxu1 }
 0xe79   : > { %v5238_v39 = vmax.f32 %v5181_v13, %v2849_v4  ;;  %v2850_v53 = vmax.f32 %v2822_v30, 0.0  ;;  %v2960_v10 = vadd.f32 %v4157_v8, %v4458_v40  ;;  %v2951_v58 = vpop.f32.mrb[111].mxu1  ;;  %v2965_v56 = vmax.f32 %v2957_v47, 0.0 }
 0xe7a   : > { %v5242_v19 = vmax.f32 %v5185_v9, %v2852_v21  ;;  %v2952_v16 = vadd.f32 %v2951_v58, %v4453_v35  ;;  %v2963_v27 = vmax.f32 %v2949_v15, 0.0 }
 0xe7b   : > { %v5246_v28 = vmax.f32 %v5189_v46, %v2850_v53  ;;  %v2966_v22 = vmax.f32 %v2960_v10, 0.0  ;;  %v4144_v60 = vpop.f32.mrb[100].mxu0  ;;  %v3646_v53 = vld [vmem:[%s4370_s12 + $0x3c] sm:$0xf] }
 0xe7c   : > { %v2964_v63 = vmax.f32 %v2952_v16, 0.0  ;;  %v2843_v13 = vadd.f32 %v4144_v60, %v4570_v25  ;;  %v2834_v29 = vpop.f32.mrb[101].mxu0 }
 0xe7d   : > { %v2968_v1 = vpack.c.bf16 %v2966_v22, %v2965_v56  ;;  %v2835_v5 = vadd.f32 %v2834_v29, %v4552_v55  ;;  %v4145_v26 = vpop.f32.mrb[102].mxu0 }
 0xe7e   : > { %v2967_v17 = vpack.c.bf16 %v2964_v63, %v2963_v27  ;;  %v2855_v9 = vmax.f32 %v2843_v13, 0.0  ;;  %v2846_v38 = vadd.f32 %v4145_v26, %v4580_v41  ;;  %v2837_v12 = vpop.f32.mrb[103].mxu0  ;;  %v3089_v14 = vpop.f32.mrb[112].mxu1 }
 0xe7f   : > { %v2853_v46 = vmax.f32 %v2835_v5, 0.0  ;;  %v2838_v11 = vadd.f32 %v2837_v12, %v4559_v7  ;;  %v3090_v42 = vadd.f32 %v3089_v14, %v4424_v20  ;;  %v4174_v6 = vpop.f32.mrb[113].mxu1 }
 0xe80   : > { %v5254_v43 = vmax.f32 %v5197_v23, %v2855_v9  ;;  %v2856_v54 = vmax.f32 %v2846_v38, 0.0  ;;  %4158 = vmatprep.subr.bf16.mxu0 %v2967_v17  ;;  %v3092_v32 = vpop.f32.mrb[114].mxu1 }
 0xe81   : > { %v5257_v61 = vmax.f32 %v5200_v45, %v2853_v46  ;;  %v2854_v4 = vmax.f32 %v2838_v11, 0.0  ;;  %v3093_v30 = vadd.f32 %v3092_v32, %v4427_v24  ;;  %4159 = vmatpush3.bf16.msra.mxu0 %v2967_v17  ;;  %v4175_v47 = vpop.f32.mrb[115].mxu1  ;;  %v3096_v23 = vmax.f32 %v3090_v42, 0.0 }
 0xe82   : > { %v5261_v37 = vmax.f32 %v5204_v2, %v2856_v54  ;;  %4160 = vmatprep.subr.bf16.mxu0 %v2968_v1  ;;  %v3238_v45 = vsel %vm335_vm1, %v3646_v53, 0 }
 0xe83   : > { %v5264_v21 = vmax.f32 %v5207_v57, %v2854_v4  ;;  %v3097_v15 = vmax.f32 %v3093_v30, 0.0 }
 0xe85   : > { %v3098_v8 = vpack.c.bf16 %v3097_v15, %v3096_v23  ;;  %4161 = vmatpush3.bf16.msra.mxu0 %v2968_v1 }
 0xe87   : > { %4176 = vmatprep.subr.bf16.mxu1 %v3098_v8 }
 0xe88   : > { %4163 = vmatmul.mubr.msk.bf16.vlgmr.msra.gmra.mrb[104].mxu0 %vm559_vm4, %v4903_v18  ;;  %4177 = vmatpush3.bf16.msra.mxu1 %v3098_v8 }
 0xe89   : > { %4166 = vmatprep.mubr.msk.bf16.mxu0 %vm559_vm4, %v4910_v44  ;;  %4194 = vmatprep.subr.bf16.mxu1 %v4292_v0 }
 0xe8b   : > { %4179 = vmatmul.mubr.msk.bf16.vlgmr.msra.gmra.mrb[116].mxu1 %vm421_vm3, %v4919_v52 }
 0xe8c   : > { %4195 = vmatpush3.bf16.msra.mxu1 %v3238_v45  ;;  %4196 = vmatprep.mubr.msk.bf16.mxu1 %vm4293_vm0, %v4292_v0 }
 0xe90   : > { %4167 = vmatmul.mubr.msk.bf16.gmra.mrb[108].mxu0 %vm559_vm4, %v4928_v3 }
 0xe91   : > { %4186 = vmatprep.mubr.msk.bf16.mxu0 %vm559_vm4, %v4935_v62 }
 0xe93   : > { %4197 = vmatmul.mubr.msk.bf16.vlgmr.msra.gmra.mrb[120].mxu1 %vm331_vm2, %v4850_v33 }
 0xe94   : > { %4202 = vmatprep.mubr.msk.bf16.mxu1 %vm421_vm3, %v4857_v31 }
 0xf5b   : > { %v4164_v2 = vpop.f32.mrb[104].mxu0 }
 0xf5c   : > { %v3012_v57 = vadd.f32 %v4164_v2, %v4546_v50  ;;  %v3003_v10 = vpop.f32.mrb[105].mxu0 }
 0xf5d   : > { %v3004_v58 = vadd.f32 %v3003_v10, %v4542_v48  ;;  %v4165_v16 = vpop.f32.mrb[106].mxu0 }
 0xf5e   : > { %v3036_v0 = vmax.f32 %v3012_v57, 0.0  ;;  %v3015_v56 = vadd.f32 %v4165_v16, %v4548_v51  ;;  %v3006_v22 = vpop.f32.mrb[107].mxu0  ;;  %v4180_v60 = vpop.f32.mrb[116].mxu1 }
 0xf5f   : > { %v3034_v27 = vmax.f32 %v3004_v58, 0.0  ;;  %v3007_v63 = vadd.f32 %v3006_v22, %v4544_v49  ;;  %v3142_v33 = vadd.f32 %v4180_v60, %v4455_v36  ;;  %v3133_v13 = vpop.f32.mrb[117].mxu1 }
 0xf60   : > { %v5291_v31 = vmax.f32 %v5234_v59, %v3036_v0  ;;  %v3037_v29 = vmax.f32 %v3015_v56, 0.0  ;;  %v3134_v1 = vadd.f32 %v3133_v13, %v4451_v34  ;;  %v4181_v5 = vpop.f32.mrb[118].mxu1 }
 0xf61   : > { %v5295_v26 = vmax.f32 %v5238_v39, %v3034_v27  ;;  %v3035_v17 = vmax.f32 %v3007_v63, 0.0  ;;  %v3145_v9 = vadd.f32 %v4181_v5, %v4458_v40  ;;  %v3136_v38 = vpop.f32.mrb[119].mxu1  ;;  %v3150_v59 = vmax.f32 %v3142_v33, 0.0 }
 0xf62   : > { %v5299_v12 = vmax.f32 %v5242_v19, %v3037_v29  ;;  %v3137_v14 = vadd.f32 %v3136_v38, %v4453_v35  ;;  %v3148_v6 = vmax.f32 %v3134_v1, 0.0 }
 0xf63   : > { %v5303_v46 = vmax.f32 %v5246_v28, %v3035_v17  ;;  %v3151_v11 = vmax.f32 %v3145_v9, 0.0  ;;  %v4168_v42 = vpop.f32.mrb[108].mxu0 }
 0xf64   : > { %v3149_v54 = vmax.f32 %v3137_v14, 0.0  ;;  %v3028_v39 = vadd.f32 %v4168_v42, %v4570_v25  ;;  %v3019_v32 = vpop.f32.mrb[109].mxu0 }
 0xf65   : > { %v3153_v4 = vpack.c.bf16 %v3151_v11, %v3150_v59  ;;  %v3020_v30 = vadd.f32 %v3019_v32, %v4552_v55  ;;  %v4169_v47 = vpop.f32.mrb[110].mxu0 }
 0xf66   : > { %v3152_v23 = vpack.c.bf16 %v3149_v54, %v3148_v6  ;;  %v3040_v19 = vmax.f32 %v3028_v39, 0.0  ;;  %v3031_v15 = vadd.f32 %v4169_v47, %v4580_v41  ;;  %v3022_v8 = vpop.f32.mrb[111].mxu0  ;;  %v3274_v53 = vpop.f32.mrb[120].mxu1 }
 0xf67   : > { %v3038_v28 = vmax.f32 %v3020_v30, 0.0  ;;  %v3023_v45 = vadd.f32 %v3022_v8, %v4559_v7  ;;  %v3275_v2 = vadd.f32 %v3274_v53, %v4424_v20  ;;  %v4198_v57 = vpop.f32.mrb[121].mxu1 }
 0xf68   : > { %v5311_v10 = vmax.f32 %v5254_v43, %v3040_v19  ;;  %v3041_v58 = vmax.f32 %v3031_v15, 0.0  ;;  %4182 = vmatprep.subr.bf16.mxu0 %v3152_v23  ;;  %v3277_v16 = vpop.f32.mrb[122].mxu1 }
 0xf69   : > { %v3046_v0 = vmax.f32 %v5257_v61, %v3038_v28  ;;  %v3039_v56 = vmax.f32 %v3023_v45, 0.0  ;;  %v3278_v22 = vadd.f32 %v3277_v16, %v4427_v24  ;;  %4183 = vmatpush3.bf16.msra.mxu0 %v3152_v23  ;;  %v4199_v60 = vpop.f32.mrb[123].mxu1  ;;  %v3281_v20 = vmax.f32 %v3275_v2, 0.0 }
 0xf6a   : > { %v3049_v27 = vmax.f32 %v5261_v37, %v3041_v58  ;;  %4184 = vmatprep.subr.bf16.mxu0 %v3153_v4 }
 0xf6b   : > { %v3047_v63 = vmax.f32 %v5264_v21, %v3039_v56  ;;  %v3282_v33 = vmax.f32 %v3278_v22, 0.0  ;;  %v4265_v56 = vld [vmem:[%s5393_s5 + $0x8] sm:$0xff]  }
 0xf6d   : > { %v3283_v13 = vpack.c.bf16 %v3282_v33, %v3281_v20  ;;  %4185 = vmatpush3.bf16.msra.mxu0 %v3153_v4 }
 0xf6f   : > { %4200 = vmatprep.subr.bf16.mxu1 %v3283_v13 }
 0xf70   : > { %4187 = vmatmul.mubr.msk.bf16.vlgmr.msra.gmra.mrb[112].mxu0 %vm559_vm4, %v4903_v18  ;;  %4201 = vmatpush3.bf16.msra.mxu1 %v3283_v13 }
 0xf71   : > { %4190 = vmatprep.mubr.msk.bf16.mxu0 %vm559_vm4, %v4910_v44 }
 0xf73   : > { %4203 = vmatmul.mubr.msk.bf16.vlgmr.msra.gmra.mrb[124].mxu1 %vm421_vm3, %v4919_v52 }
 0xf78   : > { %4191 = vmatmul.mubr.msk.bf16.gmra.mrb[116].mxu0 %vm559_vm4, %v4928_v3 }
 0xf79   : > { %4210 = vmatprep.mubr.msk.bf16.mxu0 %vm559_vm4, %v4935_v62 }
0x1043   : > { %v4188_v24 = vpop.f32.mrb[112].mxu0 }
0x1044   : > { %v3197_v43 = vadd.f32 %v4188_v24, %v4546_v50  ;;  %v3188_v61 = vpop.f32.mrb[113].mxu0 }
0x1045   : > { %v3189_v37 = vadd.f32 %v3188_v61, %v4542_v48  ;;  %v4189_v18 = vpop.f32.mrb[114].mxu0 }
0x1046   : > { %v3221_v21 = vmax.f32 %v3197_v43, 0.0  ;;  %v3200_v29 = vadd.f32 %v4189_v18, %v4548_v51  ;;  %v3191_v44 = vpop.f32.mrb[115].mxu0  ;;  %v4204_v1 = vpop.f32.mrb[124].mxu1 }
0x1047   : > { %v3219_v5 = vmax.f32 %v3189_v37, 0.0  ;;  %v3192_v52 = vadd.f32 %v3191_v44, %v4544_v49  ;;  %v3327_v3 = vadd.f32 %v4204_v1, %v4455_v36  ;;  %v3318_v17 = vpop.f32.mrb[125].mxu1 }
0x1048   : > { %v3229_v62 = vmax.f32 %v5291_v31, %v3221_v21  ;;  %v3222_v9 = vmax.f32 %v3200_v29, 0.0  ;;  %v3319_v38 = vadd.f32 %v3318_v17, %v4451_v34  ;;  %v4205_v14 = vpop.f32.mrb[126].mxu1 }
0x1049   : > { %v3227_v59 = vmax.f32 %v5295_v26, %v3219_v5  ;;  %v3220_v11 = vmax.f32 %v3192_v52, 0.0  ;;  %v3330_v42 = vadd.f32 %v4205_v14, %v4458_v40  ;;  %v3321_v6 = vpop.f32.mrb[127].mxu1  ;;  %v3335_v36 = vmax.f32 %v3327_v3, 0.0 }
0x104a   : > { %v3230_v54 = vmax.f32 %v5299_v12, %v3222_v9  ;;  %v3322_v39 = vadd.f32 %v3321_v6, %v4453_v35  ;;  %v3333_v31 = vmax.f32 %v3319_v38, 0.0 }
0x104b   : > { %v3228_v32 = vmax.f32 %v5303_v46, %v3220_v11  ;;  %v3336_v4 = vmax.f32 %v3330_v42, 0.0  ;;  %v4192_v30 = vpop.f32.mrb[116].mxu0 }
0x104c   : > { %v3334_v47 = vmax.f32 %v3322_v39, 0.0  ;;  %v3213_v34 = vadd.f32 %v4192_v30, %v4570_v25  ;;  %v3204_v23 = vpop.f32.mrb[117].mxu0 }
0x104d   : > { %v3338_v19 = vpack.c.bf16 %v3336_v4, %v3335_v36  ;;  %v3205_v26 = vadd.f32 %v3204_v23, %v4552_v55  ;;  %v4193_v15 = vpop.f32.mrb[118].mxu0 }
0x104e   : > { %v3337_v40 = vpack.c.bf16 %v3334_v47, %v3333_v31  ;;  %v3225_v8 = vmax.f32 %v3213_v34, 0.0  ;;  %v3216_v12 = vadd.f32 %v4193_v15, %v4580_v41  ;;  %v3207_v53 = vpop.f32.mrb[119].mxu0 }
0x104f   : > { %v3223_v35 = vmax.f32 %v3205_v26, 0.0  ;;  %v3208_v46 = vadd.f32 %v3207_v53, %v4559_v7 }
0x1050   : > { %v3233_v28 = vmax.f32 %v5311_v10, %v3225_v8  ;;  %v3226_v45 = vmax.f32 %v3216_v12, 0.0  ;;  %4206 = vmatprep.subr.bf16.mxu0 %v3337_v40  ;;  %v4266_v10 = vld [vmem:[%s5393_s5 + $0x10] sm:$0xff]  }
0x1051   : > { %v3231_v2 = vmax.f32 %v3046_v0, %v3223_v35  ;;  %v3224_v57 = vmax.f32 %v3208_v46, 0.0  ;;  %4207 = vmatpush3.bf16.msra.mxu0 %v3337_v40  ;;  %v4267_v0 = vld [vmem:[%s5393_s5 + $0x18] sm:$0xff]  }
0x1052   : > { %v3234_v58 = vmax.f32 %v3049_v27, %v3226_v45  ;;  %4208 = vmatprep.subr.bf16.mxu0 %v3338_v19 }
0x1053   : > { %v3232_v16 = vmax.f32 %v3047_v63, %v3224_v57 }
0x1055   : > { %4209 = vmatpush3.bf16.msra.mxu0 %v3338_v19 }
0x1058   : > { %4211 = vmatmul.mubr.msk.bf16.vlgmr.msra.gmra.mrb[120].mxu0 %vm559_vm4, %v4265_v56 }
0x1059   : > { %4214 = vmatprep.mubr.msk.bf16.mxu0 %vm559_vm4, %v4266_v10 }
0x1060   : > { %4215 = vmatmul.mubr.msk.bf16.gmra.mrb[124].mxu0 %vm559_vm4, %v4267_v0 }
0x112b   : > { %v4212_v22 = vpop.f32.mrb[120].mxu0 }
0x112c   : > { %v3382_v60 = vadd.f32 %v4212_v22, %v4546_v50  ;;  %v3373_v27 = vpop.f32.mrb[121].mxu0 }
0x112d   : > { %v3374_v63 = vadd.f32 %v3373_v27, %v4542_v48  ;;  %v4213_v20 = vpop.f32.mrb[122].mxu0 }
0x112e   : > { %v3406_v33 = vmax.f32 %v3382_v60, 0.0  ;;  %v3385_v13 = vadd.f32 %v4213_v20, %v4548_v51  ;;  %v3376_v24 = vpop.f32.mrb[123].mxu0 }
0x112f   : > { %v3404_v43 = vmax.f32 %v3374_v63, 0.0  ;;  %v3377_v50 = vadd.f32 %v3376_v24, %v4544_v49 }
0x1130   : > { %v3414_v61 = vmax.f32 %v3229_v62, %v3406_v33  ;;  %v3407_v48 = vmax.f32 %v3385_v13, 0.0 }
0x1131   : > { %v3412_v37 = vmax.f32 %v3227_v59, %v3404_v43  ;;  %v3405_v18 = vmax.f32 %v3377_v50, 0.0 }
0x1132   : > { %3422 = vst [vmem:[%s5364_s21 + $0x10] sm:$0xff] %v3414_v61  ;;  %v3415_v51 = vmax.f32 %v3230_v54, %v3407_v48 }
0x1133   : > { %3420 = vst [vmem:[%s5364_s21] sm:$0xff] %v3412_v37  ;;  %v3413_v21 = vmax.f32 %v3228_v32, %v3405_v18  ;;  %v4216_v29 = vpop.f32.mrb[124].mxu0 }
0x1134   : > { %3423 = vst [vmem:[%s5364_s21 + $0x18] sm:$0xff] %v3415_v51  ;;  %v3398_v44 = vadd.f32 %v4216_v29, %v4570_v25  ;;  %v3389_v1 = vpop.f32.mrb[125].mxu0 }
0x1135   : > { %3421 = vst [vmem:[%s5364_s21 + $0x8] sm:$0xff] %v3413_v21  ;;  %v3390_v5 = vadd.f32 %v3389_v1, %v4552_v55  ;;  %v4217_v49 = vpop.f32.mrb[126].mxu0 }
0x1136   : > { %v3410_v52 = vmax.f32 %v3398_v44, 0.0  ;;  %v3401_v3 = vadd.f32 %v4217_v49, %v4580_v41  ;;  %v3392_v17 = vpop.f32.mrb[127].mxu0 }
0x1137   : > { %v3408_v62 = vmax.f32 %v3390_v5, 0.0  ;;  %v3393_v9 = vadd.f32 %v3392_v17, %v4559_v7 }
0x1138   : > { %v3418_v38 = vmax.f32 %v3233_v28, %v3410_v52  ;;  %v3411_v14 = vmax.f32 %v3401_v3, 0.0 }
0x1139   : > { %v3416_v59 = vmax.f32 %v3231_v2, %v3408_v62  ;;  %v3409_v11 = vmax.f32 %v3393_v9, 0.0 }
0x113a   : > { %3426 = vst [vmem:[%s5364_s21 + $0x30] sm:$0xff] %v3418_v38  ;;  %v3419_v25 = vmax.f32 %v3234_v58, %v3411_v14 }
0x113b   : > { %3424 = vst [vmem:[%s5364_s21 + $0x20] sm:$0xff] %v3416_v59  ;;  %v3417_v42 = vmax.f32 %v3232_v16, %v3409_v11 }
0x113c   : > { %3427 = vst [vmem:[%s5364_s21 + $0x38] sm:$0xff] %v3419_v25 }
0x113d   : > { %3425 = vst [vmem:[%s5364_s21 + $0x28] sm:$0xff] %v3417_v42 }
0x113e PF: > { %s17_s26 = sadd.s32 1, %s4290_s26   ;;  %s5396_s24 = smov %s4286_s25 }
0x113f   : > { %p14_p5 = scmp.ge.s32.totalorder %s17_s26, 4   ;;  %s5397_s25 = smov %s5399_s27 }
0x1141   :  { %16 = sbr.rel (!%p14_p5) target bundleno = 2 (0x2), region = 93 }

// kernel: _lambda_.4
= control target key start
LH: loop header
LB: loop body
LE: loop exit
PB: predicated region body
PF: predicated region fallthrough
CT: control target
= control target key end

     0   :  { %s1528_s18 = smov 0   ;;  %s1530_s19 = smov 0   ;;  %s1741_s0 = inlined_call_operand.vmem [shape: bf16[2,8,8,128], index: 0, kind: input, shape index: {}]   ;;  %s1742_s1 = inlined_call_operand.vmem [shape: bf16[16,8], index: 1, kind: input, shape index: {}]   ;;  %s1743_s2 = inlined_call_operand.vmem [shape: f32[16,1], index: 2, kind: input, shape index: {}]   ;;  %s1744_s3 = inlined_call_operand.vmem [shape: bf16[32,16], index: 3, kind: input, shape index: {}]   ;;  %s1745_s4 = inlined_call_operand.vmem [shape: f32[32,1], index: 4, kind: input, shape index: {}]   ;;  %s1746_s5 = inlined_call_operand.vmem [shape: f32[2,32,128], index: 5, kind: output, shape index: {}]  }
   0x1   :  { %s1532_s20 = smov 0  }
   0x2 LB: > { %s27_s21 = sadd.s32 1, %s1489_s19  ;;  %p1260_p0 = scmp.ge.s32.totalorder %s1493_s20, 1  ;;  %s1493_s20 = sphi %s1532_s20, %s15_s20   ;;  %s1489_s19 = sphi %s1530_s19, %s1748_s19   ;;  %s1485_s18 = sphi %s1528_s18, %s1747_s18  }
   0x3   : > { %p29_p1 = scmp.ge.s32.totalorder %s27_s21, 2  ;;  %p206_p2 = scmp.lt.s32.totalorder %s1493_s20, 3 }
   0x5   : > { %s1750_s21 = smov (%p29_p1, %s27_s21), 0  ;;  %p207_p3 = pnand %p1260_p0, %p206_p2 }
   0x6   : > { %p240_p4 = scmp.lt.s32.totalorder (!%p207_p3), %s1485_s18, 1  ;;  %v1495_v0 = vmov (!%p207_p3), 0.0   ;;  %vm1496_vm0 = vmmov (!%p207_p3), 0   ;;  %v260_v1 = vld [vmem:[%s1743_s2] sm:$0xff] (!%p207_p3)  ;;  %v1497_v2 = vmov (!%p207_p3), 0   ;;  %vm281_vm1 = vcmask (!%p207_p3), 1043456  }
   0x7   : > { %210 = sbr.rel (%p207_p3) target bundleno = 524 (0x20c), region = 40  ;;  %1343 = vmatprep.subr.bf16.mxu0 (!%p207_p3), %v1495_v0  ;;  %1345 = vmatprep.mubr.msk.bf16.mxu0 (!%p207_p3), %vm1496_vm0, %v1495_v0  ;;  %v261_v3 = vld [vmem:[%s1743_s2 + $0x8] sm:$0xff] (!%p207_p3)  ;;  %v1468_v7 = vld [vmem:[%s1742_s1] sm:$0xff] (!%p207_p3)   ;;  %vm277_vm2 = vcmask (!%p207_p3), 64512   ;;  %v335_v8 = vld [vmem:[%s1745_s4 + $0x10] sm:$0xff] (!%p207_p3)  ;;  %vm367_vm3 = vcmask (!%p207_p3), 130048  }
   0x8   : > { %1466 = vset.pattern.permute.xlu0 (!%p207_p3), %v1497_v2  ;;  %1467 = vset.pattern.permute.xlu1 (!%p207_p3), %v1497_v2  ;;  %v1619_v22 = vld [vmem:[%s1744_s3] sm:$0xff] (!%p207_p3)   ;;  %v334_v24 = vld [vmem:[%s1745_s4 + $0x8] sm:$0xff] (!%p207_p3)  ;;  %v336_v25 = vld [vmem:[%s1745_s4 + $0x18] sm:$0xff] (!%p207_p3) }
   0x9   : > { %264 = vperm.xlu0 (!%p207_p3), %1466, %v260_v1   ;;  %1351 = vmatprep.mubr.msk.bf16.mxu1 (!%p207_p3), %vm367_vm3, %v1619_v22  ;;  %v333_v23 = vld [vmem:[%s1745_s4] sm:$0xff] (!%p207_p3)  ;;  %v1642_v40 = vld [vmem:[%s1744_s3 + $0x8] sm:$0xff] (!%p207_p3)  }
   0xa   : > { %339 = vperm.xlu1 (!%p207_p3), %1467, %v333_v23  }
   0xd   : > { %269 = vperm.xlu0 (!%p207_p3), %1466, %v261_v3  }
   0xe   : > { %s1752_s18 = smov (!%p240_p4, %s1485_s18), 1  ;;  %344 = vperm.xlu1 %1467, %v334_v24  }
   0xf   : > { %s1301_s24 = sshll.u32 %s1752_s18, 5 }
  0x10   : > { %s1563_s29 = scalar_lea.vmem %s1741_s0, %s1301_s24  ;;  %s255_s26 = scalar_lea.vmem %s1746_s5, %s1301_s24 }
  0x11   : > { %v257_v4 = vld [vmem:[%s1563_s29] sm:$0xf]  ;;  %v1271_v5 = vld [vmem:[%s1563_s29 + $0x4] sm:$0xf]  ;;  %349 = vperm.xlu0 %1466, %v335_v8   ;;  %v1275_v10 = vld [vmem:[%s1563_s29 + $0x8] sm:$0xf] }
  0x12   : > { %v283_v6 = vsel %vm281_vm1, %v257_v4, 0  ;;  %v430_v9 = vsel %vm281_vm1, %v1271_v5, 0  ;;  %v536_v11 = vsel %vm281_vm1, %v1275_v10, 0  ;;  %v1279_v12 = vld [vmem:[%s1563_s29 + $0xc] sm:$0xf]  ;;  %354 = vperm.xlu1 %1467, %v336_v25  }
  0x13   : > { %1344 = vmatpush3.bf16.msra.mxu0 %v283_v6  ;;  %v642_v13 = vsel %vm281_vm1, %v1279_v12, 0  ;;  %v1283_v14 = vld [vmem:[%s1563_s29 + $0x10] sm:$0xf]  ;;  %v1287_v16 = vld [vmem:[%s1563_s29 + $0x14] sm:$0xf] }
  0x14   : > { %1355 = vmatprep.subr.bf16.mxu0 %v1495_v0  ;;  %v748_v15 = vsel %vm281_vm1, %v1283_v14, 0  ;;  %v854_v17 = vsel %vm281_vm1, %v1287_v16, 0  ;;  %v1291_v18 = vld [vmem:[%s1563_s29 + $0x18] sm:$0xf]  ;;  %v1295_v20 = vld [vmem:[%s1563_s29 + $0x1c] sm:$0xf] }
  0x15   : > { %v960_v19 = vsel %vm281_vm1, %v1291_v18, 0  ;;  %v1066_v21 = vsel %vm281_vm1, %v1295_v20, 0 }
  0x16   : > { %1346 = vmatmul.mubr.msk.bf16.vlgmr.msra.gmra.mrb[0].mxu0 %vm277_vm2, %v1468_v7 }
  0x17   : > { %1356 = vmatpush3.bf16.msra.mxu0 %v430_v9  ;;  %1357 = vmatprep.mubr.msk.bf16.mxu0 %vm1496_vm0, %v1495_v0 }
  0x18   : > { %1367 = vmatprep.subr.bf16.mxu0 %v1495_v0 }
  0x1e   : > { %1358 = vmatmul.mubr.msk.bf16.vlgmr.msra.gmra.mrb[4].mxu0 %vm277_vm2, %v1468_v7 }
  0x1f   : > { %1368 = vmatpush3.bf16.msra.mxu0 %v536_v11  ;;  %1369 = vmatprep.mubr.msk.bf16.mxu0 %vm1496_vm0, %v1495_v0 }
  0x20   : > { %1379 = vmatprep.subr.bf16.mxu0 %v1495_v0 }
  0x26   : > { %1370 = vmatmul.mubr.msk.bf16.vlgmr.msra.gmra.mrb[8].mxu0 %vm277_vm2, %v1468_v7 }
  0x27   : > { %1380 = vmatpush3.bf16.msra.mxu0 %v642_v13  ;;  %1381 = vmatprep.mubr.msk.bf16.mxu0 %vm1496_vm0, %v1495_v0 }
  0x28   : > { %1391 = vmatprep.subr.bf16.mxu0 %v1495_v0 }
  0x2e   : > { %1382 = vmatmul.mubr.msk.bf16.vlgmr.msra.gmra.mrb[12].mxu0 %vm277_vm2, %v1468_v7 }
  0x2f   : > { %1392 = vmatpush3.bf16.msra.mxu0 %v748_v15  ;;  %1393 = vmatprep.mubr.msk.bf16.mxu0 %vm1496_vm0, %v1495_v0 }
  0x30   : > { %1403 = vmatprep.subr.bf16.mxu0 %v1495_v0 }
  0x36   : > { %1394 = vmatmul.mubr.msk.bf16.vlgmr.msra.gmra.mrb[16].mxu0 %vm277_vm2, %v1468_v7 }
  0x37   : > { %1404 = vmatpush3.bf16.msra.mxu0 %v854_v17  ;;  %1405 = vmatprep.mubr.msk.bf16.mxu0 %vm1496_vm0, %v1495_v0 }
  0x38   : > { %1415 = vmatprep.subr.bf16.mxu0 %v1495_v0 }
  0x3e   : > { %1406 = vmatmul.mubr.msk.bf16.vlgmr.msra.gmra.mrb[20].mxu0 %vm277_vm2, %v1468_v7 }
  0x3f   : > { %1416 = vmatpush3.bf16.msra.mxu0 %v960_v19  ;;  %1417 = vmatprep.mubr.msk.bf16.mxu0 %vm1496_vm0, %v1495_v0 }
  0x40   : > { %1427 = vmatprep.subr.bf16.mxu0 %v1495_v0 }
  0x46   : > { %1418 = vmatmul.mubr.msk.bf16.vlgmr.msra.gmra.mrb[24].mxu0 %vm277_vm2, %v1468_v7 }
  0x47   : > { %1428 = vmatpush3.bf16.msra.mxu0 %v1066_v21  ;;  %1429 = vmatprep.mubr.msk.bf16.mxu0 %vm1496_vm0, %v1495_v0 }
  0x4e   : > { %1430 = vmatmul.mubr.msk.bf16.vlgmr.msra.gmra.mrb[28].mxu0 %vm277_vm2, %v1468_v7 }
  0x88   : > { %v1632_v26 = vpop.permute.xlu0 %264 }
  0x8c   : > { %v1635_v30 = vpop.permute.xlu0 %269 }
  0xe9   : > { %v319_v27 = vpop.f32.mrb[0].mxu0 }
  0xea   : > { %v320_v28 = vadd.f32 %v319_v27, %v1632_v26  ;;  %v1347_v29 = vpop.f32.mrb[1].mxu0 }
  0xeb   : > { %v322_v31 = vpop.f32.mrb[2].mxu0 }
  0xec   : > { %v323_v32 = vadd.f32 %v322_v31, %v1635_v30  ;;  %v1348_v33 = vpop.f32.mrb[3].mxu0  ;;  %v326_v34 = vmax.f32 %v320_v28, 0.0 }
  0xee   : > { %v327_v35 = vmax.f32 %v323_v32, 0.0 }
  0xf0   : > { %v328_v36 = vpack.c.bf16 %v327_v35, %v326_v34 }
  0xf1   : > { %v466_v37 = vpop.f32.mrb[4].mxu0 }
  0xf2   : > { %v467_v38 = vadd.f32 %v466_v37, %v1632_v26  ;;  %1349 = vmatprep.subr.bf16.mxu1 %v328_v36  ;;  %v1359_v39 = vpop.f32.mrb[5].mxu0 }
  0xf3   : > { %1350 = vmatpush3.bf16.msra.mxu1 %v328_v36  ;;  %v469_v41 = vpop.f32.mrb[6].mxu0 }
  0xf4   : > { %v470_v42 = vadd.f32 %v469_v41, %v1635_v30  ;;  %v1360_v43 = vpop.f32.mrb[7].mxu0  ;;  %v473_v44 = vmax.f32 %v467_v38, 0.0 }
  0xf6   : > { %v474_v45 = vmax.f32 %v470_v42, 0.0  ;;  %1352 = vmatmul.mubr.msk.bf16.vlgmr.msra.gmra.mrb[0].mxu1 %vm367_vm3, %v1642_v40 }
  0xf7   : > { %1363 = vmatprep.mubr.msk.bf16.mxu1 %vm367_vm3, %v1619_v22 }
  0xf8   : > { %v475_v46 = vpack.c.bf16 %v474_v45, %v473_v44  ;;  %v1691_v45 = vpop.permute.xlu0 %349 }
  0xf9   : > { %v572_v47 = vpop.f32.mrb[8].mxu0 }
  0xfa   : > { %v573_v48 = vadd.f32 %v572_v47, %v1632_v26  ;;  %1361 = vmatprep.subr.bf16.mxu1 %v475_v46  ;;  %v1371_v49 = vpop.f32.mrb[9].mxu0 }
  0xfb   : > { %1362 = vmatpush3.bf16.msra.mxu1 %v475_v46  ;;  %v575_v50 = vpop.f32.mrb[10].mxu0 }
  0xfc   : > { %v576_v51 = vadd.f32 %v575_v50, %v1635_v30  ;;  %v1372_v52 = vpop.f32.mrb[11].mxu0  ;;  %v579_v53 = vmax.f32 %v573_v48, 0.0 }
  0xfe   : > { %v580_v54 = vmax.f32 %v576_v51, 0.0  ;;  %1364 = vmatmul.mubr.msk.bf16.vlgmr.msra.gmra.mrb[4].mxu1 %vm367_vm3, %v1642_v40 }
  0xff   : > { %1375 = vmatprep.mubr.msk.bf16.mxu1 %vm367_vm3, %v1619_v22 }
 0x100   : > { %v581_v55 = vpack.c.bf16 %v580_v54, %v579_v53 }
 0x101   : > { %v678_v56 = vpop.f32.mrb[12].mxu0 }
 0x102   : > { %v679_v57 = vadd.f32 %v678_v56, %v1632_v26  ;;  %1373 = vmatprep.subr.bf16.mxu1 %v581_v55  ;;  %v1383_v58 = vpop.f32.mrb[13].mxu0 }
 0x103   : > { %1374 = vmatpush3.bf16.msra.mxu1 %v581_v55  ;;  %v681_v59 = vpop.f32.mrb[14].mxu0 }
 0x104   : > { %v682_v60 = vadd.f32 %v681_v59, %v1635_v30  ;;  %v1384_v61 = vpop.f32.mrb[15].mxu0  ;;  %v685_v62 = vmax.f32 %v679_v57, 0.0 }
 0x106   : > { %v686_v63 = vmax.f32 %v682_v60, 0.0  ;;  %1376 = vmatmul.mubr.msk.bf16.vlgmr.msra.gmra.mrb[8].mxu1 %vm367_vm3, %v1642_v40 }
 0x107   : > { %1387 = vmatprep.mubr.msk.bf16.mxu1 %vm367_vm3, %v1619_v22 }
 0x108   : > { %v687_v0 = vpack.c.bf16 %v686_v63, %v685_v62 }
 0x109   : > { %v784_v1 = vpop.f32.mrb[16].mxu0 }
 0x10a   : > { %v785_v2 = vadd.f32 %v784_v1, %v1632_v26  ;;  %1385 = vmatprep.subr.bf16.mxu1 %v687_v0  ;;  %v1395_v3 = vpop.f32.mrb[17].mxu0 }
 0x10b   : > { %1386 = vmatpush3.bf16.msra.mxu1 %v687_v0  ;;  %v787_v4 = vpop.f32.mrb[18].mxu0 }
 0x10c   : > { %v788_v5 = vadd.f32 %v787_v4, %v1635_v30  ;;  %v1396_v6 = vpop.f32.mrb[19].mxu0  ;;  %v791_v7 = vmax.f32 %v785_v2, 0.0 }
 0x10e   : > { %v792_v8 = vmax.f32 %v788_v5, 0.0  ;;  %1388 = vmatmul.mubr.msk.bf16.vlgmr.msra.gmra.mrb[12].mxu1 %vm367_vm3, %v1642_v40 }
 0x10f   : > { %1399 = vmatprep.mubr.msk.bf16.mxu1 %vm367_vm3, %v1619_v22 }
 0x110   : > { %v793_v9 = vpack.c.bf16 %v792_v8, %v791_v7 }
 0x111   : > { %v890_v10 = vpop.f32.mrb[20].mxu0 }
 0x112   : > { %v891_v11 = vadd.f32 %v890_v10, %v1632_v26  ;;  %1397 = vmatprep.subr.bf16.mxu1 %v793_v9  ;;  %v1407_v12 = vpop.f32.mrb[21].mxu0 }
 0x113   : > { %1398 = vmatpush3.bf16.msra.mxu1 %v793_v9  ;;  %v893_v13 = vpop.f32.mrb[22].mxu0 }
 0x114   : > { %v894_v14 = vadd.f32 %v893_v13, %v1635_v30  ;;  %v1408_v15 = vpop.f32.mrb[23].mxu0  ;;  %v897_v16 = vmax.f32 %v891_v11, 0.0 }
 0x116   : > { %v898_v17 = vmax.f32 %v894_v14, 0.0  ;;  %1400 = vmatmul.mubr.msk.bf16.vlgmr.msra.gmra.mrb[16].mxu1 %vm367_vm3, %v1642_v40 }
 0x117   : > { %1411 = vmatprep.mubr.msk.bf16.mxu1 %vm367_vm3, %v1619_v22 }
 0x118   : > { %v899_v18 = vpack.c.bf16 %v898_v17, %v897_v16 }
 0x119   : > { %v996_v19 = vpop.f32.mrb[24].mxu0 }
 0x11a   : > { %v997_v20 = vadd.f32 %v996_v19, %v1632_v26  ;;  %1409 = vmatprep.subr.bf16.mxu1 %v899_v18  ;;  %v1419_v21 = vpop.f32.mrb[25].mxu0 }
 0x11b   : > { %1410 = vmatpush3.bf16.msra.mxu1 %v899_v18  ;;  %v999_v23 = vpop.f32.mrb[26].mxu0 }
 0x11c   : > { %v1000_v24 = vadd.f32 %v999_v23, %v1635_v30  ;;  %v1420_v25 = vpop.f32.mrb[27].mxu0  ;;  %v1003_v27 = vmax.f32 %v997_v20, 0.0 }
 0x11e   : > { %v1004_v28 = vmax.f32 %v1000_v24, 0.0  ;;  %1412 = vmatmul.mubr.msk.bf16.vlgmr.msra.gmra.mrb[20].mxu1 %vm367_vm3, %v1642_v40 }
 0x11f   : > { %1423 = vmatprep.mubr.msk.bf16.mxu1 %vm367_vm3, %v1619_v22 }
 0x120   : > { %v1005_v29 = vpack.c.bf16 %v1004_v28, %v1003_v27 }
 0x121   : > { %v1102_v31 = vpop.f32.mrb[28].mxu0 }
 0x122   : > { %v1103_v32 = vadd.f32 %v1102_v31, %v1632_v26  ;;  %1421 = vmatprep.subr.bf16.mxu1 %v1005_v29  ;;  %v1431_v33 = vpop.f32.mrb[29].mxu0  ;;  %v1687_v26 = vpop.permute.xlu1 %339 }
 0x123   : > { %1422 = vmatpush3.bf16.msra.mxu1 %v1005_v29  ;;  %v1105_v34 = vpop.f32.mrb[30].mxu0 }
 0x124   : > { %v1106_v35 = vadd.f32 %v1105_v34, %v1635_v30  ;;  %v1432_v36 = vpop.f32.mrb[31].mxu0  ;;  %v1109_v37 = vmax.f32 %v1103_v32, 0.0 }
 0x126   : > { %v1110_v38 = vmax.f32 %v1106_v35, 0.0  ;;  %1424 = vmatmul.mubr.msk.bf16.vlgmr.msra.gmra.mrb[24].mxu1 %vm367_vm3, %v1642_v40  ;;  %v1689_v42 = vpop.permute.xlu1 %344 }
 0x127   : > { %1435 = vmatprep.mubr.msk.bf16.mxu1 %vm367_vm3, %v1619_v22 }
 0x128   : > { %v1111_v39 = vpack.c.bf16 %v1110_v38, %v1109_v37 }
 0x12a   : > { %1433 = vmatprep.subr.bf16.mxu1 %v1111_v39  ;;  %v1693_v46 = vpop.permute.xlu1 %354 }
 0x12b   : > { %1434 = vmatpush3.bf16.msra.mxu1 %v1111_v39 }
 0x12e   : > { %1436 = vmatmul.mubr.msk.bf16.vlgmr.msra.gmra.mrb[28].mxu1 %vm367_vm3, %v1642_v40 }
 0x1c9   : > { %v1353_v41 = vpop.f32.mrb[0].mxu1 }
 0x1ca   : > { %v408_v30 = vpop.f32.mrb[1].mxu1  ;;  %v417_v22 = vadd.f32 %v1353_v41, %v1691_v45 }
 0x1cb   : > { %v1354_v43 = vpop.f32.mrb[2].mxu1  ;;  %v409_v47 = vadd.f32 %v408_v30, %v1687_v26 }
 0x1cc   : > { %v411_v44 = vpop.f32.mrb[3].mxu1  ;;  %v420_v50 = vadd.f32 %v1354_v43, %v1693_v46  ;;  %v425_v54 = vmax.f32 %v417_v22, 0.0 }
 0x1cd   : > { %v412_v51 = vadd.f32 %v411_v44, %v1689_v42  ;;  %v423_v58 = vmax.f32 %v409_v47, 0.0 }
 0x1ce   : > { %v426_v62 = vmax.f32 %v420_v50, 0.0 }
 0x1cf   : > { %v424_v0 = vmax.f32 %v412_v51, 0.0 }
 0x1d1   : > { %v1365_v48 = vpop.f32.mrb[4].mxu1 }
 0x1d2   : > { %v519_v49 = vadd.f32 %v1365_v48, %v1691_v45  ;;  %v510_v40 = vpop.f32.mrb[5].mxu1 }
 0x1d3   : > { %v511_v52 = vadd.f32 %v510_v40, %v1687_v26  ;;  %v1366_v53 = vpop.f32.mrb[6].mxu1 }
 0x1d4   : > { %v527_v55 = vmax.f32 %v519_v49, 0.0  ;;  %v522_v56 = vadd.f32 %v1366_v53, %v1693_v46  ;;  %v513_v57 = vpop.f32.mrb[7].mxu1 }
 0x1d5   : > { %v525_v59 = vmax.f32 %v511_v52, 0.0  ;;  %v514_v60 = vadd.f32 %v513_v57, %v1689_v42 }
 0x1d6   : > { %v531_v61 = vmax.f32 %v425_v54, %v527_v55  ;;  %v528_v63 = vmax.f32 %v522_v56, 0.0 }
 0x1d7   : > { %v529_v1 = vmax.f32 %v423_v58, %v525_v59  ;;  %v526_v2 = vmax.f32 %v514_v60, 0.0 }
 0x1d8   : > { %v532_v3 = vmax.f32 %v426_v62, %v528_v63 }
 0x1d9   : > { %v530_v4 = vmax.f32 %v424_v0, %v526_v2  ;;  %v1377_v5 = vpop.f32.mrb[8].mxu1 }
 0x1da   : > { %v625_v6 = vadd.f32 %v1377_v5, %v1691_v45  ;;  %v616_v7 = vpop.f32.mrb[9].mxu1 }
 0x1db   : > { %v617_v8 = vadd.f32 %v616_v7, %v1687_v26  ;;  %v1378_v9 = vpop.f32.mrb[10].mxu1 }
 0x1dc   : > { %v633_v10 = vmax.f32 %v625_v6, 0.0  ;;  %v628_v11 = vadd.f32 %v1378_v9, %v1693_v46  ;;  %v619_v12 = vpop.f32.mrb[11].mxu1 }
 0x1dd   : > { %v631_v13 = vmax.f32 %v617_v8, 0.0  ;;  %v620_v14 = vadd.f32 %v619_v12, %v1689_v42 }
 0x1de   : > { %v637_v15 = vmax.f32 %v531_v61, %v633_v10  ;;  %v634_v16 = vmax.f32 %v628_v11, 0.0 }
 0x1df   : > { %v635_v17 = vmax.f32 %v529_v1, %v631_v13  ;;  %v632_v18 = vmax.f32 %v620_v14, 0.0 }
 0x1e0   : > { %v638_v19 = vmax.f32 %v532_v3, %v634_v16 }
 0x1e1   : > { %v636_v20 = vmax.f32 %v530_v4, %v632_v18  ;;  %v1389_v21 = vpop.f32.mrb[12].mxu1 }
 0x1e2   : > { %v731_v23 = vadd.f32 %v1389_v21, %v1691_v45  ;;  %v722_v24 = vpop.f32.mrb[13].mxu1 }
 0x1e3   : > { %v723_v25 = vadd.f32 %v722_v24, %v1687_v26  ;;  %v1390_v27 = vpop.f32.mrb[14].mxu1 }
 0x1e4   : > { %v739_v28 = vmax.f32 %v731_v23, 0.0  ;;  %v734_v29 = vadd.f32 %v1390_v27, %v1693_v46  ;;  %v725_v31 = vpop.f32.mrb[15].mxu1 }
 0x1e5   : > { %v737_v32 = vmax.f32 %v723_v25, 0.0  ;;  %v726_v33 = vadd.f32 %v725_v31, %v1689_v42 }
 0x1e6   : > { %v743_v34 = vmax.f32 %v637_v15, %v739_v28  ;;  %v740_v35 = vmax.f32 %v734_v29, 0.0 }
 0x1e7   : > { %v741_v36 = vmax.f32 %v635_v17, %v737_v32  ;;  %v738_v37 = vmax.f32 %v726_v33, 0.0 }
 0x1e8   : > { %v744_v38 = vmax.f32 %v638_v19, %v740_v35 }
 0x1e9   : > { %v742_v39 = vmax.f32 %v636_v20, %v738_v37  ;;  %v1401_v41 = vpop.f32.mrb[16].mxu1 }
 0x1ea   : > { %v837_v30 = vadd.f32 %v1401_v41, %v1691_v45  ;;  %v828_v43 = vpop.f32.mrb[17].mxu1 }
 0x1eb   : > { %v829_v44 = vadd.f32 %v828_v43, %v1687_v26  ;;  %v1402_v22 = vpop.f32.mrb[18].mxu1 }
 0x1ec   : > { %v845_v47 = vmax.f32 %v837_v30, 0.0  ;;  %v840_v48 = vadd.f32 %v1402_v22, %v1693_v46  ;;  %v831_v49 = vpop.f32.mrb[19].mxu1 }
 0x1ed   : > { %v843_v40 = vmax.f32 %v829_v44, 0.0  ;;  %v832_v50 = vadd.f32 %v831_v49, %v1689_v42 }
 0x1ee   : > { %v849_v51 = vmax.f32 %v743_v34, %v845_v47  ;;  %v846_v52 = vmax.f32 %v840_v48, 0.0 }
 0x1ef   : > { %v847_v53 = vmax.f32 %v741_v36, %v843_v40  ;;  %v844_v54 = vmax.f32 %v832_v50, 0.0 }
 0x1f0   : > { %v850_v55 = vmax.f32 %v744_v38, %v846_v52 }
 0x1f1   : > { %v848_v56 = vmax.f32 %v742_v39, %v844_v54  ;;  %v1413_v57 = vpop.f32.mrb[20].mxu1 }
 0x1f2   : > { %v943_v58 = vadd.f32 %v1413_v57, %v1691_v45  ;;  %v934_v59 = vpop.f32.mrb[21].mxu1 }
 0x1f3   : > { %v935_v60 = vadd.f32 %v934_v59, %v1687_v26  ;;  %v1414_v61 = vpop.f32.mrb[22].mxu1 }
 0x1f4   : > { %v951_v62 = vmax.f32 %v943_v58, 0.0  ;;  %v946_v63 = vadd.f32 %v1414_v61, %v1693_v46  ;;  %v937_v0 = vpop.f32.mrb[23].mxu1 }
 0x1f5   : > { %v949_v1 = vmax.f32 %v935_v60, 0.0  ;;  %v938_v2 = vadd.f32 %v937_v0, %v1689_v42 }
 0x1f6   : > { %v955_v3 = vmax.f32 %v849_v51, %v951_v62  ;;  %v952_v4 = vmax.f32 %v946_v63, 0.0 }
 0x1f7   : > { %v953_v5 = vmax.f32 %v847_v53, %v949_v1  ;;  %v950_v6 = vmax.f32 %v938_v2, 0.0 }
 0x1f8   : > { %v956_v7 = vmax.f32 %v850_v55, %v952_v4 }
 0x1f9   : > { %v954_v8 = vmax.f32 %v848_v56, %v950_v6  ;;  %v1425_v9 = vpop.f32.mrb[24].mxu1 }
 0x1fa   : > { %v1049_v10 = vadd.f32 %v1425_v9, %v1691_v45  ;;  %v1040_v11 = vpop.f32.mrb[25].mxu1 }
 0x1fb   : > { %v1041_v12 = vadd.f32 %v1040_v11, %v1687_v26  ;;  %v1426_v13 = vpop.f32.mrb[26].mxu1 }
 0x1fc   : > { %v1057_v14 = vmax.f32 %v1049_v10, 0.0  ;;  %v1052_v15 = vadd.f32 %v1426_v13, %v1693_v46  ;;  %v1043_v16 = vpop.f32.mrb[27].mxu1 }
 0x1fd   : > { %v1055_v17 = vmax.f32 %v1041_v12, 0.0  ;;  %v1044_v18 = vadd.f32 %v1043_v16, %v1689_v42 }
 0x1fe   : > { %v1061_v19 = vmax.f32 %v955_v3, %v1057_v14  ;;  %v1058_v20 = vmax.f32 %v1052_v15, 0.0 }
 0x1ff   : > { %v1059_v21 = vmax.f32 %v953_v5, %v1055_v17  ;;  %v1056_v23 = vmax.f32 %v1044_v18, 0.0 }
 0x200   : > { %v1062_v24 = vmax.f32 %v956_v7, %v1058_v20 }
 0x201   : > { %v1060_v25 = vmax.f32 %v954_v8, %v1056_v23  ;;  %v1437_v27 = vpop.f32.mrb[28].mxu1 }
 0x202   : > { %v1155_v28 = vadd.f32 %v1437_v27, %v1691_v45  ;;  %v1146_v29 = vpop.f32.mrb[29].mxu1 }
 0x203   : > { %v1147_v31 = vadd.f32 %v1146_v29, %v1687_v26  ;;  %v1438_v32 = vpop.f32.mrb[30].mxu1 }
 0x204   : > { %v1163_v33 = vmax.f32 %v1155_v28, 0.0  ;;  %v1158_v34 = vadd.f32 %v1438_v32, %v1693_v46  ;;  %v1149_v35 = vpop.f32.mrb[31].mxu1 }
 0x205   : > { %v1161_v36 = vmax.f32 %v1147_v31, 0.0  ;;  %v1150_v37 = vadd.f32 %v1149_v35, %v1689_v42 }
 0x206   : > { %v1167_v38 = vmax.f32 %v1061_v19, %v1163_v33  ;;  %v1164_v39 = vmax.f32 %v1158_v34, 0.0 }
 0x207   : > { %v1165_v41 = vmax.f32 %v1059_v21, %v1161_v36  ;;  %v1162_v45 = vmax.f32 %v1150_v37, 0.0 }
 0x208   : > { %1171 = vst [vmem:[%s255_s26 + $0x10] sm:$0xff] %v1167_v38  ;;  %v1168_v30 = vmax.f32 %v1062_v24, %v1164_v39 }
 0x209   : > { %1169 = vst [vmem:[%s255_s26] sm:$0xff] %v1165_v41  ;;  %v1166_v26 = vmax.f32 %v1060_v25, %v1162_v45 }
 0x20a   : > { %1172 = vst [vmem:[%s255_s26 + $0x18] sm:$0xff] %v1168_v30 }
 0x20b   : > { %1170 = vst [vmem:[%s255_s26 + $0x8] sm:$0xff] %v1166_v26 }
 0x20c PF: > { %s15_s20 = sadd.s32 1, %s1493_s20   ;;  %s1747_s18 = smov %s1489_s19 }
 0x20d   : > { %p12_p5 = scmp.ge.s32.totalorder %s15_s20, 4   ;;  %s1748_s19 = smov %s1750_s21 }
 0x20f   :  { %14 = sbr.rel (!%p12_p5) target bundleno = 2 (0x2), region = 77 }

</bundles_post_ra>
